<compile_context>
chip_gen: v5e
topology: v5e:2x2
jax: 0.10.0
libtpu: 0.0.40
codegen_flags: <defaults>
</compile_context>

<pallas_src>
import functools

import jax
import jax.numpy as jnp
from jax.experimental import pallas as pl
from jax.experimental.pallas import tpu as pltpu


_MASK = -1.0e30   # finite "minus infinity": avoids (-inf) - (-inf) -> NaN


# -----------------------------------------------------------------------------
# Pallas kernel: online-softmax (flash) attention over KV blocks, optional bias.
# Blocks (all [B, H, S, D] / [B, H, S, S] layout):
#   q / out : (1, Hb, Tq, D)      k / v : (1, Hb, Tk, D)
#   bias    : (1, Hb, Tq, Tk)     (bias variant only)
# Scratch (f32, persistent across the kv grid axis):
#   m: (Hb, Tq, 1) running max   l: (Hb, Tq, 1) denom   acc: (Hb, Tq, D)
# -----------------------------------------------------------------------------
def _flash_attn_kernel(*refs, scale, has_bias, need_kv_mask, seq_len, block_kv):
    if has_bias:
        q_ref, k_ref, v_ref, bias_ref, o_ref, m_sc, l_sc, acc_sc = refs
    else:
        q_ref, k_ref, v_ref, o_ref, m_sc, l_sc, acc_sc = refs
        bias_ref = None

    kv = pl.program_id(3)

    @pl.when(kv == 0)
    def _init():
        # Finite init => alpha/p below are always exp(finite - finite).
        m_sc[...] = jnp.full(m_sc.shape, _MASK, dtype=m_sc.dtype)
        l_sc[...] = jnp.zeros_like(l_sc)
        acc_sc[...] = jnp.zeros_like(acc_sc)

    # Fold the softmax scale into q (hb*tq*D elements once) instead of scaling
    # the hb*tq*tk f32 score tile on every kv step; stay in native dtype so the
    # MXU sees bf16/f32 operands directly.
    q = (q_ref[0] * scale).astype(q_ref.dtype)   # (Hb, Tq, D)
    k = k_ref[0]                                 # (Hb, Tk, D)
    v = v_ref[0]                                 # (Hb, Tk, D)

    # scores = (q*scale) @ k^T, contraction over D, f32 accumulation; the
    # transpose is expressed via contraction dims (no materialized K^T).
    s = jnp.einsum("hqd,hkd->hqk", q, k, preferred_element_type=jnp.float32)
    if has_bias:
        s = s + bias_ref[0].astype(jnp.float32)
    if need_kv_mask:
        # Tail mask for padded key positions (S was padded to a 128 multiple).
        col = jax.lax.broadcasted_iota(jnp.int32, s.shape, 2)
        s = jnp.where(col + kv * block_kv < seq_len, s, _MASK)

    m_prev = m_sc[...]
    m_new = jnp.maximum(m_prev, jnp.max(s, axis=-1, keepdims=True))
    alpha = jnp.exp(m_prev - m_new)
    p = jnp.exp(s - m_new)
    l_sc[...] = alpha * l_sc[...] + jnp.sum(p, axis=-1, keepdims=True)
    acc_sc[...] = alpha * acc_sc[...] + jnp.einsum(
        "hqk,hkd->hqd", p.astype(v.dtype), v,
        preferred_element_type=jnp.float32)
    m_sc[...] = m_new

    @pl.when(kv == pl.num_programs(3) - 1)
    def _finalize():
        l = l_sc[...]
        l = jnp.where(l > 0.0, l, jnp.ones_like(l))   # fully-masked rows -> 0
        inv_l = pl.reciprocal(l, approx=True)         # EUP slot, once per q block
        # TODO(synk): for D < 128 this store is lane-padded (vst.msk); folding
        # (hb, D) into a >=128-wide minor dim would make it lane-dense.
        o_ref[0] = (acc_sc[...] * inv_l).astype(o_ref.dtype)


# -----------------------------------------------------------------------------
# Chip-gated tile / head-block selection.
# -----------------------------------------------------------------------------
@functools.lru_cache(maxsize=1)
def _chip_profile():
    try:
        kind = jax.devices()[0].device_kind.lower()
    except Exception:
        kind = ""
    try:
        vmem = int(pltpu.get_tpu_info().vmem_capacity_bytes)
    except Exception:
        vmem = 64 * 1024 * 1024                        # conservative (v7x) default
    # ~96 MiB scoped limit on 128 MiB parts (v5e/v6e), ~48 MiB on 64 MiB v7x.
    vmem_limit = min((vmem * 3) // 4, 96 * 1024 * 1024)
    big_vmem = vmem >= 100 * 1024 * 1024
    is_v5e = ("v5 lite" in kind) or ("v5e" in kind) or ("v5litepod" in kind)
    two_tc = "7" in kind                               # v7x: 2 TCs share the grid
    return {
        "vmem_limit": vmem_limit,
        "vmem_budget": int(0.6 * vmem_limit),          # kernel working-set target
        # Bigger q tiles cut K/V re-reads on 128 MiB parts; cap at 512 on v7x.
        "tq_candidates": (1024, 512, 256, 128) if big_vmem else (512, 256, 128),
        "tk_candidates": (512, 256, 128),
        # v5e: single vector-store slot, no bf16 VALU -> keep f32 s/p spills small.
        "score_budget": (2 if is_v5e else 4) * 1024 * 1024,
        "parallel_target": 2 if two_tc else 1,
    }


def _vmem_bill(hb, tq, tk, D, qkv_bytes, bias_bytes, has_bias):
    # Double-buffered q/k/v/out/bias blocks + f32 scratch + f32 s/p intermediates.
    blocks = 2 * hb * tq * D * qkv_bytes              # q
    blocks += 2 * 2 * hb * tk * D * qkv_bytes         # k, v
    blocks += 2 * hb * tq * D * qkv_bytes             # out
    if has_bias:
        blocks += 2 * hb * tq * tk * bias_bytes
    scratch = hb * tq * D * 4 + 2 * hb * tq * 4
    intermediates = 2 * hb * tq * tk * 4               # s and p in f32
    return blocks + scratch + intermediates


def _pick_head_block(H, tq, tk, D, qkv_bytes, bias_bytes, has_bias, profile,
                     outer_parallel):
    """Largest head block that fits the VMEM/score budgets and still leaves
    enough parallel grid blocks for every TensorCore."""
    feasible = []
    for hb in range(H, 0, -1):
        if H % hb:
            continue
        score_bytes = hb * tq * tk * 4 * (2 if has_bias else 1)
        if score_bytes > profile["score_budget"]:
            continue
        if _vmem_bill(hb, tq, tk, D, qkv_bytes, bias_bytes, has_bias) > profile["vmem_budget"]:
            continue
        feasible.append(hb)
    if not feasible:
        return None
    for hb in feasible:                                # descending
        if outer_parallel * (H // hb) >= profile["parallel_target"]:
            return hb
    return feasible[0]


def _select_tiling(B, H, S_pad, D, qkv_bytes, bias_bytes, has_bias, profile,
                   block_q=None, block_kv=None):
    tq_cands = ([block_q] if block_q else
                [t for t in profile["tq_candidates"] if S_pad % t == 0])
    tk_cands = ([block_kv] if block_kv else
                [t for t in profile["tk_candidates"] if S_pad % t == 0])
    for tq in tq_cands:
        for tk in tk_cands:
            hb = _pick_head_block(H, tq, tk, D, qkv_bytes, bias_bytes, has_bias,
                                  profile, outer_parallel=B * (S_pad // tq))
            if hb is not None:
                return tq, tk, hb
    return min(S_pad, 128), min(S_pad, 128), 1         # always fits


# -----------------------------------------------------------------------------
# Wrapper: local attention in [B, H, S, D] layout.
# -----------------------------------------------------------------------------
def local_attention_pallas(q_bhsd, k_bhsd, v_bhsd, bias_bhss=None, *,
                           block_q=None, block_kv=None,
                           bias_compute_dtype=jnp.bfloat16):
    """q/k/v: [B, H, S, D]; bias: [B, H, S, S] or None -> context [B, H, S, D]."""
    B, H, S, D = q_bhsd.shape
    scale = float(1.0 / (D ** 0.5))
    has_bias = bias_bhss is not None

    if has_bias and bias_compute_dtype is not None and bias_bhss.dtype != bias_compute_dtype:
        # The bias is the only O(B*H*S^2) HBM stream; bf16 halves the dominant
        # DMA traffic and the double-buffered bias VMEM footprint.
        bias_bhss = bias_bhss.astype(bias_compute_dtype)

    # Irregular S: pad to a 128 multiple + in-kernel key tail mask so per-step
    # VMEM stays constant and the online-softmax streaming structure is kept.
    S_pad = ((S + 127) // 128) * 128
    need_kv_mask = S_pad != S
    if need_kv_mask:
        pad4 = ((0, 0), (0, 0), (0, S_pad - S), (0, 0))
        q_bhsd = jnp.pad(q_bhsd, pad4)
        k_bhsd = jnp.pad(k_bhsd, pad4)
        v_bhsd = jnp.pad(v_bhsd, pad4)
        if has_bias:
            bias_bhss = jnp.pad(
                bias_bhss, ((0, 0), (0, 0), (0, S_pad - S), (0, S_pad - S)))

    profile = _chip_profile()
    bias_bytes = bias_bhss.dtype.itemsize if has_bias else 0
    tq, tk, hb = _select_tiling(B, H, S_pad, D, q_bhsd.dtype.itemsize, bias_bytes,
                                has_bias, profile, block_q, block_kv)
    assert S_pad % tq == 0 and S_pad % tk == 0 and H % hb == 0, (S_pad, tq, tk, H, hb)

    grid = (B, H // hb, S_pad // tq, S_pad // tk)

    q_spec = pl.BlockSpec((1, hb, tq, D), lambda b, h, qi, ki: (b, h, qi, 0))
    kv_spec = pl.BlockSpec((1, hb, tk, D), lambda b, h, qi, ki: (b, h, ki, 0))
    out_spec = pl.BlockSpec((1, hb, tq, D), lambda b, h, qi, ki: (b, h, qi, 0))

    in_specs = [q_spec, kv_spec, kv_spec]
    operands = [q_bhsd, k_bhsd, v_bhsd]
    if has_bias:
        # TODO(synk): sweep pipeline_mode=pl.Buffered(3) here on 128 MiB parts
        # (hides bias-DMA jitter on v6e) once VMEM headroom is confirmed.
        in_specs.append(
            pl.BlockSpec((1, hb, tq, tk), lambda b, h, qi, ki: (b, h, qi, ki)))
        operands.append(bias_bhss)

    kernel = functools.partial(
        _flash_attn_kernel, scale=scale, has_bias=has_bias,
        need_kv_mask=need_kv_mask, seq_len=S, block_kv=tk)

    out = pl.pallas_call(
        kernel,
        out_shape=jax.ShapeDtypeStruct((B, H, S_pad, D), q_bhsd.dtype),
        grid_spec=pltpu.PrefetchScalarGridSpec(
            num_scalar_prefetch=0,
            grid=grid,
            in_specs=in_specs,
            out_specs=out_spec,
            scratch_shapes=[
                pltpu.VMEM((hb, tq, 1), jnp.float32),   # running max
                pltpu.VMEM((hb, tq, 1), jnp.float32),   # running denom
                pltpu.VMEM((hb, tq, D), jnp.float32),   # running accumulator
            ],
        ),
        compiler_params=pltpu.CompilerParams(
            dimension_semantics=("parallel", "parallel", "parallel",
                                 "arbitrary"),
            vmem_limit_bytes=profile["vmem_limit"],
        ),
    )(*operands)

    if need_kv_mask:
        out = out[:, :, :S, :]
    return out


# -----------------------------------------------------------------------------
# Distributed glue (sequence-parallel world size == 1 -> identities).
# -----------------------------------------------------------------------------
SP_WORLD_SIZE = 1


def seq_all_to_all(x, scatter_idx, gather_idx):
    # tensor_split along scatter_idx, all_to_all within a group of size 1
    # (identity), concat along gather_idx.
    chunks = jnp.split(x, SP_WORLD_SIZE, axis=scatter_idx)
    return jnp.concatenate(chunks, axis=gather_idx)


def merge_global_token0(x, merge_dim):
    del merge_dim  # single rank -> no duplicated global tokens to merge
    return x


def extend_global_token0(x, extend_dim):
    del extend_dim  # single rank -> nothing to re-replicate
    return x


# -----------------------------------------------------------------------------
# DistributedAttentionAll2all.forward equivalent.
# -----------------------------------------------------------------------------
def distributed_attention_all2all(query, key, value, attn_bias, edge_index,
                                  scatter_idx=2, gather_idx=1):
    """query/key/value: [B, S, H, D]; attn_bias: [B, H, S, S] or None."""
    del edge_index  # TODO(synk): edge_index is consumed only by graph-specific
    #                local attentions; the generic SDPA path ignores it.

    q = seq_all_to_all(query, scatter_idx, gather_idx)
    k = seq_all_to_all(key, scatter_idx, gather_idx)
    v = seq_all_to_all(value, scatter_idx, gather_idx)

    q = merge_global_token0(q, merge_dim=1)
    k = merge_global_token0(k, merge_dim=1)
    v = merge_global_token0(v, merge_dim=1)

    if attn_bias is not None:
        bias = seq_all_to_all(attn_bias, 1, 2)
        bias = merge_global_token0(bias, merge_dim=2)
    else:
        bias = None   # bias-free kernel variant; no zero tensor is materialized

    # [B, S, H, D] -> [B, H, S, D].
    # TODO(synk): feeding BSHD directly would drop ~8 HBM passes, but the
    # in-kernel (tq,hb,D)->(hb,tq,D) relayout needs a non-leading-batch
    # dot_general or a major-dim transpose, neither of which lowers reliably in
    # current Mosaic; keeping the explicit XLA transposes until that lands.
    q_bhsd = jnp.transpose(q, (0, 2, 1, 3))
    k_bhsd = jnp.transpose(k, (0, 2, 1, 3))
    v_bhsd = jnp.transpose(v, (0, 2, 1, 3))

    ctx_bhsd = local_attention_pallas(q_bhsd, k_bhsd, v_bhsd, bias)

    context = jnp.transpose(ctx_bhsd, (0, 2, 1, 3))          # back to [B,S,H,D]
    context = extend_global_token0(context, extend_dim=1)
    return seq_all_to_all(context, gather_idx, scatter_idx)


# -----------------------------------------------------------------------------
# Pure-JAX references for sanity checks.
# -----------------------------------------------------------------------------
def _ref_attention_bhsd(q, k, v, bias=None):
    scale = 1.0 / (q.shape[-1] ** 0.5)
    s = jnp.einsum("bhqd,bhkd->bhqk",
                   q.astype(jnp.float32), k.astype(jnp.float32)) * scale
    if bias is not None:
        s = s + bias.astype(jnp.float32)
    p = jax.nn.softmax(s, axis=-1)
    return jnp.einsum("bhqk,bhkd->bhqd", p, v.astype(jnp.float32)).astype(q.dtype)


def _reference_attention(query, key, value, attn_bias=None):
    q = jnp.transpose(query, (0, 2, 1, 3))
    k = jnp.transpose(key, (0, 2, 1, 3))
    v = jnp.transpose(value, (0, 2, 1, 3))
    o = _ref_attention_bhsd(q, k, v, attn_bias)
    return jnp.transpose(o, (0, 2, 1, 3))


def _round_bias(b):
    # The kernel path intentionally streams the bias in bf16 (perf tradeoff);
    # compare like-to-like.
    return b.astype(jnp.bfloat16).astype(jnp.float32)


if __name__ == "__main__":
    B, S, H, D = 2, 16, 4, 32
    key0 = jax.random.PRNGKey(0)
    kq, kk, kv, kb = jax.random.split(key0, 4)

    query = jax.random.normal(kq, (B, S, H, D), dtype=jnp.float32)
    key_t = jax.random.normal(kk, (B, S, H, D), dtype=jnp.float32)
    value = jax.random.normal(kv, (B, S, H, D), dtype=jnp.float32)
    attn_bias = 0.1 * jax.random.normal(kb, (B, H, S, S), dtype=jnp.float32)
    edge_index = jnp.zeros((2, 8), dtype=jnp.int32)  # unused by generic SDPA

    # 1) bias path (S=16 -> padded to 128, exercises key masking + bf16 bias)
    out = distributed_attention_all2all(query, key_t, value, attn_bias, edge_index)
    out = jax.block_until_ready(out)
    ref = _reference_attention(query, key_t, value, _round_bias(attn_bias))
    assert out.shape == (B, S, H, D), out.shape
    assert jnp.allclose(out, ref, atol=2e-3, rtol=2e-3), "bias path mismatch"

    # 2) bias-free path (no zero bias materialized; separate kernel variant)
    out_nb = distributed_attention_all2all(query, key_t, value, None, edge_index)
    out_nb = jax.block_until_ready(out_nb)
    ref_nb = _reference_attention(query, key_t, value, None)
    assert jnp.allclose(out_nb, ref_nb, atol=2e-3, rtol=2e-3), "no-bias mismatch"

    # 3) multi KV-block path (exercise the online-softmax accumulation + bias)
    B2, H2, S2, D2 = 1, 2, 256, 32
    k1, k2, k3, k4 = jax.random.split(jax.random.PRNGKey(1), 4)
    q2 = jax.random.normal(k1, (B2, H2, S2, D2), dtype=jnp.float32)
    kk2 = jax.random.normal(k2, (B2, H2, S2, D2), dtype=jnp.float32)
    v2 = jax.random.normal(k3, (B2, H2, S2, D2), dtype=jnp.float32)
    b2 = 0.1 * jax.random.normal(k4, (B2, H2, S2, S2), dtype=jnp.float32)
    out2 = local_attention_pallas(q2, kk2, v2, b2, block_q=128, block_kv=128)
    out2 = jax.block_until_ready(out2)
    ref2 = _ref_attention_bhsd(q2, kk2, v2, _round_bias(b2))
    assert jnp.allclose(out2, ref2, atol=2e-3, rtol=2e-3), "tiled path mismatch"

    # 4) irregular S with multiple KV blocks (padding + tail-mask path, no bias)
    B3, H3, S3, D3 = 1, 2, 200, 64
    j1, j2, j3 = jax.random.split(jax.random.PRNGKey(2), 3)
    q3 = jax.random.normal(j1, (B3, H3, S3, D3), dtype=jnp.float32)
    kk3 = jax.random.normal(j2, (B3, H3, S3, D3), dtype=jnp.float32)
    v3 = jax.random.normal(j3, (B3, H3, S3, D3), dtype=jnp.float32)
    out3 = local_attention_pallas(q3, kk3, v3, None, block_q=128, block_kv=128)
    out3 = jax.block_until_ready(out3)
    ref3 = _ref_attention_bhsd(q3, kk3, v3, None)
    assert out3.shape == (B3, H3, S3, D3), out3.shape
    assert jnp.allclose(out3, ref3, atol=2e-3, rtol=2e-3), "masked path mismatch"

    print("KERNEL_OK")
</pallas_src>

<mosaic_0001>
module attributes {stable_mosaic.version = 11 : i64} {
  func.func @_flash_attn_kernel(%arg0: i32, %arg1: i32, %arg2: i32, %arg3: i32, %arg4: memref<1x4x128x32xf32, #tpu.memory_space<vmem>>, %arg5: memref<1x4x128x32xf32, #tpu.memory_space<vmem>>, %arg6: memref<1x4x128x32xf32, #tpu.memory_space<vmem>>, %arg7: memref<1x4x128x128xbf16, #tpu.memory_space<vmem>>, %arg8: memref<1x4x128x32xf32, #tpu.memory_space<vmem>>, %arg9: memref<4x128x1xf32, #tpu.memory_space<vmem>>, %arg10: memref<4x128x1xf32, #tpu.memory_space<vmem>>, %arg11: memref<4x128x32xf32, #tpu.memory_space<vmem>>) attributes {dimension_semantics = [#tpu.dimension_semantics<parallel>, #tpu.dimension_semantics<parallel>, #tpu.dimension_semantics<parallel>, #tpu.dimension_semantics<arbitrary>], iteration_bounds = array<i64: 2, 1, 1, 1>, scalar_prefetch = 0 : i64, scratch_operands = 3 : i64, tpu.core_type = #tpu.core_type<tc>, window_params = [{transform_indices = @transform_0, window_bounds = array<i64: 1, 4, 128, 32>}, {transform_indices = @transform_1, window_bounds = array<i64: 1, 4, 128, 32>}, {transform_indices = @transform_2, window_bounds = array<i64: 1, 4, 128, 32>}, {transform_indices = @transform_3, window_bounds = array<i64: 1, 4, 128, 128>}, {transform_indices = @transform_4, window_bounds = array<i64: 1, 4, 128, 32>}]} {
    %c0_i32 = arith.constant 0 : i32
    %0 = arith.cmpi eq, %arg3, %c0_i32 : i32
    %1 = arith.extui %0 : i1 to i32
    %c0_i32_0 = arith.constant 0 : i32
    %2 = arith.cmpi ne, %1, %c0_i32_0 : i32
    scf.if %2 {
      %cst_41 = arith.constant -1.000000e+30 : f32
      %49 = vector.broadcast %cst_41 : f32 to vector<4x128x1xf32>
      %c0_42 = arith.constant 0 : index
      %c0_43 = arith.constant 0 : index
      %c0_44 = arith.constant 0 : index
      %50 = vector.load %arg9[%c0_42, %c0_43, %c0_44] : memref<4x128x1xf32, #tpu.memory_space<vmem>>, vector<4x128x1xf32>
      tpu.vector_store %arg9[%c0_42, %c0_43, %c0_44], %49 {strides = array<i32>} : memref<4x128x1xf32, #tpu.memory_space<vmem>>, vector<4x128x1xf32>,
      %cst_45 = arith.constant 0.000000e+00 : f32
      %51 = vector.broadcast %cst_45 : f32 to vector<4x128x1xf32>
      %c0_46 = arith.constant 0 : index
      %c0_47 = arith.constant 0 : index
      %c0_48 = arith.constant 0 : index
      %52 = vector.load %arg10[%c0_46, %c0_47, %c0_48] : memref<4x128x1xf32, #tpu.memory_space<vmem>>, vector<4x128x1xf32>
      tpu.vector_store %arg10[%c0_46, %c0_47, %c0_48], %51 {strides = array<i32>} : memref<4x128x1xf32, #tpu.memory_space<vmem>>, vector<4x128x1xf32>,
      %cst_49 = arith.constant 0.000000e+00 : f32
      %53 = vector.broadcast %cst_49 : f32 to vector<4x128x32xf32>
      %c0_50 = arith.constant 0 : index
      %c0_51 = arith.constant 0 : index
      %c0_52 = arith.constant 0 : index
      %54 = vector.load %arg11[%c0_50, %c0_51, %c0_52] : memref<4x128x32xf32, #tpu.memory_space<vmem>>, vector<4x128x32xf32>
      tpu.vector_store %arg11[%c0_50, %c0_51, %c0_52], %53 {strides = array<i32>} : memref<4x128x32xf32, #tpu.memory_space<vmem>>, vector<4x128x32xf32>,
    } else {
    }
    %c0 = arith.constant 0 : index
    %c0_1 = arith.constant 0 : index
    %c0_2 = arith.constant 0 : index
    %c0_3 = arith.constant 0 : index
    %3 = vector.load %arg4[%c0, %c0_1, %c0_2, %c0_3] : memref<1x4x128x32xf32, #tpu.memory_space<vmem>>, vector<1x4x128x32xf32>
    %4 = vector.shape_cast %3 : vector<1x4x128x32xf32> to vector<4x128x32xf32>
    %cst = arith.constant 0.176776692 : f32
    %5 = vector.broadcast %cst : f32 to vector<4x128x32xf32>
    %6 = arith.mulf %4, %5 : vector<4x128x32xf32>
    %c0_4 = arith.constant 0 : index
    %c0_5 = arith.constant 0 : index
    %c0_6 = arith.constant 0 : index
    %c0_7 = arith.constant 0 : index
    %7 = vector.load %arg5[%c0_4, %c0_5, %c0_6, %c0_7] : memref<1x4x128x32xf32, #tpu.memory_space<vmem>>, vector<1x4x128x32xf32>
    %8 = vector.shape_cast %7 : vector<1x4x128x32xf32> to vector<4x128x32xf32>
    %c0_8 = arith.constant 0 : index
    %c0_9 = arith.constant 0 : index
    %c0_10 = arith.constant 0 : index
    %c0_11 = arith.constant 0 : index
    %9 = vector.load %arg6[%c0_8, %c0_9, %c0_10, %c0_11] : memref<1x4x128x32xf32, #tpu.memory_space<vmem>>, vector<1x4x128x32xf32>
    %10 = vector.shape_cast %9 : vector<1x4x128x32xf32> to vector<4x128x32xf32>
    "tpu.trace_start"() <{level = 10 : i32, message = "hqd,hkd->hqk"}> : () -> ()
    %cst_12 = arith.constant dense<0.000000e+00> : vector<4x128x128xf32>
    %11 = tpu.matmul %6, %8, %cst_12 {dimension_numbers = #tpu.dot_dimension_numbers<[2], [2], [1], [1], [0, 0, 0, 1, 1, 1], [0], [0]>} : vector<4x128x32xf32>, vector<4x128x32xf32>, vector<4x128x128xf32> -> vector<4x128x128xf32>
    "tpu.trace_stop"() : () -> ()
    %c0_13 = arith.constant 0 : index
    %c0_14 = arith.constant 0 : index
    %c0_15 = arith.constant 0 : index
    %c0_16 = arith.constant 0 : index
    %12 = vector.load %arg7[%c0_13, %c0_14, %c0_15, %c0_16] : memref<1x4x128x128xbf16, #tpu.memory_space<vmem>>, vector<1x4x128x128xbf16>
    %13 = vector.shape_cast %12 : vector<1x4x128x128xbf16> to vector<4x128x128xbf16>
    %14 = arith.extf %13 : vector<4x128x128xbf16> to vector<4x128x128xf32>
    %15 = arith.addf %11, %14 : vector<4x128x128xf32>
    %16 = tpu.iota {dimensions = array<i32: 2>} : vector<4x128x128xi32>
    %c128_i32 = arith.constant 128 : i32
    %17 = arith.muli %arg3, %c128_i32 : i32
    %18 = vector.broadcast %17 : i32 to vector<4x128x128xi32>
    %19 = arith.addi %16, %18 : vector<4x128x128xi32>
    %c16_i32 = arith.constant 16 : i32
    %20 = vector.broadcast %c16_i32 : i32 to vector<4x128x128xi32>
    %21 = arith.cmpi slt, %19, %20 : vector<4x128x128xi32>
    %cst_17 = arith.constant -1.000000e+30 : f32
    %22 = vector.broadcast %cst_17 : f32 to vector<4x128x128xf32>
    %23 = arith.select %21, %15, %22 : vector<4x128x128xi1>, vector<4x128x128xf32>
    %c0_18 = arith.constant 0 : index
    %c0_19 = arith.constant 0 : index
    %c0_20 = arith.constant 0 : index
    %24 = vector.load %arg9[%c0_18, %c0_19, %c0_20] : memref<4x128x1xf32, #tpu.memory_space<vmem>>, vector<4x128x1xf32>
    %cst_21 = arith.constant dense<0xFF800000> : vector<4x128xf32>
    %25 = vector.multi_reduction <maximumf>, %23, %cst_21 [2] : vector<4x128x128xf32> to vector<4x128xf32>
    %26 = vector.shape_cast %25 : vector<4x128xf32> to vector<4x128x1xf32>
    %27 = arith.maximumf %24, %26 : vector<4x128x1xf32>
    %28 = arith.subf %24, %27 : vector<4x128x1xf32>
    %29 = math.exp %28 : vector<4x128x1xf32>
    %30 = vector.broadcast %27 : vector<4x128x1xf32> to vector<4x128x128xf32>
    %31 = arith.subf %23, %30 : vector<4x128x128xf32>
    %32 = math.exp %31 : vector<4x128x128xf32>
    %c0_22 = arith.constant 0 : index
    %c0_23 = arith.constant 0 : index
    %c0_24 = arith.constant 0 : index
    %33 = vector.load %arg10[%c0_22, %c0_23, %c0_24] : memref<4x128x1xf32, #tpu.memory_space<vmem>>, vector<4x128x1xf32>
    %34 = arith.mulf %29, %33 : vector<4x128x1xf32>
    %cst_25 = arith.constant dense<0.000000e+00> : vector<4x128xf32>
    %35 = vector.multi_reduction <add>, %32, %cst_25 [2] : vector<4x128x128xf32> to vector<4x128xf32>
    %36 = vector.shape_cast %35 : vector<4x128xf32> to vector<4x128x1xf32>
    %37 = arith.addf %34, %36 : vector<4x128x1xf32>
    %c0_26 = arith.constant 0 : index
    %c0_27 = arith.constant 0 : index
    %c0_28 = arith.constant 0 : index
    %38 = vector.load %arg10[%c0_26, %c0_27, %c0_28] : memref<4x128x1xf32, #tpu.memory_space<vmem>>, vector<4x128x1xf32>
    tpu.vector_store %arg10[%c0_26, %c0_27, %c0_28], %37 {strides = array<i32>} : memref<4x128x1xf32, #tpu.memory_space<vmem>>, vector<4x128x1xf32>,
    %c0_29 = arith.constant 0 : index
    %c0_30 = arith.constant 0 : index
    %c0_31 = arith.constant 0 : index
    %39 = vector.load %arg11[%c0_29, %c0_30, %c0_31] : memref<4x128x32xf32, #tpu.memory_space<vmem>>, vector<4x128x32xf32>
    %40 = vector.broadcast %29 : vector<4x128x1xf32> to vector<4x128x32xf32>
    %41 = arith.mulf %40, %39 : vector<4x128x32xf32>
    "tpu.trace_start"() <{level = 10 : i32, message = "hqk,hkd->hqd"}> : () -> ()
    %cst_32 = arith.constant dense<0.000000e+00> : vector<4x128x32xf32>
    %42 = tpu.matmul %32, %10, %cst_32 {dimension_numbers = #tpu.dot_dimension_numbers<[2], [1], [1], [2], [0, 0, 0, 1, 1, 2], [0], [0]>} : vector<4x128x128xf32>, vector<4x128x32xf32>, vector<4x128x32xf32> -> vector<4x128x32xf32>
    "tpu.trace_stop"() : () -> ()
    %43 = arith.addf %41, %42 : vector<4x128x32xf32>
    %c0_33 = arith.constant 0 : index
    %c0_34 = arith.constant 0 : index
    %c0_35 = arith.constant 0 : index
    %44 = vector.load %arg11[%c0_33, %c0_34, %c0_35] : memref<4x128x32xf32, #tpu.memory_space<vmem>>, vector<4x128x32xf32>
    tpu.vector_store %arg11[%c0_33, %c0_34, %c0_35], %43 {strides = array<i32>} : memref<4x128x32xf32, #tpu.memory_space<vmem>>, vector<4x128x32xf32>,
    %c0_36 = arith.constant 0 : index
    %c0_37 = arith.constant 0 : index
    %c0_38 = arith.constant 0 : index
    %45 = vector.load %arg9[%c0_36, %c0_37, %c0_38] : memref<4x128x1xf32, #tpu.memory_space<vmem>>, vector<4x128x1xf32>
    tpu.vector_store %arg9[%c0_36, %c0_37, %c0_38], %27 {strides = array<i32>} : memref<4x128x1xf32, #tpu.memory_space<vmem>>, vector<4x128x1xf32>,
    %c0_i32_39 = arith.constant 0 : i32
    %46 = arith.cmpi eq, %arg3, %c0_i32_39 : i32
    %47 = arith.extui %46 : i1 to i32
    %c0_i32_40 = arith.constant 0 : i32
    %48 = arith.cmpi ne, %47, %c0_i32_40 : i32
    scf.if %48 {
      %c0_41 = arith.constant 0 : index
      %c0_42 = arith.constant 0 : index
      %c0_43 = arith.constant 0 : index
      %49 = vector.load %arg10[%c0_41, %c0_42, %c0_43] : memref<4x128x1xf32, #tpu.memory_space<vmem>>, vector<4x128x1xf32>
      %cst_44 = arith.constant 0.000000e+00 : f32
      %50 = vector.broadcast %cst_44 : f32 to vector<4x128x1xf32>
      %51 = arith.cmpf ogt, %49, %50 : vector<4x128x1xf32>
      %cst_45 = arith.constant 1.000000e+00 : f32
      %52 = vector.broadcast %cst_45 : f32 to vector<4x128x1xf32>
      %53 = arith.select %51, %49, %52 : vector<4x128x1xi1>, vector<4x128x1xf32>
      %54 = tpu.reciprocal %53 {approx = true} : vector<4x128x1xf32> -> vector<4x128x1xf32>
      %c0_46 = arith.constant 0 : index
      %c0_47 = arith.constant 0 : index
      %c0_48 = arith.constant 0 : index
      %55 = vector.load %arg11[%c0_46, %c0_47, %c0_48] : memref<4x128x32xf32, #tpu.memory_space<vmem>>, vector<4x128x32xf32>
      %56 = vector.broadcast %54 : vector<4x128x1xf32> to vector<4x128x32xf32>
      %57 = arith.mulf %55, %56 : vector<4x128x32xf32>
      %c0_49 = arith.constant 0 : index
      %c0_50 = arith.constant 0 : index
      %c0_51 = arith.constant 0 : index
      %c0_52 = arith.constant 0 : index
      %58 = vector.load %arg8[%c0_49, %c0_50, %c0_51, %c0_52] : memref<1x4x128x32xf32, #tpu.memory_space<vmem>>, vector<1x4x128x32xf32>
      %59 = vector.shape_cast %58 : vector<1x4x128x32xf32> to vector<4x128x32xf32>
      %60 = vector.shape_cast %57 : vector<4x128x32xf32> to vector<1x4x128x32xf32>
      tpu.vector_store %arg8[%c0_49, %c0_50, %c0_51, %c0_52], %60 {strides = array<i32>} : memref<1x4x128x32xf32, #tpu.memory_space<vmem>>, vector<1x4x128x32xf32>,
    } else {
    }
    return
  }
  func.func @transform_0(%arg0: i32, %arg1: i32, %arg2: i32, %arg3: i32) -> (i32, i32, i32, i32) {
    %c0_i32 = arith.constant 0 : i32
    %c0_i32_0 = arith.constant 0 : i32
    return %arg0, %arg1, %arg2, %c0_i32 : i32, i32, i32, i32
  }
  func.func @transform_1(%arg0: i32, %arg1: i32, %arg2: i32, %arg3: i32) -> (i32, i32, i32, i32) {
    %c0_i32 = arith.constant 0 : i32
    %c0_i32_0 = arith.constant 0 : i32
    return %arg0, %arg1, %arg3, %c0_i32 : i32, i32, i32, i32
  }
  func.func @transform_2(%arg0: i32, %arg1: i32, %arg2: i32, %arg3: i32) -> (i32, i32, i32, i32) {
    %c0_i32 = arith.constant 0 : i32
    %c0_i32_0 = arith.constant 0 : i32
    return %arg0, %arg1, %arg3, %c0_i32 : i32, i32, i32, i32
  }
  func.func @transform_3(%arg0: i32, %arg1: i32, %arg2: i32, %arg3: i32) -> (i32, i32, i32, i32) {
    %c0_i32 = arith.constant 0 : i32
    return %arg0, %arg1, %arg2, %arg3 : i32, i32, i32, i32
  }
  func.func @transform_4(%arg0: i32, %arg1: i32, %arg2: i32, %arg3: i32) -> (i32, i32, i32, i32) {
    %c0_i32 = arith.constant 0 : i32
    %c0_i32_0 = arith.constant 0 : i32
    return %arg0, %arg1, %arg2, %c0_i32 : i32, i32, i32, i32
  }
}

</mosaic_0001>

<bundles_post_ra>
// kernel: tpu_custom_call.1
= control target key start
LH: loop header
LB: loop body
LE: loop exit
PB: predicated region body
PF: predicated region fallthrough
CT: control target
= control target key end

     0   :  { %s5740_s15 = smov 0   ;;  %s5742_s16 = smov 0   ;;  %s8519_s0 = inlined_call_operand.vmem [shape: f32[2,4,128,32], index: 0, kind: input, shape index: {}]   ;;  %s8520_s1 = inlined_call_operand.vmem [shape: f32[2,4,128,32], index: 1, kind: input, shape index: {}]   ;;  %s8521_s2 = inlined_call_operand.vmem [shape: f32[2,4,128,32], index: 2, kind: input, shape index: {}]   ;;  %s8522_s3 = inlined_call_operand.vmem [shape: bf16[2,4,128,128], index: 3, kind: input, shape index: {}]   ;;  %s8523_s4 = inlined_call_operand.vmem [shape: f32[2,4,128,32], index: 4, kind: output, shape index: {}]  }
   0x1   :  { %s5744_s17 = smov 0  }
   0x2 LB: > { %s40_s18 = sadd.s32 1, %s5706_s16  ;;  %p4969_p0 = scmp.ge.s32.totalorder %s5710_s17, 1  ;;  %s5710_s17 = sphi %s5744_s17, %s14_s17   ;;  %s5706_s16 = sphi %s5742_s16, %s9043_s16   ;;  %s5702_s15 = sphi %s5740_s15, %s9042_s15  }
   0x3   : > { %p42_p1 = scmp.ge.s32.totalorder %s40_s18, 2  ;;  %p287_p2 = scmp.lt.s32.totalorder %s5710_s17, 3 }
   0x5   : > { %s9045_s18 = smov (%p42_p1, %s40_s18), 0  ;;  %p288_p3 = pnand %p4969_p0, %p287_p2 }
   0x7   : > { %291 = sbr.rel (%p288_p3) target bundleno = 1387 (0x56b), region = 36 }
   0xc   : > { %p378_p4 = scmp.lt.s32.totalorder %s5702_s15, 1  ;;  %vm592_vm0 = vcmask 261120   ;;  %vm463_vm2 = vcmask 7168  }
   0xe   : > { %s9047_s15 = smov (!%p378_p4, %s5702_s15), 1 }
   0xf   : > { %s5761_s19 = sshll.u32 %s9047_s15, 9  ;;  %s5113_s26 = sshll.u32 %s9047_s15, 8 }
  0x10   : > { %s5767_s22 = scalar_lea.vmem %s8520_s1, %s5761_s19  ;;  %s5886_s25 = scalar_lea.vmem %s8519_s0, %s5761_s19 }
  0x11   : > { %v800_v0 = vld [vmem:[%s5767_s22 + $0x78] sm:$0xff]  ;;  %v799_v3 = vld [vmem:[%s5767_s22 + $0x70] sm:$0xff]  ;;  %v798_v8 = vld [vmem:[%s5767_s22 + $0x68] sm:$0xff]  ;;  %s6019_s29 = scalar_lea.vmem %s8522_s3, %s5113_s26  ;;  %s6964_s6 = scalar_lea.vmem %s8521_s2, %s5761_s19 }
  0x12   : > { %v832_v1 = vld [vmem:[%s5767_s22 + $0x178] sm:$0xff]  ;;  %4980 = vmatpush.xpose.msk.msra.mxu0 %vm592_vm0, %v800_v0  ;;  %v831_v4 = vld [vmem:[%s5767_s22 + $0x170] sm:$0xff]  ;;  %v830_v9 = vld [vmem:[%s5767_s22 + $0x168] sm:$0xff]  ;;  %s8369_s9 = scalar_lea.vmem %s8523_s4, %s5761_s19 }
  0x13   : > { %v848_v2 = vld [vmem:[%s5767_s22 + $0x1f8] sm:$0xff]  ;;  %5044 = vmatpush.xpose.msk.msra.mxu2 %vm592_vm0, %v832_v1  ;;  %v847_v6 = vld [vmem:[%s5767_s22 + $0x1f0] sm:$0xff]  ;;  %v846_v10 = vld [vmem:[%s5767_s22 + $0x1e8] sm:$0xff] }
  0x14   : > { %5076 = vmatpush.xpose.msk.msra.mxu3 %vm592_vm0, %v848_v2  ;;  %v816_v5 = vld [vmem:[%s5767_s22 + $0xf8] sm:$0xff]  ;;  %v815_v7 = vld [vmem:[%s5767_s22 + $0xf0] sm:$0xff]  ;;  %v814_v11 = vld [vmem:[%s5767_s22 + $0xe8] sm:$0xff] }
  0x15   : > { %5012 = vmatpush.xpose.msk.msra.mxu1 %vm592_vm0, %v816_v5  ;;  %v797_v12 = vld [vmem:[%s5767_s22 + $0x60] sm:$0xff]  ;;  %v796_v16 = vld [vmem:[%s5767_s22 + $0x58] sm:$0xff]  ;;  %v795_v20 = vld [vmem:[%s5767_s22 + $0x50] sm:$0xff] }
  0x16   : > { %4981 = vmatpush.xpose.msk.msra.mxu0 %vm592_vm0, %v799_v3  ;;  %v829_v13 = vld [vmem:[%s5767_s22 + $0x160] sm:$0xff]  ;;  %v828_v17 = vld [vmem:[%s5767_s22 + $0x158] sm:$0xff]  ;;  %v827_v21 = vld [vmem:[%s5767_s22 + $0x150] sm:$0xff] }
  0x17   : > { %5045 = vmatpush.xpose.msk.msra.mxu2 %vm592_vm0, %v831_v4  ;;  %v845_v14 = vld [vmem:[%s5767_s22 + $0x1e0] sm:$0xff]  ;;  %v844_v18 = vld [vmem:[%s5767_s22 + $0x1d8] sm:$0xff]  ;;  %v843_v22 = vld [vmem:[%s5767_s22 + $0x1d0] sm:$0xff] }
  0x18   : > { %5077 = vmatpush.xpose.msk.msra.mxu3 %vm592_vm0, %v847_v6  ;;  %v813_v15 = vld [vmem:[%s5767_s22 + $0xe0] sm:$0xff]  ;;  %v812_v19 = vld [vmem:[%s5767_s22 + $0xd8] sm:$0xff]  ;;  %v811_v23 = vld [vmem:[%s5767_s22 + $0xd0] sm:$0xff] }
  0x19   : > { %5013 = vmatpush.xpose.msk.msra.mxu1 %vm592_vm0, %v815_v7  ;;  %v794_v24 = vld [vmem:[%s5767_s22 + $0x48] sm:$0xff]  ;;  %v793_v28 = vld [vmem:[%s5767_s22 + $0x40] sm:$0xff]  ;;  %v792_v32 = vld [vmem:[%s5767_s22 + $0x38] sm:$0xff] }
  0x1a   : > { %4982 = vmatpush.xpose.msk.msra.mxu0 %vm592_vm0, %v798_v8  ;;  %v826_v25 = vld [vmem:[%s5767_s22 + $0x148] sm:$0xff]  ;;  %v825_v29 = vld [vmem:[%s5767_s22 + $0x140] sm:$0xff]  ;;  %v824_v33 = vld [vmem:[%s5767_s22 + $0x138] sm:$0xff] }
  0x1b   : > { %5046 = vmatpush.xpose.msk.msra.mxu2 %vm592_vm0, %v830_v9  ;;  %v842_v26 = vld [vmem:[%s5767_s22 + $0x1c8] sm:$0xff]  ;;  %v841_v30 = vld [vmem:[%s5767_s22 + $0x1c0] sm:$0xff]  ;;  %v840_v34 = vld [vmem:[%s5767_s22 + $0x1b8] sm:$0xff] }
  0x1c   : > { %5078 = vmatpush.xpose.msk.msra.mxu3 %vm592_vm0, %v846_v10  ;;  %v810_v27 = vld [vmem:[%s5767_s22 + $0xc8] sm:$0xff]  ;;  %v809_v31 = vld [vmem:[%s5767_s22 + $0xc0] sm:$0xff]  ;;  %v808_v35 = vld [vmem:[%s5767_s22 + $0xb8] sm:$0xff] }
  0x1d   : > { %5014 = vmatpush.xpose.msk.msra.mxu1 %vm592_vm0, %v814_v11  ;;  %v791_v36 = vld [vmem:[%s5767_s22 + $0x30] sm:$0xff]  ;;  %v790_v40 = vld [vmem:[%s5767_s22 + $0x28] sm:$0xff]  ;;  %v789_v44 = vld [vmem:[%s5767_s22 + $0x20] sm:$0xff] }
  0x1e   : > { %4983 = vmatpush.xpose.msk.msra.mxu0 %vm592_vm0, %v797_v12  ;;  %v823_v37 = vld [vmem:[%s5767_s22 + $0x130] sm:$0xff]  ;;  %v822_v41 = vld [vmem:[%s5767_s22 + $0x128] sm:$0xff]  ;;  %v821_v45 = vld [vmem:[%s5767_s22 + $0x120] sm:$0xff] }
  0x1f   : > { %5047 = vmatpush.xpose.msk.msra.mxu2 %vm592_vm0, %v829_v13  ;;  %v839_v38 = vld [vmem:[%s5767_s22 + $0x1b0] sm:$0xff]  ;;  %v838_v42 = vld [vmem:[%s5767_s22 + $0x1a8] sm:$0xff]  ;;  %v837_v46 = vld [vmem:[%s5767_s22 + $0x1a0] sm:$0xff] }
  0x20   : > { %5079 = vmatpush.xpose.msk.msra.mxu3 %vm592_vm0, %v845_v14  ;;  %v807_v39 = vld [vmem:[%s5767_s22 + $0xb0] sm:$0xff]  ;;  %v806_v43 = vld [vmem:[%s5767_s22 + $0xa8] sm:$0xff]  ;;  %v805_v47 = vld [vmem:[%s5767_s22 + $0xa0] sm:$0xff] }
  0x21   : > { %5015 = vmatpush.xpose.msk.msra.mxu1 %vm592_vm0, %v813_v15  ;;  %v788_v48 = vld [vmem:[%s5767_s22 + $0x18] sm:$0xff]  ;;  %v787_v52 = vld [vmem:[%s5767_s22 + $0x10] sm:$0xff]  ;;  %v786_v56 = vld [vmem:[%s5767_s22 + $0x8] sm:$0xff] }
  0x22   : > { %4984 = vmatpush.xpose.msk.msra.mxu0 %vm592_vm0, %v796_v16  ;;  %v820_v49 = vld [vmem:[%s5767_s22 + $0x118] sm:$0xff]  ;;  %v819_v53 = vld [vmem:[%s5767_s22 + $0x110] sm:$0xff]  ;;  %v818_v57 = vld [vmem:[%s5767_s22 + $0x108] sm:$0xff] }
  0x23   : > { %5048 = vmatpush.xpose.msk.msra.mxu2 %vm592_vm0, %v828_v17  ;;  %v836_v50 = vld [vmem:[%s5767_s22 + $0x198] sm:$0xff]  ;;  %v835_v54 = vld [vmem:[%s5767_s22 + $0x190] sm:$0xff]  ;;  %v834_v58 = vld [vmem:[%s5767_s22 + $0x188] sm:$0xff] }
  0x24   : > { %5080 = vmatpush.xpose.msk.msra.mxu3 %vm592_vm0, %v844_v18  ;;  %v804_v51 = vld [vmem:[%s5767_s22 + $0x98] sm:$0xff]  ;;  %v803_v55 = vld [vmem:[%s5767_s22 + $0x90] sm:$0xff]  ;;  %v802_v59 = vld [vmem:[%s5767_s22 + $0x88] sm:$0xff] }
  0x25   : > { %5016 = vmatpush.xpose.msk.msra.mxu1 %vm592_vm0, %v812_v19  ;;  %v657_v60 = vld [vmem:[%s5886_s25] sm:$0xff]  ;;  %v690_v8 = vld [vmem:[%s5886_s25 + $0x108] sm:$0xff]  ;;  %v691_v16 = vld [vmem:[%s5886_s25 + $0x110] sm:$0xff] }
  0x26   : > { %4985 = vmatpush.xpose.msk.msra.mxu0 %vm592_vm0, %v795_v20  ;;  %v689_v61 = vld [vmem:[%s5886_s25 + $0x100] sm:$0xff]  ;;  %v721_v3 = vmul.f32 0.17677669, %v657_v60  ;;  %v658_v9 = vld [vmem:[%s5886_s25 + $0x8] sm:$0xff]  ;;  %v754_v12 = vmul.f32 0.17677669, %v690_v8 }
  0x27   : > { %5049 = vmatpush.xpose.msk.msra.mxu2 %vm592_vm0, %v827_v21  ;;  %v785_v62 = vld [vmem:[%s5767_s22] sm:$0xff]  ;;  %v753_v4 = vmul.f32 0.17677669, %v689_v61  ;;  %v706_v10 = vld [vmem:[%s5886_s25 + $0x188] sm:$0xff]  ;;  %v722_v13 = vmul.f32 0.17677669, %v658_v9 }
  0x28   : > { %5081 = vmatpush.xpose.msk.msra.mxu3 %vm592_vm0, %v843_v22  ;;  %v817_v63 = vld [vmem:[%s5767_s22 + $0x100] sm:$0xff]  ;;  %v674_v11 = vld [vmem:[%s5886_s25 + $0x88] sm:$0xff]  ;;  %v770_v14 = vmul.f32 0.17677669, %v706_v10  ;;  %v659_v17 = vld [vmem:[%s5886_s25 + $0x10] sm:$0xff] }
  0x29   : > { %5017 = vmatpush.xpose.msk.msra.mxu1 %vm592_vm0, %v811_v23  ;;  %v705_v0 = vld [vmem:[%s5886_s25 + $0x180] sm:$0xff]  ;;  %v738_v15 = vmul.f32 0.17677669, %v674_v11  ;;  %v707_v18 = vld [vmem:[%s5886_s25 + $0x190] sm:$0xff]  ;;  %v755_v20 = vmul.f32 0.17677669, %v691_v16 }
  0x2a   : > { %4986 = vmatpush.xpose.msk.msra.mxu0 %vm592_vm0, %v794_v24  ;;  %v833_v1 = vld [vmem:[%s5767_s22 + $0x180] sm:$0xff]  ;;  %v769_v6 = vmul.f32 0.17677669, %v705_v0  ;;  %v675_v19 = vld [vmem:[%s5886_s25 + $0x90] sm:$0xff]  ;;  %v723_v21 = vmul.f32 0.17677669, %v659_v17 }
  0x2b   : > { %5050 = vmatpush.xpose.msk.msra.mxu2 %vm592_vm0, %v826_v25  ;;  %v673_v2 = vld [vmem:[%s5886_s25 + $0x80] sm:$0xff]  ;;  %v771_v22 = vmul.f32 0.17677669, %v707_v18  ;;  %v739_v23 = vmul.f32 0.17677669, %v675_v19  ;;  %v692_v24 = vld [vmem:[%s5886_s25 + $0x118] sm:$0xff] }
  0x2c   : > { %5082 = vmatpush.xpose.msk.msra.mxu3 %vm592_vm0, %v842_v26  ;;  %v801_v5 = vld [vmem:[%s5767_s22 + $0x80] sm:$0xff]  ;;  %v737_v7 = vmul.f32 0.17677669, %v673_v2  ;;  %v660_v25 = vld [vmem:[%s5886_s25 + $0x18] sm:$0xff]  ;;  %v666_v8 = vld [vmem:[%s5886_s25 + $0x48] sm:$0xff] }
  0x2d   : > { %5018 = vmatpush.xpose.msk.msra.mxu1 %vm592_vm0, %v810_v27  ;;  %v708_v26 = vld [vmem:[%s5886_s25 + $0x198] sm:$0xff]  ;;  %v665_v0 = vld [vmem:[%s5886_s25 + $0x40] sm:$0xff]  ;;  %v698_v9 = vld [vmem:[%s5886_s25 + $0x148] sm:$0xff] }
  0x2e   : > { %4987 = vmatpush.xpose.msk.msra.mxu0 %vm592_vm0, %v793_v28  ;;  %v676_v27 = vld [vmem:[%s5886_s25 + $0x98] sm:$0xff]  ;;  %v756_v28 = vmul.f32 0.17677669, %v692_v24  ;;  %v713_v2 = vld [vmem:[%s5886_s25 + $0x1c0] sm:$0xff]  ;;  %v714_v10 = vld [vmem:[%s5886_s25 + $0x1c8] sm:$0xff] }
  0x2f   : > { %5051 = vmatpush.xpose.msk.msra.mxu2 %vm592_vm0, %v825_v29  ;;  %v724_v29 = vmul.f32 0.17677669, %v660_v25  ;;  %v682_v11 = vld [vmem:[%s5886_s25 + $0xc8] sm:$0xff]  ;;  %v699_v16 = vld [vmem:[%s5886_s25 + $0x150] sm:$0xff]  ;;  %v668_v24 = vld [vmem:[%s5886_s25 + $0x58] sm:$0xff] }
  0x30   : > { %5083 = vmatpush.xpose.msk.msra.mxu3 %vm592_vm0, %v841_v30  ;;  %v772_v30 = vmul.f32 0.17677669, %v708_v26  ;;  %v667_v17 = vld [vmem:[%s5886_s25 + $0x50] sm:$0xff]  ;;  %v700_v25 = vld [vmem:[%s5886_s25 + $0x158] sm:$0xff] }
  0x31   : > { %5019 = vmatpush.xpose.msk.msra.mxu1 %vm592_vm0, %v809_v31  ;;  %v740_v31 = vmul.f32 0.17677669, %v676_v27  ;;  %v715_v18 = vld [vmem:[%s5886_s25 + $0x1d0] sm:$0xff]  ;;  %v716_v26 = vld [vmem:[%s5886_s25 + $0x1d8] sm:$0xff] }
  0x32   : > { %4988 = vmatpush.xpose.msk.msra.mxu0 %vm592_vm0, %v792_v32  ;;  %v661_v32 = vld [vmem:[%s5886_s25 + $0x20] sm:$0xff]  ;;  %v683_v19 = vld [vmem:[%s5886_s25 + $0xd0] sm:$0xff]  ;;  %v684_v27 = vld [vmem:[%s5886_s25 + $0xd8] sm:$0xff] }
  0x33   : > { %5052 = vmatpush.xpose.msk.msra.mxu2 %vm592_vm0, %v824_v33  ;;  %v693_v33 = vld [vmem:[%s5886_s25 + $0x120] sm:$0xff] }
  0x34   : > { %5084 = vmatpush.xpose.msk.msra.mxu3 %vm592_vm0, %v840_v34  ;;  %v709_v34 = vld [vmem:[%s5886_s25 + $0x1a0] sm:$0xff] }
  0x35   : > { %5020 = vmatpush.xpose.msk.msra.mxu1 %vm592_vm0, %v808_v35  ;;  %v677_v35 = vld [vmem:[%s5886_s25 + $0xa0] sm:$0xff] }
  0x36   : > { %4989 = vmatpush.xpose.msk.msra.mxu0 %vm592_vm0, %v791_v36  ;;  %v725_v36 = vmul.f32 0.17677669, %v661_v32  ;;  %v669_v32 = vld [vmem:[%s5886_s25 + $0x60] sm:$0xff] }
  0x37   : > { %5053 = vmatpush.xpose.msk.msra.mxu2 %vm592_vm0, %v823_v37  ;;  %v757_v37 = vmul.f32 0.17677669, %v693_v33  ;;  %v701_v33 = vld [vmem:[%s5886_s25 + $0x160] sm:$0xff] }
  0x38   : > { %5085 = vmatpush.xpose.msk.msra.mxu3 %vm592_vm0, %v839_v38  ;;  %v773_v38 = vmul.f32 0.17677669, %v709_v34  ;;  %v733_v34 = vmul.f32 0.17677669, %v669_v32 }
  0x39   : > { %5021 = vmatpush.xpose.msk.msra.mxu1 %vm592_vm0, %v807_v39  ;;  %v741_v39 = vmul.f32 0.17677669, %v677_v35  ;;  %v765_v35 = vmul.f32 0.17677669, %v701_v33 }
  0x3a   : > { %4990 = vmatpush.xpose.msk.msra.mxu0 %vm592_vm0, %v790_v40  ;;  %v662_v40 = vld [vmem:[%s5886_s25 + $0x28] sm:$0xff] }
  0x3b   : > { %5054 = vmatpush.xpose.msk.msra.mxu2 %vm592_vm0, %v822_v41  ;;  %v694_v41 = vld [vmem:[%s5886_s25 + $0x128] sm:$0xff] }
  0x3c   : > { %5086 = vmatpush.xpose.msk.msra.mxu3 %vm592_vm0, %v838_v42  ;;  %v710_v42 = vld [vmem:[%s5886_s25 + $0x1a8] sm:$0xff] }
  0x3d   : > { %5022 = vmatpush.xpose.msk.msra.mxu1 %vm592_vm0, %v806_v43  ;;  %v678_v43 = vld [vmem:[%s5886_s25 + $0xa8] sm:$0xff] }
  0x3e   : > { %4991 = vmatpush.xpose.msk.msra.mxu0 %vm592_vm0, %v789_v44  ;;  %v726_v44 = vmul.f32 0.17677669, %v662_v40  ;;  %v702_v40 = vld [vmem:[%s5886_s25 + $0x168] sm:$0xff] }
  0x3f   : > { %5055 = vmatpush.xpose.msk.msra.mxu2 %vm592_vm0, %v821_v45  ;;  %v758_v45 = vmul.f32 0.17677669, %v694_v41  ;;  %v766_v41 = vmul.f32 0.17677669, %v702_v40 }
  0x40   : > { %5087 = vmatpush.xpose.msk.msra.mxu3 %vm592_vm0, %v837_v46  ;;  %v774_v46 = vmul.f32 0.17677669, %v710_v42  ;;  %v670_v42 = vld [vmem:[%s5886_s25 + $0x68] sm:$0xff] }
  0x41   : > { %5023 = vmatpush.xpose.msk.msra.mxu1 %vm592_vm0, %v805_v47  ;;  %v742_v47 = vmul.f32 0.17677669, %v678_v43  ;;  %v686_v43 = vld [vmem:[%s5886_s25 + $0xe8] sm:$0xff] }
  0x42   : > { %4992 = vmatpush.xpose.msk.msra.mxu0 %vm592_vm0, %v788_v48  ;;  %v663_v48 = vld [vmem:[%s5886_s25 + $0x30] sm:$0xff] }
  0x43   : > { %5056 = vmatpush.xpose.msk.msra.mxu2 %vm592_vm0, %v820_v49  ;;  %v695_v49 = vld [vmem:[%s5886_s25 + $0x130] sm:$0xff] }
  0x44   : > { %5088 = vmatpush.xpose.msk.msra.mxu3 %vm592_vm0, %v836_v50  ;;  %v711_v50 = vld [vmem:[%s5886_s25 + $0x1b0] sm:$0xff] }
  0x45   : > { %5024 = vmatpush.xpose.msk.msra.mxu1 %vm592_vm0, %v804_v51  ;;  %v679_v51 = vld [vmem:[%s5886_s25 + $0xb0] sm:$0xff] }
  0x46   : > { %4993 = vmatpush.xpose.msk.msra.mxu0 %vm592_vm0, %v787_v52  ;;  %v727_v52 = vmul.f32 0.17677669, %v663_v48  ;;  %v671_v48 = vld [vmem:[%s5886_s25 + $0x70] sm:$0xff] }
  0x47   : > { %5057 = vmatpush.xpose.msk.msra.mxu2 %vm592_vm0, %v819_v53  ;;  %v759_v53 = vmul.f32 0.17677669, %v695_v49  ;;  %v5116_v49 = vld [vmem:[%s6019_s29] sm:$0xff]  }
  0x48   : > { %5089 = vmatpush.xpose.msk.msra.mxu3 %vm592_vm0, %v835_v54  ;;  %v775_v54 = vmul.f32 0.17677669, %v711_v50  ;;  %v1686_v50 = vlaneseq }
  0x49   : > { %5025 = vmatpush.xpose.msk.msra.mxu1 %vm592_vm0, %v803_v55  ;;  %v743_v55 = vmul.f32 0.17677669, %v679_v51  ;;  %v735_v51 = vmul.f32 0.17677669, %v671_v48 }
  0x4a   : > { %4994 = vmatpush.xpose.msk.msra.mxu0 %vm592_vm0, %v786_v56  ;;  %v696_v56 = vld [vmem:[%s5886_s25 + $0x138] sm:$0xff] }
  0x4b   : > { %5058 = vmatpush.xpose.msk.msra.mxu2 %vm592_vm0, %v818_v57  ;;  %v664_v57 = vld [vmem:[%s5886_s25 + $0x38] sm:$0xff]  ;;  %v760_v60 = vmul.f32 0.17677669, %v696_v56 }
  0x4c   : > { %5090 = vmatpush.xpose.msk.msra.mxu3 %vm592_vm0, %v834_v58  ;;  %v712_v58 = vld [vmem:[%s5886_s25 + $0x1b8] sm:$0xff]  ;;  %v728_v61 = vmul.f32 0.17677669, %v664_v57 }
  0x4d   : > { %5026 = vmatpush.xpose.msk.msra.mxu1 %vm592_vm0, %v802_v59  ;;  %v680_v59 = vld [vmem:[%s5886_s25 + $0xb8] sm:$0xff] }
  0x4e   : > { %4995 = vmatpush.xpose.msk.msra.mxu0 %vm592_vm0, %v785_v62  ;;  %v776_v62 = vmul.f32 0.17677669, %v712_v58  ;;  %v6027_v58 = vand.u32 127, %v1686_v50 }
  0x4f   : > { %5059 = vmatpush.xpose.msk.msra.mxu2 %vm592_vm0, %v817_v63  ;;  %v744_v63 = vmul.f32 0.17677669, %v680_v59  ;;  %v5250_v59 = vld [vmem:[%s6019_s29 + $0x40] sm:$0xff]  }
  0x50   : > { %5091 = vmatpush.xpose.msk.msra.mxu3 %vm592_vm0, %v833_v1  ;;  %v697_v1 = vld [vmem:[%s5886_s25 + $0x140] sm:$0xff]  ;;  %vm1691_vm1 = vcmp.lt.s32.totalorder %v6027_v58, 16 }
  0x51   : > { %5027 = vmatpush.xpose.msk.msra.mxu1 %vm592_vm0, %v801_v5  ;;  %4996 = vmatmul.msk.f32.vlgmr.msra.gmra.mxu0 %vm592_vm0, %v721_v3  ;;  %v681_v3 = vld [vmem:[%s5886_s25 + $0xc0] sm:$0xff]  ;;  %v761_v5 = vmul.f32 0.17677669, %v697_v1 }
  0x52   : > { %5060 = vmatmul.msk.f32.vlgmr.msra.gmra.mxu2 %vm592_vm0, %v753_v4  ;;  %v729_v4 = vmul.f32 0.17677669, %v665_v0  ;;  %v5266_v1 = vld [vmem:[%s6019_s29 + $0xc0] sm:$0xff]  }
  0x53   : > { %5092 = vmatmul.msk.f32.vlgmr.msra.gmra.mxu3 %vm592_vm0, %v769_v6  ;;  %v777_v6 = vmul.f32 0.17677669, %v713_v2  ;;  %v672_v2 = vld [vmem:[%s5886_s25 + $0x78] sm:$0xff] }
  0x54   : > { %5028 = vmatmul.msk.f32.vlgmr.msra.gmra.mxu1 %vm592_vm0, %v737_v7  ;;  %v745_v7 = vmul.f32 0.17677669, %v681_v3 }
  0x59   : > { %4997 = vmatmul.msk.f32.gmra.mxu0 %vm592_vm0, %v722_v13  ;;  %v762_v13 = vmul.f32 0.17677669, %v698_v9 }
  0x5a   : > { %5061 = vmatmul.msk.f32.gmra.mxu2 %vm592_vm0, %v754_v12  ;;  %v730_v12 = vmul.f32 0.17677669, %v666_v8  ;;  %v5213_v8 = vunpack.c.l.bf16 %v5266_v1 }
  0x5b   : > { %5093 = vmatmul.msk.f32.gmra.mxu3 %vm592_vm0, %v770_v14  ;;  %v778_v14 = vmul.f32 0.17677669, %v714_v10 }
  0x5c   : > { %5029 = vmatmul.msk.f32.gmra.mxu1 %vm592_vm0, %v738_v15  ;;  %v746_v15 = vmul.f32 0.17677669, %v682_v11 }
  0x61   : > { %4998 = vmatmul.msk.f32.gmra.mxu0 %vm592_vm0, %v723_v21  ;;  %v731_v21 = vmul.f32 0.17677669, %v667_v17 }
  0x62   : > { %5062 = vmatmul.msk.f32.gmra.mxu2 %vm592_vm0, %v755_v20  ;;  %v763_v20 = vmul.f32 0.17677669, %v699_v16 }
  0x63   : > { %5094 = vmatmul.msk.f32.gmra.mxu3 %vm592_vm0, %v771_v22  ;;  %v779_v22 = vmul.f32 0.17677669, %v715_v18 }
  0x64   : > { %5030 = vmatmul.msk.f32.gmra.mxu1 %vm592_vm0, %v739_v23  ;;  %v747_v23 = vmul.f32 0.17677669, %v683_v19  ;;  %v5118_v19 = vunpack.c.h.bf16 %v5116_v49 }
  0x69   : > { %4999 = vmatmul.msk.f32.gmra.mxu0 %vm592_vm0, %v724_v29  ;;  %v764_v29 = vmul.f32 0.17677669, %v700_v25 }
  0x6a   : > { %5063 = vmatmul.msk.f32.gmra.mxu2 %vm592_vm0, %v756_v28  ;;  %v732_v28 = vmul.f32 0.17677669, %v668_v24 }
  0x6b   : > { %5095 = vmatmul.msk.f32.gmra.mxu3 %vm592_vm0, %v772_v30  ;;  %v780_v30 = vmul.f32 0.17677669, %v716_v26 }
  0x6c   : > { %5031 = vmatmul.msk.f32.gmra.mxu1 %vm592_vm0, %v740_v31  ;;  %v748_v31 = vmul.f32 0.17677669, %v684_v27 }
  0x71   : > { %5000 = vmatmul.msk.f32.gmra.mxu0 %vm592_vm0, %v725_v36  ;;  %v717_v36 = vld [vmem:[%s5886_s25 + $0x1e0] sm:$0xff] }
  0x72   : > { %5064 = vmatmul.msk.f32.gmra.mxu2 %vm592_vm0, %v757_v37  ;;  %v781_v37 = vmul.f32 0.17677669, %v717_v36  ;;  %v5259_v36 = vld [vmem:[%s6019_s29 + $0x88] sm:$0xff]  }
  0x73   : > { %5096 = vmatmul.msk.f32.gmra.mxu3 %vm592_vm0, %v773_v38  ;;  %v685_v38 = vld [vmem:[%s5886_s25 + $0xe0] sm:$0xff] }
  0x74   : > { %5032 = vmatmul.msk.f32.gmra.mxu1 %vm592_vm0, %v741_v39  ;;  %v749_v39 = vmul.f32 0.17677669, %v685_v38 }
  0x79   : > { %5001 = vmatmul.msk.f32.gmra.mxu0 %vm592_vm0, %v726_v44  ;;  %v734_v44 = vmul.f32 0.17677669, %v670_v42  ;;  %v5185_v42 = vunpack.c.l.bf16 %v5259_v36 }
  0x7a   : > { %5065 = vmatmul.msk.f32.gmra.mxu2 %vm592_vm0, %v758_v45  ;;  %v750_v45 = vmul.f32 0.17677669, %v686_v43 }
  0x7b   : > { %5097 = vmatmul.msk.f32.gmra.mxu3 %vm592_vm0, %v774_v46  ;;  %v718_v46 = vld [vmem:[%s5886_s25 + $0x1e8] sm:$0xff] }
  0x7c   : > { %5033 = vmatmul.msk.f32.gmra.mxu1 %vm592_vm0, %v742_v47  ;;  %v782_v47 = vmul.f32 0.17677669, %v718_v46 }
  0x81   : > { %5002 = vmatmul.msk.f32.gmra.mxu0 %vm592_vm0, %v727_v52  ;;  %v687_v52 = vld [vmem:[%s5886_s25 + $0xf0] sm:$0xff] }
  0x82   : > { %5066 = vmatmul.msk.f32.gmra.mxu2 %vm592_vm0, %v759_v53  ;;  %v703_v53 = vld [vmem:[%s5886_s25 + $0x170] sm:$0xff] }
  0x83   : > { %5098 = vmatmul.msk.f32.gmra.mxu3 %vm592_vm0, %v775_v54  ;;  %v719_v54 = vld [vmem:[%s5886_s25 + $0x1f0] sm:$0xff]  ;;  %v767_v56 = vmul.f32 0.17677669, %v703_v53 }
  0x84   : > { %5034 = vmatmul.msk.f32.gmra.mxu1 %vm592_vm0, %v743_v55  ;;  %v751_v55 = vmul.f32 0.17677669, %v687_v52  ;;  %v783_v57 = vmul.f32 0.17677669, %v719_v54  ;;  %v5244_v52 = vld [vmem:[%s6019_s29 + $0x10] sm:$0xff]  }
  0x89   : > { %5003 = vmatmul.msk.f32.gmra.mxu0 %vm592_vm0, %v728_v61  ;;  %v5149_v61 = vunpack.c.l.bf16 %v5250_v59 }
  0x8a   : > { %5067 = vmatmul.msk.f32.gmra.mxu2 %vm592_vm0, %v760_v60  ;;  %v5117_v60 = vunpack.c.l.bf16 %v5116_v49  ;;  %v5186_v49 = vunpack.c.h.bf16 %v5259_v36 }
  0x8b   : > { %5099 = vmatmul.msk.f32.gmra.mxu3 %vm592_vm0, %v776_v62 }
  0x8c   : > { %5035 = vmatmul.msk.f32.gmra.mxu1 %vm592_vm0, %v744_v63  ;;  %v5258_v63 = vld [vmem:[%s6019_s29 + $0x80] sm:$0xff]  }
  0x8d   : > { %v5182_v32 = vunpack.c.h.bf16 %v5258_v63 }
  0x91   : > { %5004 = vmatmul.msk.f32.gmra.mxu0 %vm592_vm0, %v729_v4  ;;  %v736_v4 = vmul.f32 0.17677669, %v672_v2 }
  0x92   : > { %5068 = vmatmul.msk.f32.gmra.mxu2 %vm592_vm0, %v761_v5 }
  0x93   : > { %5100 = vmatmul.msk.f32.gmra.mxu3 %vm592_vm0, %v777_v6 }
  0x94   : > { %5036 = vmatmul.msk.f32.gmra.mxu1 %vm592_vm0, %v745_v7  ;;  %v5181_v7 = vunpack.c.l.bf16 %v5258_v63 }
  0x99   : > { %5005 = vmatmul.msk.f32.gmra.mxu0 %vm592_vm0, %v730_v12 }
  0x9a   : > { %5069 = vmatmul.msk.f32.gmra.mxu2 %vm592_vm0, %v762_v13  ;;  %v5150_v13 = vunpack.c.h.bf16 %v5250_v59  ;;  %v5125_v59 = vunpack.c.l.bf16 %v5244_v52 }
  0x9b   : > { %5101 = vmatmul.msk.f32.gmra.mxu3 %vm592_vm0, %v778_v14 }
  0x9c   : > { %5037 = vmatmul.msk.f32.gmra.mxu1 %vm592_vm0, %v746_v15 }
  0xa1   : > { %5006 = vmatmul.msk.f32.gmra.mxu0 %vm592_vm0, %v731_v21  ;;  %v5214_v21 = vunpack.c.h.bf16 %v5266_v1 }
  0xa2   : > { %5070 = vmatmul.msk.f32.gmra.mxu2 %vm592_vm0, %v763_v20 }
  0xa3   : > { %5102 = vmatmul.msk.f32.gmra.mxu3 %vm592_vm0, %v779_v22  ;;  %v5243_v22 = vld [vmem:[%s6019_s29 + $0x8] sm:$0xff]  }
  0xa4   : > { %5038 = vmatmul.msk.f32.gmra.mxu1 %vm592_vm0, %v747_v23 }
  0xa9   : > { %5007 = vmatmul.msk.f32.gmra.mxu0 %vm592_vm0, %v732_v28  ;;  %v5121_v28 = vunpack.c.l.bf16 %v5243_v22 }
  0xaa   : > { %5071 = vmatmul.msk.f32.gmra.mxu2 %vm592_vm0, %v764_v29 }
  0xab   : > { %5103 = vmatmul.msk.f32.gmra.mxu3 %vm592_vm0, %v780_v30  ;;  %v5267_v30 = vld [vmem:[%s6019_s29 + $0xc8] sm:$0xff]  }
  0xac   : > { %5039 = vmatmul.msk.f32.gmra.mxu1 %vm592_vm0, %v748_v31  ;;  %v5218_v63 = vunpack.c.h.bf16 %v5267_v30 }
  0xb1   : > { %5008 = vmatmul.msk.f32.gmra.mxu0 %vm592_vm0, %v733_v34 }
  0xb2   : > { %5072 = vmatmul.msk.f32.gmra.mxu2 %vm592_vm0, %v765_v35  ;;  %v5217_v35 = vunpack.c.l.bf16 %v5267_v30 }
  0xb3   : > { %5104 = vmatmul.msk.f32.gmra.mxu3 %vm592_vm0, %v781_v37 }
  0xb4   : > { %5040 = vmatmul.msk.f32.gmra.mxu1 %vm592_vm0, %v749_v39  ;;  %v5251_v39 = vld [vmem:[%s6019_s29 + $0x48] sm:$0xff]  }
  0xb5   : > { %v5153_v46 = vunpack.c.l.bf16 %v5251_v39 }
  0xb9   : > { %5009 = vmatmul.msk.f32.gmra.mxu0 %vm592_vm0, %v734_v44 }
  0xba   : > { %5073 = vmatmul.msk.f32.gmra.mxu2 %vm592_vm0, %v766_v41 }
  0xbb   : > { %5105 = vmatmul.msk.f32.gmra.mxu3 %vm592_vm0, %v782_v47 }
  0xbc   : > { %5041 = vmatmul.msk.f32.gmra.mxu1 %vm592_vm0, %v750_v45 }
  0xc1   : > { %5010 = vmatmul.msk.f32.gmra.mxu0 %vm592_vm0, %v735_v51 }
  0xc2   : > { %5074 = vmatmul.msk.f32.gmra.mxu2 %vm592_vm0, %v767_v56  ;;  %v5122_v56 = vunpack.c.h.bf16 %v5243_v22 }
  0xc3   : > { %5106 = vmatmul.msk.f32.gmra.mxu3 %vm592_vm0, %v783_v57 }
  0xc4   : > { %5042 = vmatmul.msk.f32.gmra.mxu1 %vm592_vm0, %v751_v55 }
  0xc9   : > { %5011 = vmatmul.msk.f32.gmra.mxu0 %vm592_vm0, %v736_v4  ;;  %v5252_v4 = vld [vmem:[%s6019_s29 + $0x50] sm:$0xff]  }
  0xca   : > { %v5158_v30 = vunpack.c.h.bf16 %v5252_v4 }
  0xce   : > { %v1155_v62 = vpop.f32.mrf.mxu0 }
  0xcf   : > { %v1156_v0 = vadd.f32 %v5117_v60, %v1155_v62 }
  0xd1   : > { %v1316_v3 = vpop.f32.mrf.mxu1  ;;  %v6039_v5 = vsel %vm1691_vm1, %v1156_v0, -1e+30 }
  0xd2   : > { %v1317_v6 = vadd.f32 %v5149_v61, %v1316_v3  ;;  %1820 = vmax.xlane.f32.xlu0 %v6039_v5 }
  0xd4   : > { %v6045_v9 = vsel %vm1691_vm1, %v1317_v6, -1e+30  ;;  %v5260_v6 = vld [vmem:[%s6019_s29 + $0x90] sm:$0xff]  }
  0xd5   : > { %v1477_v10 = vpop.f32.mrf.mxu2  ;;  %1852 = vmax.xlane.f32.xlu1 %v6045_v9 }
  0xd6   : > { %v1478_v11 = vadd.f32 %v5181_v7, %v1477_v10  ;;  %v1638_v12 = vpop.f32.mrf.mxu3  ;;  %v1158_v15 = vpop.f32.mrf.mxu0  ;;  %v5154_v7 = vunpack.c.h.bf16 %v5251_v39 }
  0xd7   : > { %v1639_v14 = vadd.f32 %v5213_v8, %v1638_v12  ;;  %v1159_v24 = vadd.f32 %v5118_v19, %v1158_v15 }
  0xd8   : > { %v6050_v16 = vsel %vm1691_vm1, %v1478_v11, -1e+30  ;;  %v5157_v11 = vunpack.c.l.bf16 %v5252_v4 }
  0xd9   : > { %1884 = vmax.xlane.f32.xlu2 %v6050_v16  ;;  %v1319_v17 = vpop.f32.mrf.mxu1  ;;  %v6055_v18 = vsel %vm1691_vm1, %v1639_v14, -1e+30  ;;  %v6072_v33 = vsel %vm1691_vm1, %v1159_v24, -1e+30  ;;  %v5189_v14 = vunpack.c.l.bf16 %v5260_v6 }
  0xda   : > { %v1320_v20 = vadd.f32 %v5150_v13, %v1319_v17  ;;  %1916 = vmax.xlane.f32.xlu0 %v6055_v18 }
  0xdc   : > { %v6061_v26 = vsel %vm1691_vm1, %v1320_v20, -1e+30 }
  0xdd   : > { %v1480_v23 = vpop.f32.mrf.mxu2  ;;  %8697 = vst [vmem:[#allocation5_spill] sm:$0xff] %v6061_v26 }
  0xde   : > { %v1641_v25 = vpop.f32.mrf.mxu3  ;;  %v1161_v29 = vpop.f32.mrf.mxu0  ;;  %v1481_v40 = vadd.f32 %v5182_v32, %v1480_v23 }
  0xdf   : > { %v1642_v27 = vadd.f32 %v5214_v21, %v1641_v25  ;;  %v1162_v34 = vadd.f32 %v5121_v28, %v1161_v29  ;;  %v5268_v21 = vld [vmem:[%s6019_s29 + $0xd0] sm:$0xff]   ;;  %v5126_v25 = vunpack.c.h.bf16 %v5244_v52  ;;  %v704_v52 = vld [vmem:[%s5886_s25 + $0x178] sm:$0xff] }
  0xe0   : > { %v6089_v48 = vsel %vm1691_vm1, %v1481_v40, -1e+30 }
  0xe1   : > { %1854 = vmax.xlane.f32.xlu2 %v6061_v26  ;;  %v6067_v31 = vsel %vm1691_vm1, %v1642_v27, -1e+30  ;;  %v1322_v37 = vpop.f32.mrf.mxu1  ;;  %v6079_v44 = vsel %vm1691_vm1, %v1162_v34, -1e+30  ;;  %v5221_v27 = vunpack.c.l.bf16 %v5268_v21 }
  0xe2   : > { %1918 = vmax.xlane.f32.xlu1 %v6067_v31  ;;  %1822 = vmax.xlane.f32.xlu0 %v6072_v33  ;;  %v1323_v51 = vadd.f32 %v5153_v46, %v1322_v37  ;;  %v5245_v37 = vld [vmem:[%s6019_s29 + $0x18] sm:$0xff]  }
  0xe3   : > { %v5129_v46 = vunpack.c.l.bf16 %v5245_v37 }
  0xe4   : > { %v6103_v61 = vsel %vm1691_vm1, %v1323_v51, -1e+30 }
  0xe5   : > { %v1483_v38 = vpop.f32.mrf.mxu2  ;;  %8701 = vst [vmem:[#allocation9_spill] sm:$0xff] %v6103_v61 }
  0xe6   : > { %v1644_v41 = vpop.f32.mrf.mxu3  ;;  %v1164_v45 = vpop.f32.mrf.mxu0  ;;  %v1484_v50 = vadd.f32 %v5185_v42, %v1483_v38  ;;  %v5222_v42 = vunpack.c.h.bf16 %v5268_v21 }
  0xe7   : > { %v1645_v43 = vadd.f32 %v5217_v35, %v1644_v41  ;;  %v1165_v1 = vadd.f32 %v5122_v56, %v1164_v45  ;;  %v5190_v41 = vunpack.c.h.bf16 %v5260_v6 }
  0xe8   : > { %v6095_v57 = vsel %vm1691_vm1, %v1484_v50, -1e+30 }
  0xe9   : > { %v6083_v47 = vsel %vm1691_vm1, %v1645_v43, -1e+30  ;;  %v1325_v55 = vpop.f32.mrf.mxu1  ;;  %8699 = vst [vmem:[#allocation7_spill] sm:$0xff] %v6095_v57  ;;  %v6116_v10 = vsel %vm1691_vm1, %v1165_v1, -1e+30 }
  0xea   : > { %8698 = vst [vmem:[#allocation6_spill] sm:$0xff] %v6083_v47  ;;  %1920 = vmax.xlane.f32.xlu2 %v6083_v47  ;;  %1824 = vmax.xlane.f32.xlu1 %v6079_v44  ;;  %v1326_v17 = vadd.f32 %v5154_v7, %v1325_v55 }
  0xeb   : > { %1886 = vmax.xlane.f32.xlu0 %v6089_v48  ;;  %8703 = vst [vmem:[#allocation11_spill] sm:$0xff] %v6116_v10 }
  0xec   : > { %v6132_v24 = vsel %vm1691_vm1, %v1326_v17, -1e+30 }
  0xed   : > { %v1486_v53 = vpop.f32.mrf.mxu2  ;;  %8706 = vst [vmem:[#allocation14_spill] sm:$0xff] %v6132_v24 }
  0xee   : > { %v1487_v54 = vadd.f32 %v5186_v49, %v1486_v53  ;;  %v1167_v62 = vpop.f32.mrf.mxu0  ;;  %v1647_v0 = vpop.f32.mrf.mxu3  ;;  %v720_v49 = vld [vmem:[%s5886_s25 + $0x1f8] sm:$0xff]  ;;  %v768_v53 = vmul.f32 0.17677669, %v704_v52 }
  0xef   : > { %v1168_v2 = vadd.f32 %v5125_v59, %v1167_v62  ;;  %v1648_v3 = vadd.f32 %v5218_v63, %v1647_v0  ;;  %v784_v51 = vmul.f32 0.17677669, %v720_v49  ;;  %v5253_v59 = vld [vmem:[%s6019_s29 + $0x58] sm:$0xff]  }
  0xf0   : > { %v6099_v60 = vsel %vm1691_vm1, %v1487_v54, -1e+30  ;;  %v5261_v62 = vld [vmem:[%s6019_s29 + $0x98] sm:$0xff]   ;;  %5075 = vmatmul.msk.f32.gmra.mxu2 %vm592_vm0, %v768_v53 }
  0xf1   : > { %8700 = vst [vmem:[#allocation8_spill] sm:$0xff] %v6099_v60  ;;  %v6112_v8 = vsel %vm1691_vm1, %v1168_v2, -1e+30  ;;  %v6120_v12 = vsel %vm1691_vm1, %v1648_v3, -1e+30  ;;  %v1328_v13 = vpop.f32.mrf.mxu1  ;;  %5107 = vmatmul.msk.f32.gmra.mxu3 %vm592_vm0, %v784_v51  ;;  %v5269_v63 = vld [vmem:[%s6019_s29 + $0xd8] sm:$0xff]   ;;  %v5161_v3 = vunpack.c.l.bf16 %v5253_v59  ;;  %v5193_v4 = vunpack.c.l.bf16 %v5261_v62 }
  0xf2   : > { %1890 = vmax.xlane.f32.xlu2 %v6099_v60  ;;  %1888 = vmax.xlane.f32.xlu1 %v6095_v57  ;;  %8702 = vst [vmem:[#allocation10_spill] sm:$0xff] %v6112_v8  ;;  %v1329_v19 = vadd.f32 %v5157_v11, %v1328_v13  ;;  %v5225_v11 = vunpack.c.l.bf16 %v5269_v63  ;;  %v5226_v51 = vunpack.c.h.bf16 %v5269_v63  ;;  %v5270_v63 = vld [vmem:[%s6019_s29 + $0xe0] sm:$0xff]  }
  0xf3   : > { %1856 = vmax.xlane.f32.xlu0 %v6103_v61  ;;  %8704 = vst [vmem:[#allocation12_spill] sm:$0xff] %v6120_v12 }
  0xf4   : > { %v6128_v23 = vsel %vm1691_vm1, %v1329_v19, -1e+30 }
  0xf5   : > { %v1489_v15 = vpop.f32.mrf.mxu2  ;;  %8705 = vst [vmem:[#allocation13_spill] sm:$0xff] %v6128_v23 }
  0xf6   : > { %v1490_v20 = vadd.f32 %v5189_v14, %v1489_v15  ;;  %v1650_v22 = vpop.f32.mrf.mxu3  ;;  %v1170_v29 = vpop.f32.mrf.mxu0  ;;  %v688_v14 = vld [vmem:[%s5886_s25 + $0xf8] sm:$0xff] }
  0xf7   : > { %v1171_v34 = vadd.f32 %v5126_v25, %v1170_v29  ;;  %v1651_v35 = vadd.f32 %v5221_v27, %v1650_v22  ;;  %v752_v15 = vmul.f32 0.17677669, %v688_v14  ;;  %v5130_v27 = vunpack.c.h.bf16 %v5245_v37 }
  0xf8   : > { %v6136_v28 = vsel %vm1691_vm1, %v1490_v20, -1e+30  ;;  %v5162_v29 = vunpack.c.h.bf16 %v5253_v59  ;;  %v5229_v14 = vunpack.c.l.bf16 %v5270_v63 }
  0xf9   : > { %8707 = vst [vmem:[#allocation15_spill] sm:$0xff] %v6136_v28  ;;  %v1331_v32 = vpop.f32.mrf.mxu1  ;;  %v6144_v39 = vsel %vm1691_vm1, %v1171_v34, -1e+30  ;;  %v6148_v40 = vsel %vm1691_vm1, %v1651_v35, -1e+30  ;;  %5043 = vmatmul.msk.f32.gmra.mxu1 %vm592_vm0, %v752_v15  ;;  %v5194_v34 = vunpack.c.h.bf16 %v5261_v62 }
  0xfa   : > { %1828 = vmax.xlane.f32.xlu2 %v6112_v8  ;;  %1826 = vmax.xlane.f32.xlu1 %v6116_v10  ;;  %v1332_v36 = vadd.f32 %v5158_v30, %v1331_v32  ;;  %8708 = vst [vmem:[#allocation16_spill] sm:$0xff] %v6144_v39 }
  0xfb   : > { %1922 = vmax.xlane.f32.xlu0 %v6120_v12  ;;  %8709 = vst [vmem:[#allocation17_spill] sm:$0xff] %v6148_v40 }
  0xfc   : > { %v6152_v43 = vsel %vm1691_vm1, %v1332_v36, -1e+30 }
  0xfd   : > { %v1492_v38 = vpop.f32.mrf.mxu2  ;;  %8710 = vst [vmem:[#allocation18_spill] sm:$0xff] %v6152_v43 }
  0xfe   : > { %v1653_v45 = vpop.f32.mrf.mxu3  ;;  %v1173_v50 = vpop.f32.mrf.mxu0  ;;  %v1493_v54 = vadd.f32 %v5190_v41, %v1492_v38 }
  0xff   : > { %v1654_v55 = vadd.f32 %v5222_v42, %v1653_v45  ;;  %v1174_v56 = vadd.f32 %v5129_v46, %v1173_v50  ;;  %v5246_v42 = vld [vmem:[%s6019_s29 + $0x20] sm:$0xff]  }
 0x100   : > { %v6170_v2 = vsel %vm1691_vm1, %v1493_v54, -1e+30  ;;  %v6198_v45 = vld [vmem:[%s6019_s29 + $0x60] sm:$0xff]   ;;  %v5133_v50 = vunpack.c.l.bf16 %v5246_v42 }
 0x101   : > { %v1334_v0 = vpop.f32.mrf.mxu1  ;;  %v6166_v1 = vsel %vm1691_vm1, %v1654_v55, -1e+30  ;;  %8712 = vst [vmem:[#allocation20_spill] sm:$0xff] %v6170_v2  ;;  %v6174_v6 = vsel %vm1691_vm1, %v1174_v56, -1e+30  ;;  %v5165_v54 = vunpack.c.l.bf16 %v6198_v45 }
 0x102   : > { %1860 = vmax.xlane.f32.xlu2 %v6128_v23  ;;  %1858 = vmax.xlane.f32.xlu1 %v6132_v24  ;;  %8711 = vst [vmem:[#allocation19_spill] sm:$0xff] %v6166_v1  ;;  %v1335_v17 = vadd.f32 %v5161_v3, %v1334_v0  ;;  %v5262_v0 = vld [vmem:[%s6019_s29 + $0xa0] sm:$0xff]   ;;  %v5712_v3 = vmov -1e+30  }
 0x103   : > { %1892 = vmax.xlane.f32.xlu0 %v6136_v28  ;;  %8713 = vst [vmem:[#allocation21_spill] sm:$0xff] %v6174_v6 }
 0x104   : > { %v6187_v25 = vsel %vm1691_vm1, %v1335_v17, -1e+30  ;;  %464 = vst.msk [vmem:[#allocation2] sm:$0xff] %vm463_vm2, %v5712_v3 }
 0x105   : > { %v1495_v7 = vpop.f32.mrf.mxu2  ;;  %8715 = vst [vmem:[#allocation23_spill] sm:$0xff] %v6187_v25 }
 0x106   : > { %v1656_v13 = vpop.f32.mrf.mxu3  ;;  %v1496_v19 = vadd.f32 %v5193_v4, %v1495_v7  ;;  %v1176_v21 = vpop.f32.mrf.mxu0  ;;  %465 = vst.msk [vmem:[#allocation2 + $0x8] sm:$0xff] %vm463_vm2, %v5712_v3 }
 0x107   : > { %v1657_v20 = vadd.f32 %v5225_v11, %v1656_v13  ;;  %v1177_v36 = vadd.f32 %v5130_v27, %v1176_v21  ;;  %466 = vst.msk [vmem:[#allocation2 + $0x10] sm:$0xff] %vm463_vm2, %v5712_v3  ;;  %v5197_v13 = vunpack.c.l.bf16 %v5262_v0 }
 0x108   : > { %v6183_v22 = vsel %vm1691_vm1, %v1496_v19, -1e+30  ;;  %467 = vst.msk [vmem:[#allocation2 + $0x18] sm:$0xff] %vm463_vm2, %v5712_v3  ;;  %v5134_v19 = vunpack.c.h.bf16 %v5246_v42 }
 0x109   : > { %8714 = vst [vmem:[#allocation22_spill] sm:$0xff] %v6183_v22  ;;  %v6191_v30 = vsel %vm1691_vm1, %v1657_v20, -1e+30  ;;  %v1337_v32 = vpop.f32.mrf.mxu1  ;;  %v6206_v49 = vsel %vm1691_vm1, %v1177_v36, -1e+30  ;;  %v5166_v36 = vunpack.c.h.bf16 %v6198_v45 }
 0x10a   : > { %1830 = vmax.xlane.f32.xlu2 %v6144_v39  ;;  %1924 = vmax.xlane.f32.xlu1 %v6148_v40  ;;  %8716 = vst [vmem:[#allocation24_spill] sm:$0xff] %v6191_v30  ;;  %v1338_v38 = vadd.f32 %v5162_v29, %v1337_v32 }
 0x10b   : > { %1862 = vmax.xlane.f32.xlu0 %v6152_v43  ;;  %8718 = vst [vmem:[#allocation26_spill] sm:$0xff] %v6206_v49 }
 0x10c   : > { %v6202_v46 = vsel %vm1691_vm1, %v1338_v38, -1e+30  ;;  %468 = vst.msk [vmem:[#allocation2 + $0x20] sm:$0xff] %vm463_vm2, %v5712_v3  ;;  %v5198_v38 = vunpack.c.h.bf16 %v5262_v0 }
 0x10d   : > { %v1498_v35 = vpop.f32.mrf.mxu2  ;;  %8717 = vst [vmem:[#allocation25_spill] sm:$0xff] %v6202_v46 }
 0x10e   : > { %v1499_v41 = vadd.f32 %v5194_v34, %v1498_v35  ;;  %v1659_v37 = vpop.f32.mrf.mxu3  ;;  %v1179_v53 = vpop.f32.mrf.mxu0  ;;  %469 = vst.msk [vmem:[#allocation2 + $0x28] sm:$0xff] %vm463_vm2, %v5712_v3 }
 0x10f   : > { %v1180_v56 = vadd.f32 %v5133_v50, %v1179_v53  ;;  %v1660_v59 = vadd.f32 %v5226_v51, %v1659_v37  ;;  %470 = vst.msk [vmem:[#allocation2 + $0x30] sm:$0xff] %vm463_vm2, %v5712_v3  ;;  %v5230_v37 = vunpack.c.h.bf16 %v5270_v63 }
 0x110   : > { %v6210_v52 = vsel %vm1691_vm1, %v1499_v41, -1e+30  ;;  %471 = vst.msk [vmem:[#allocation2 + $0x38] sm:$0xff] %vm463_vm2, %v5712_v3 }
 0x111   : > { %8719 = vst [vmem:[#allocation27_spill] sm:$0xff] %v6210_v52  ;;  %v1340_v55 = vpop.f32.mrf.mxu1  ;;  %v6226_v7 = vsel %vm1691_vm1, %v1180_v56, -1e+30  ;;  %v6230_v11 = vsel %vm1691_vm1, %v1660_v59, -1e+30  ;;  %v6286_v59 = vld [vmem:[%s6019_s29 + $0xa8] sm:$0xff]  }
 0x112   : > { %1926 = vmax.xlane.f32.xlu2 %v6166_v1  ;;  %1894 = vmax.xlane.f32.xlu1 %v6170_v2  ;;  %v1341_v62 = vadd.f32 %v5165_v54, %v1340_v55  ;;  %8720 = vst [vmem:[#allocation28_spill] sm:$0xff] %v6226_v7  ;;  %v5247_v54 = vld [vmem:[%s6019_s29 + $0x28] sm:$0xff]  }
 0x113   : > { %1832 = vmax.xlane.f32.xlu0 %v6174_v6  ;;  %8721 = vst [vmem:[#allocation29_spill] sm:$0xff] %v6230_v11  ;;  %v5255_v55 = vld [vmem:[%s6019_s29 + $0x68] sm:$0xff]   ;;  %v5137_v63 = vunpack.c.l.bf16 %v5247_v54 }
 0x114   : > { %v6236_v15 = vsel %vm1691_vm1, %v1341_v62, -1e+30  ;;  %472 = vst.msk [vmem:[#allocation2 + $0x40] sm:$0xff] %vm463_vm2, %v5712_v3 }
 0x115   : > { %v1501_v4 = vpop.f32.mrf.mxu2  ;;  %8722 = vst [vmem:[#allocation30_spill] sm:$0xff] %v6236_v15 }
 0x116   : > { %v1662_v17 = vpop.f32.mrf.mxu3  ;;  %v1182_v20 = vpop.f32.mrf.mxu0  ;;  %v1502_v21 = vadd.f32 %v5197_v13, %v1501_v4  ;;  %473 = vst.msk [vmem:[#allocation2 + $0x48] sm:$0xff] %vm463_vm2, %v5712_v3  ;;  %v5169_v4 = vunpack.c.l.bf16 %v5255_v55 }
 0x117   : > { %v1663_v27 = vadd.f32 %v5229_v14, %v1662_v17  ;;  %v1183_v29 = vadd.f32 %v5134_v19, %v1182_v20  ;;  %474 = vst.msk [vmem:[#allocation2 + $0x50] sm:$0xff] %vm463_vm2, %v5712_v3  ;;  %v5201_v17 = vunpack.c.l.bf16 %v6286_v59 }
 0x118   : > { %v6261_v35 = vsel %vm1691_vm1, %v1502_v21, -1e+30  ;;  %475 = vst.msk [vmem:[#allocation2 + $0x58] sm:$0xff] %vm463_vm2, %v5712_v3 }
 0x119   : > { %v1343_v32 = vpop.f32.mrf.mxu1  ;;  %v6257_v34 = vsel %vm1691_vm1, %v1663_v27, -1e+30  ;;  %8724 = vst [vmem:[#allocation32_spill] sm:$0xff] %v6261_v35  ;;  %v6268_v41 = vsel %vm1691_vm1, %v1183_v29, -1e+30  ;;  %v5271_v29 = vld [vmem:[%s6019_s29 + $0xe8] sm:$0xff]  }
 0x11a   : > { %1896 = vmax.xlane.f32.xlu2 %v6183_v22  ;;  %1864 = vmax.xlane.f32.xlu1 %v6187_v25  ;;  %8723 = vst [vmem:[#allocation31_spill] sm:$0xff] %v6257_v34  ;;  %v1344_v45 = vadd.f32 %v5166_v36, %v1343_v32  ;;  %v5138_v32 = vunpack.c.h.bf16 %v5247_v54 }
 0x11b   : > { %1928 = vmax.xlane.f32.xlu0 %v6191_v30  ;;  %8725 = vst [vmem:[#allocation33_spill] sm:$0xff] %v6268_v41 }
 0x11c   : > { %476 = vst.msk [vmem:[#allocation2 + $0x60] sm:$0xff] %vm463_vm2, %v5712_v3  ;;  %v6298_v0 = vsel %vm1691_vm1, %v1344_v45, -1e+30 }
 0x11d   : > { %v1504_v42 = vpop.f32.mrf.mxu2  ;;  %477 = vst.msk [vmem:[#allocation2 + $0x68] sm:$0xff] %vm463_vm2, %v5712_v3 }
 0x11e   : > { %v1665_v50 = vpop.f32.mrf.mxu3  ;;  %478 = vst.msk [vmem:[#allocation2 + $0x70] sm:$0xff] %vm463_vm2, %v5712_v3  ;;  %v1505_v51 = vadd.f32 %v5198_v38, %v1504_v42  ;;  %v1185_v56 = vpop.f32.mrf.mxu0 }
 0x11f   : > { %479 = vst.msk [vmem:[#allocation2 + $0x78] sm:$0xff] %vm463_vm2, %v5712_v3  ;;  %v1666_v53 = vadd.f32 %v5230_v37, %v1665_v50  ;;  %v1186_v20 = vadd.f32 %v5137_v63, %v1185_v56  ;;  %v5233_v50 = vunpack.c.l.bf16 %v5271_v29  ;;  %v6350_v63 = vld [vmem:[#allocation2] sm:$0xff] }
 0x120   : > { %480 = vst.msk [vmem:[#allocation2 + $0x80] sm:$0xff] %vm463_vm2, %v5712_v3  ;;  %v6294_v62 = vsel %vm1691_vm1, %v1505_v51, -1e+30  ;;  %v5170_v51 = vunpack.c.h.bf16 %v5255_v55 }
 0x121   : > { %481 = vst.msk [vmem:[#allocation2 + $0x88] sm:$0xff] %vm463_vm2, %v5712_v3  ;;  %v6304_v13 = vsel %vm1691_vm1, %v1666_v53, -1e+30  ;;  %v1346_v14 = vpop.f32.mrf.mxu1  ;;  %v6331_v42 = vsel %vm1691_vm1, %v1186_v20, -1e+30 }
 0x122   : > { %1866 = vmax.xlane.f32.xlu2 %v6202_v46  ;;  %1834 = vmax.xlane.f32.xlu1 %v6206_v49  ;;  %482 = vst.msk [vmem:[#allocation2 + $0x90] sm:$0xff] %vm463_vm2, %v5712_v3  ;;  %v1347_v21 = vadd.f32 %v5169_v4, %v1346_v14  ;;  %v6357_v4 = vld [vmem:[%s6019_s29 + $0x30] sm:$0xff]  }
 0x123   : > { %1898 = vmax.xlane.f32.xlu0 %v6210_v52  ;;  %8726 = vst [vmem:[#allocation34_spill] sm:$0xff] %v6294_v62 }
 0x124   : > { %8727 = vst [vmem:[#allocation35_spill] sm:$0xff] %v6298_v0  ;;  %v6327_v38 = vsel %vm1691_vm1, %v1347_v21, -1e+30 }
 0x125   : > { %483 = vst.msk [vmem:[#allocation2 + $0x98] sm:$0xff] %vm463_vm2, %v5712_v3  ;;  %v1507_v19 = vpop.f32.mrf.mxu2 }
 0x126   : > { %8728 = vst [vmem:[#allocation36_spill] sm:$0xff] %v6304_v13  ;;  %v1508_v27 = vadd.f32 %v5201_v17, %v1507_v19  ;;  %v1668_v36 = vpop.f32.mrf.mxu3  ;;  %v1188_v37 = vpop.f32.mrf.mxu0 }
 0x127   : > { %484 = vst.msk [vmem:[#allocation2 + $0xa0] sm:$0xff] %vm463_vm2, %v5712_v3  ;;  %v1189_v54 = vadd.f32 %v5138_v32, %v1188_v37  ;;  %v1669_v56 = vadd.f32 %v5233_v50, %v1668_v36  ;;  %v6365_v19 = vld [vmem:[#allocation2 + $0x80] sm:$0xff]  ;;  %v5202_v32 = vunpack.c.h.bf16 %v6286_v59  ;;  %v5234_v36 = vunpack.c.h.bf16 %v5271_v29 }
 0x128   : > { %485 = vst.msk [vmem:[#allocation2 + $0xa8] sm:$0xff] %vm463_vm2, %v5712_v3  ;;  %v6337_v45 = vsel %vm1691_vm1, %v1508_v27, -1e+30 }
 0x129   : > { %486 = vst.msk [vmem:[#allocation2 + $0xb0] sm:$0xff] %vm463_vm2, %v5712_v3  ;;  %v1349_v53 = vpop.f32.mrf.mxu1  ;;  %v6363_v17 = vsel %vm1691_vm1, %v1189_v54, -1e+30  ;;  %v6374_v27 = vsel %vm1691_vm1, %v1669_v56, -1e+30 }
 0x12a   : > { %1836 = vmax.xlane.f32.xlu2 %v6226_v7  ;;  %1930 = vmax.xlane.f32.xlu1 %v6230_v11  ;;  %487 = vst.msk [vmem:[#allocation2 + $0xb8] sm:$0xff] %vm463_vm2, %v5712_v3  ;;  %v1350_v55 = vadd.f32 %v5170_v51, %v1349_v53  ;;  %v5141_v53 = vunpack.c.l.bf16 %v6357_v4 }
 0x12b   : > { %1868 = vmax.xlane.f32.xlu0 %v6236_v15  ;;  %488 = vst.msk [vmem:[#allocation2 + $0xc0] sm:$0xff] %vm463_vm2, %v5712_v3 }
 0x12c   : > { %489 = vst.msk [vmem:[#allocation2 + $0xc8] sm:$0xff] %vm463_vm2, %v5712_v3  ;;  %v6381_v37 = vsel %vm1691_vm1, %v1350_v55, -1e+30 }
 0x12d   : > { %490 = vst.msk [vmem:[#allocation2 + $0xd0] sm:$0xff] %vm463_vm2, %v5712_v3  ;;  %v1510_v20 = vpop.f32.mrf.mxu2 }
 0x12e   : > { %8729 = vst [vmem:[#allocation37_spill] sm:$0xff] %v6327_v38  ;;  %v1671_v51 = vpop.f32.mrf.mxu3  ;;  %v1191_v59 = vpop.f32.mrf.mxu0  ;;  %v1511_v56 = vadd.f32 %v5202_v32, %v1510_v20 }
 0x12f   : > { %8730 = vst [vmem:[#allocation38_spill] sm:$0xff] %v6331_v42  ;;  %v1672_v55 = vadd.f32 %v5234_v36, %v1671_v51 }
 0x130   : > { %491 = vst.msk [vmem:[#allocation2 + $0xd8] sm:$0xff] %vm463_vm2, %v5712_v3  ;;  %v6419_v32 = vsel %vm1691_vm1, %v1511_v56, -1e+30 }
 0x131   : > { %8731 = vst [vmem:[#allocation39_spill] sm:$0xff] %v6337_v45  ;;  %v1352_v29 = vpop.f32.mrf.mxu1  ;;  %v6415_v20 = vsel %vm1691_vm1, %v1672_v55, -1e+30 }
 0x132   : > { %1932 = vmax.xlane.f32.xlu2 %v6257_v34  ;;  %1900 = vmax.xlane.f32.xlu1 %v6261_v35  ;;  %492 = vst.msk [vmem:[#allocation2 + $0xe0] sm:$0xff] %vm463_vm2, %v5712_v3  ;;  %v6546_v35 = vld [vmem:[%s6019_s29 + $0xf8] sm:$0xff]  }
 0x133   : > { %1838 = vmax.xlane.f32.xlu0 %v6268_v41  ;;  %493 = vst.msk [vmem:[#allocation2 + $0xe8] sm:$0xff] %vm463_vm2, %v5712_v3  ;;  %v6535_v41 = vld [vmem:[%s6019_s29 + $0xb8] sm:$0xff]   ;;  %v5242_v39 = vunpack.c.h.bf16 %v6546_v35 }
 0x134   : > { %494 = vst.msk [vmem:[#allocation2 + $0xf0] sm:$0xff] %vm463_vm2, %v5712_v3 }
 0x135   : > { %495 = vst.msk [vmem:[#allocation2 + $0xf8] sm:$0xff] %vm463_vm2, %v5712_v3 }
 0x136   : > { %8732 = vst [vmem:[#allocation40_spill] sm:$0xff] %v6350_v63  ;;  %v1674_v55 = vpop.f32.mrf.mxu3 }
 0x137   : > { %496 = vst.msk [vmem:[#allocation2 + $0x100] sm:$0xff] %vm463_vm2, %v5712_v3 }
 0x138   : > { %497 = vst.msk [vmem:[#allocation2 + $0x108] sm:$0xff] %vm463_vm2, %v5712_v3 }
 0x139   : > { %498 = vst.msk [vmem:[#allocation2 + $0x110] sm:$0xff] %vm463_vm2, %v5712_v3 }
 0x13a   : > { %1902 = vmax.xlane.f32.xlu2 %v6294_v62  ;;  %1870 = vmax.xlane.f32.xlu1 %v6298_v0  ;;  %8733 = vst [vmem:[#allocation41_spill] sm:$0xff] %v6363_v17 }
 0x13b   : > { %1934 = vmax.xlane.f32.xlu0 %v6304_v13  ;;  %8734 = vst [vmem:[#allocation42_spill] sm:$0xff] %v6365_v19 }
 0x13c   : > { %499 = vst.msk [vmem:[#allocation2 + $0x118] sm:$0xff] %vm463_vm2, %v5712_v3 }
 0x13d   : > { %8736 = vst [vmem:[#allocation44_spill] sm:$0xff] %v6374_v27 }
 0x13e   : > { %500 = vst.msk [vmem:[#allocation2 + $0x120] sm:$0xff] %vm463_vm2, %v5712_v3 }
 0x13f   : > { %8737 = vst [vmem:[#allocation45_spill] sm:$0xff] %v6381_v37 }
 0x140   : > { %501 = vst.msk [vmem:[#allocation2 + $0x128] sm:$0xff] %vm463_vm2, %v5712_v3 }
 0x141   : > { %502 = vst.msk [vmem:[#allocation2 + $0x130] sm:$0xff] %vm463_vm2, %v5712_v3 }
 0x142   : > { %1872 = vmax.xlane.f32.xlu2 %v6327_v38  ;;  %1840 = vmax.xlane.f32.xlu1 %v6331_v42  ;;  %503 = vst.msk [vmem:[#allocation2 + $0x138] sm:$0xff] %vm463_vm2, %v5712_v3  ;;  %v6407_v38 = vld [vmem:[%s6019_s29 + $0xf0] sm:$0xff]   ;;  %v6488_v42 = vld [vmem:[%s6019_s29 + $0x78] sm:$0xff]  }
 0x143   : > { %1904 = vmax.xlane.f32.xlu0 %v6337_v45  ;;  %504 = vst.msk [vmem:[#allocation2 + $0x140] sm:$0xff] %vm463_vm2, %v5712_v3 }
 0x144   : > { %505 = vst.msk [vmem:[#allocation2 + $0x148] sm:$0xff] %vm463_vm2, %v5712_v3 }
 0x145   : > { %v1821_v14 = vpop.xlane.xlu0 %1820  ;;  %506 = vst.msk [vmem:[#allocation2 + $0x150] sm:$0xff] %vm463_vm2, %v5712_v3 }
 0x146   : > { %v6368_v21 = vmax.f32 %v6350_v63, %v1821_v14  ;;  %v5256_v63 = vld [vmem:[%s6019_s29 + $0x70] sm:$0xff]   ;;  %8739 = vst [vmem:[#allocation47_spill] sm:$0xff] %v6415_v20 }
 0x147   : > { %8740 = vst [vmem:[#allocation48_spill] sm:$0xff] %v6419_v32  ;;  %v5173_v36 = vunpack.c.l.bf16 %v5256_v63 }
 0x148   : > { %8735 = vst [vmem:[#allocation43_spill] sm:$0xff] %v6368_v21  ;;  %v1853_v50 = vpop.xlane.xlu1 %1852 }
 0x149   : > { %3937 = vst.msk [vmem:[#allocation2] sm:$0xff] %vm463_vm2, %v6368_v21  ;;  %v6387_v54 = vmax.f32 %v6365_v19, %v1853_v50  ;;  %v1192_v50 = vadd.f32 %v5141_v53, %v1191_v59  ;;  %v1513_v59 = vpop.f32.mrf.mxu2  ;;  %v5237_v19 = vunpack.c.l.bf16 %v6407_v38  ;;  %v1353_v56 = vadd.f32 %v5173_v36, %v1352_v29 }
 0x14a   : > { %1842 = vmax.xlane.f32.xlu2 %v6363_v17  ;;  %1936 = vmax.xlane.f32.xlu1 %v6374_v27  ;;  %v5264_v17 = vld [vmem:[%s6019_s29 + $0xb0] sm:$0xff]   ;;  %507 = vst.msk [vmem:[#allocation2 + $0x158] sm:$0xff] %vm463_vm2, %v5712_v3  ;;  %v5142_v36 = vunpack.c.h.bf16 %v6357_v4  ;;  %v6476_v4 = vld [vmem:[%s6019_s29 + $0x38] sm:$0xff]  }
 0x14b   : > { %8738 = vst [vmem:[#allocation46_spill] sm:$0xff] %v6387_v54  ;;  %1874 = vmax.xlane.f32.xlu0 %v6381_v37  ;;  %v5205_v51 = vunpack.c.l.bf16 %v5264_v17  ;;  %v6425_v53 = vsel %vm1691_vm1, %v1192_v50, -1e+30  ;;  %v1675_v45 = vadd.f32 %v5237_v19, %v1674_v55  ;;  %v6457_v19 = vsel %vm1691_vm1, %v1353_v56, -1e+30  ;;  %v1355_v55 = vpop.f32.mrf.mxu1 }
 0x14c   : > { %v6400_v14 = vpop.xlane.xlu2 %1884  ;;  %8741 = vst [vmem:[#allocation49_spill] sm:$0xff] %v6425_v53  ;;  %v5146_v46 = vunpack.c.h.bf16 %v6476_v4 }
 0x14d   : > { %v1917_v37 = vpop.xlane.xlu0 %1916  ;;  %508 = vst.msk [vmem:[#allocation2 + $0x160] sm:$0xff] %vm463_vm2, %v5712_v3  ;;  %v1514_v50 = vadd.f32 %v5205_v51, %v1513_v59  ;;  %v5174_v51 = vunpack.c.h.bf16 %v5256_v63  ;;  %v6464_v59 = vsel %vm1691_vm1, %v1675_v45, -1e+30 }
 0x14e   : > { %509 = vst.msk [vmem:[#allocation2 + $0x168] sm:$0xff] %vm463_vm2, %v5712_v3 }
 0x14f   : > { %510 = vst.msk [vmem:[#allocation2 + $0x170] sm:$0xff] %vm463_vm2, %v5712_v3  ;;  %v6453_v29 = vsel %vm1691_vm1, %v1514_v50, -1e+30  ;;  %v1356_v63 = vadd.f32 %v5174_v51, %v1355_v55  ;;  %v5145_v51 = vunpack.c.l.bf16 %v6476_v4  ;;  %v1677_v55 = vpop.f32.mrf.mxu3 }
 0x150   : > { %511 = vst.msk [vmem:[#allocation2 + $0x178] sm:$0xff] %vm463_vm2, %v5712_v3 }
 0x151   : > { %512 = vst.msk [vmem:[#allocation2 + $0x180] sm:$0xff] %vm463_vm2, %v5712_v3  ;;  %v1516_v50 = vpop.f32.mrf.mxu2 }
 0x152   : > { %1938 = vmax.xlane.f32.xlu2 %v6415_v20  ;;  %1906 = vmax.xlane.f32.xlu1 %v6419_v32  ;;  %513 = vst.msk [vmem:[#allocation2 + $0x188] sm:$0xff] %vm463_vm2, %v5712_v3  ;;  %v1194_v32 = vpop.f32.mrf.mxu0 }
 0x153   : > { %1844 = vmax.xlane.f32.xlu0 %v6425_v53  ;;  %514 = vst.msk [vmem:[#allocation2 + $0x190] sm:$0xff] %vm463_vm2, %v5712_v3  ;;  %v5206_v53 = vunpack.c.h.bf16 %v5264_v17  ;;  %v1195_v45 = vadd.f32 %v5142_v36, %v1194_v32  ;;  %v6492_v32 = vld [vmem:[#allocation2 + $0x100] sm:$0xff] }
 0x154   : > { %v6439_v27 = vpop.xlane.xlu2 %1854  ;;  %8742 = vst [vmem:[#allocation50_spill] sm:$0xff] %v6453_v29 }
 0x155   : > { %v6443_v62 = vpop.xlane.xlu1 %1918  ;;  %v6447_v20 = vpop.xlane.xlu0 %1822  ;;  %8743 = vst [vmem:[#allocation51_spill] sm:$0xff] %v6457_v19  ;;  %v1517_v56 = vadd.f32 %v5206_v53, %v1516_v50  ;;  %v6501_v53 = vsel %vm1691_vm1, %v1356_v63, -1e+30  ;;  %v6505_v50 = vsel %vm1691_vm1, %v1195_v45, -1e+30  ;;  %v6519_v45 = vmax.f32 %v6492_v32, %v6400_v14  ;;  %v6521_v63 = vld [vmem:[#allocation2 + $0x88] sm:$0xff] }
 0x156   : > { %515 = vst.msk [vmem:[#allocation2 + $0x198] sm:$0xff] %vm463_vm2, %v5712_v3  ;;  %v6541_v7 = vmax.f32 %v6521_v63, %v6439_v27 }
 0x157   : > { %8744 = vst [vmem:[#allocation52_spill] sm:$0xff] %v6464_v59  ;;  %v6512_v34 = vsel %vm1691_vm1, %v1517_v56, -1e+30  ;;  %v1680_v15 = vpop.f32.mrf.mxu3 }
 0x158   : > { %516 = vst.msk [vmem:[#allocation2 + $0x1a0] sm:$0xff] %vm463_vm2, %v5712_v3  ;;  %v6480_v17 = vld [vmem:[#allocation2 + $0x180] sm:$0xff] }
 0x159   : > { %517 = vst.msk [vmem:[#allocation2 + $0x1a8] sm:$0xff] %vm463_vm2, %v5712_v3  ;;  %v6525_v56 = vld [vmem:[#allocation2 + $0x188] sm:$0xff] }
 0x15a   : > { %1908 = vmax.xlane.f32.xlu2 %v6453_v29  ;;  %1876 = vmax.xlane.f32.xlu1 %v6457_v19  ;;  %518 = vst.msk [vmem:[#allocation2 + $0x1b0] sm:$0xff] %vm463_vm2, %v5712_v3  ;;  %v6485_v29 = vmax.f32 %v6480_v17, %v1917_v37  ;;  %v1197_v0 = vpop.f32.mrf.mxu0  ;;  %v5177_v37 = vunpack.c.l.bf16 %v6488_v42 }
 0x15b   : > { %1940 = vmax.xlane.f32.xlu0 %v6464_v59  ;;  %519 = vst.msk [vmem:[#allocation2 + $0x1b8] sm:$0xff] %vm463_vm2, %v5712_v3  ;;  %v5238_v59 = vunpack.c.h.bf16 %v6407_v38  ;;  %v1358_v38 = vpop.f32.mrf.mxu1  ;;  %v1198_v14 = vadd.f32 %v5145_v51, %v1197_v0  ;;  %v6552_v0 = vmax.f32 %v6525_v56, %v6443_v62 }
 0x15c   : > { %8745 = vst [vmem:[#allocation53_spill] sm:$0xff] %v6480_v17  ;;  %v6531_v17 = vld [vmem:[#allocation2 + $0x8] sm:$0xff] }
 0x15d   : > { %520 = vst.msk [vmem:[#allocation2 + $0x1c0] sm:$0xff] %vm463_vm2, %v5712_v3  ;;  %v1921_v19 = vpop.xlane.xlu2 %1920  ;;  %v1825_v13 = vpop.xlane.xlu1 %1824  ;;  %v6560_v27 = vmax.f32 %v6531_v17, %v6447_v20 }
 0x15e   : > { %8746 = vst [vmem:[#allocation54_spill] sm:$0xff] %v6485_v29  ;;  %v1887_v36 = vpop.xlane.xlu0 %1886 }
 0x15f   : > { %521 = vst.msk [vmem:[#allocation2 + $0x1c8] sm:$0xff] %vm463_vm2, %v5712_v3 }
 0x160   : > { %8747 = vst [vmem:[#allocation55_spill] sm:$0xff] %v6492_v32  ;;  %v1678_v32 = vadd.f32 %v5238_v59, %v1677_v55  ;;  %v6554_v59 = vld [vmem:[#allocation2 + $0x10] sm:$0xff]  ;;  %v6562_v55 = vld [vmem:[#allocation2 + $0x108] sm:$0xff] }
 0x161   : > { %522 = vst.msk [vmem:[#allocation2 + $0x1d0] sm:$0xff] %vm463_vm2, %v5712_v3 }
 0x162   : > { %8748 = vst [vmem:[#allocation56_spill] sm:$0xff] %v6501_v53  ;;  %1878 = vmax.xlane.f32.xlu2 %v6501_v53  ;;  %1846 = vmax.xlane.f32.xlu1 %v6505_v50  ;;  %v6543_v53 = vld [vmem:[#allocation2 + $0x190] sm:$0xff]  ;;  %v6578_v20 = vsel %vm1691_vm1, %v1678_v32, -1e+30  ;;  %v6596_v32 = vmax.f32 %v6562_v55, %v1887_v36  ;;  %v1200_v52 = vpop.f32.mrf.mxu0  ;;  %v6611_v36 = vld [vmem:[#allocation2 + $0x20] sm:$0xff] }
 0x163   : > { %8749 = vst [vmem:[#allocation57_spill] sm:$0xff] %v6505_v50  ;;  %1910 = vmax.xlane.f32.xlu0 %v6512_v34  ;;  %v1359_v50 = vadd.f32 %v5177_v37, %v1358_v38  ;;  %v5209_v38 = vunpack.c.l.bf16 %v6535_v41  ;;  %v6568_v62 = vmax.f32 %v6543_v53, %v1921_v19  ;;  %v6586_v19 = vld [vmem:[#allocation2 + $0x110] sm:$0xff] }
 0x164   : > { %523 = vst.msk [vmem:[#allocation2 + $0x1d8] sm:$0xff] %vm463_vm2, %v5712_v3 }
 0x165   : > { %8750 = vst [vmem:[#allocation58_spill] sm:$0xff] %v6512_v34  ;;  %v1891_v51 = vpop.xlane.xlu2 %1890  ;;  %v6584_v34 = vmax.f32 %v6554_v59, %v1825_v13 }
 0x166   : > { %524 = vst.msk [vmem:[#allocation2 + $0x1e0] sm:$0xff] %vm463_vm2, %v5712_v3  ;;  %v1857_v37 = vpop.xlane.xlu0 %1856 }
 0x167   : > { %8751 = vst [vmem:[#allocation59_spill] sm:$0xff] %v6519_v45 }
 0x168   : > { %8752 = vst [vmem:[#allocation60_spill] sm:$0xff] %v6521_v63  ;;  %v6574_v63 = vsel %vm1691_vm1, %v1198_v14, -1e+30  ;;  %v1519_v14 = vpop.f32.mrf.mxu2 }
 0x169   : > { %525 = vst.msk [vmem:[#allocation2 + $0x1e8] sm:$0xff] %vm463_vm2, %v5712_v3 }
 0x16a   : > { %8753 = vst [vmem:[#allocation61_spill] sm:$0xff] %v6525_v56  ;;  %v6570_v56 = vld [vmem:[#allocation2 + $0x118] sm:$0xff]  ;;  %1848 = vmax.xlane.f32.xlu2 %v6574_v63  ;;  %1942 = vmax.xlane.f32.xlu1 %v6578_v20 }
 0x16b   : > { %526 = vst.msk [vmem:[#allocation2 + $0x1f0] sm:$0xff] %vm463_vm2, %v5712_v3  ;;  %v6601_v13 = vmax.f32 %v6570_v56, %v1891_v51  ;;  %v1520_v51 = vadd.f32 %v5209_v38, %v1519_v14 }
 0x16c   : > { %8754 = vst [vmem:[#allocation62_spill] sm:$0xff] %v6531_v17  ;;  %v5241_v17 = vunpack.c.l.bf16 %v6546_v35 }
 0x16d   : > { %527 = vst.msk [vmem:[#allocation2 + $0x1f8] sm:$0xff] %vm463_vm2, %v5712_v3  ;;  %v1889_v3 = vpop.xlane.xlu1 %1888  ;;  %v6642_v14 = vsel %vm1691_vm1, %v1520_v51, -1e+30  ;;  %v6662_v51 = vld [vmem:[#allocation2 + $0x98] sm:$0xff] }
 0x16e   : > { %8755 = vst [vmem:[#allocation63_spill] sm:$0xff] %v6541_v7  ;;  %v6608_v4 = vmax.f32 %v6586_v19, %v1889_v3  ;;  %v1829_v3 = vpop.xlane.xlu2 %1828 }
 0x16f   : > { %8756 = vst [vmem:[#allocation64_spill] sm:$0xff] %v6543_v53  ;;  %v6590_v53 = vsel %vm1691_vm1, %v1359_v50, -1e+30  ;;  %v6613_v50 = vld [vmem:[#allocation2 + $0x18] sm:$0xff] }
 0x170   : > { %3969 = vst.msk [vmem:[#allocation2 + $0x100] sm:$0xff] %vm463_vm2, %v6519_v45  ;;  %1880 = vmax.xlane.f32.xlu0 %v6590_v53 }
 0x171   : > { %8757 = vst [vmem:[#allocation65_spill] sm:$0xff] %v6552_v0 }
 0x172   : > { %8758 = vst [vmem:[#allocation66_spill] sm:$0xff] %v6554_v59  ;;  %v6615_v59 = vld [vmem:[#allocation2 + $0x90] sm:$0xff]  ;;  %1912 = vmax.xlane.f32.xlu1 %v6642_v14 }
 0x173   : > { %3953 = vst.msk [vmem:[#allocation2 + $0x80] sm:$0xff] %vm463_vm2, %v6387_v54 }
 0x174   : > { %8759 = vst [vmem:[#allocation67_spill] sm:$0xff] %v6560_v27  ;;  %v1683_v40 = vpop.f32.mrf.mxu3 }
 0x175   : > { %8760 = vst [vmem:[#allocation68_spill] sm:$0xff] %v6562_v55  ;;  %v1201_v55 = vadd.f32 %v5146_v46, %v1200_v52  ;;  %v1923_v46 = vpop.xlane.xlu0 %1922  ;;  %v5713_v52 = vmov 0   ;;  %v1684_v35 = vadd.f32 %v5242_v39, %v1683_v40 }
 0x176   : > { %3985 = vst.msk [vmem:[#allocation2 + $0x180] sm:$0xff] %vm463_vm2, %v6485_v29  ;;  %5303 = vset.pattern.permute.xlu0 %v5713_v52  ;;  %5302 = vset.pattern.permute.xlu2 %v5713_v52 }
 0x177   : > { %8761 = vst [vmem:[#allocation69_spill] sm:$0xff] %v6570_v56  ;;  %v1681_v56 = vadd.f32 %v5241_v17, %v1680_v15  ;;  %v6632_v15 = vmax.f32 %v6615_v59, %v1857_v37  ;;  %5301 = vset.pattern.permute.xlu1 %v5713_v52  ;;  %v6651_v37 = vsel %vm1691_vm1, %v1201_v55, -1e+30  ;;  %v6666_v55 = vld [vmem:[#allocation2 + $0x120] sm:$0xff] }
 0x178   : > { %8762 = vst [vmem:[#allocation70_spill] sm:$0xff] %v6574_v63  ;;  %v6619_v63 = vld [vmem:[#allocation2 + $0x198] sm:$0xff]  ;;  %1850 = vmax.xlane.f32.xlu0 %v6651_v37 }
 0x179   : > { %8763 = vst [vmem:[#allocation71_spill] sm:$0xff] %v6578_v20  ;;  %v6638_v17 = vsel %vm1691_vm1, %v1681_v56, -1e+30  ;;  %v6660_v56 = vld [vmem:[#allocation2 + $0xa0] sm:$0xff] }
 0x17a   : > { %3954 = vst.msk [vmem:[#allocation2 + $0x88] sm:$0xff] %vm463_vm2, %v6541_v7  ;;  %1944 = vmax.xlane.f32.xlu2 %v6638_v17 }
 0x17b   : > { %8764 = vst [vmem:[#allocation72_spill] sm:$0xff] %v6584_v34 }
 0x17c   : > { %8765 = vst [vmem:[#allocation73_spill] sm:$0xff] %v6586_v19  ;;  %v1827_v19 = vpop.xlane.xlu1 %1826 }
 0x17d   : > { %8766 = vst [vmem:[#allocation74_spill] sm:$0xff] %v6590_v53  ;;  %v6626_v53 = vmax.f32 %v6611_v36, %v1829_v3  ;;  %v6629_v38 = vmax.f32 %v6613_v50, %v1827_v19  ;;  %v6645_v19 = vmax.f32 %v6619_v63, %v1923_v46  ;;  %v8607_v3 = vmov 0.0   ;;  %v1861_v46 = vpop.xlane.xlu2 %1860 }
 0x17e   : > { %3986 = vst.msk [vmem:[#allocation2 + $0x188] sm:$0xff] %vm463_vm2, %v6552_v0 }
 0x17f   : > { %8767 = vst [vmem:[#allocation75_spill] sm:$0xff] %v6596_v32 }
 0x180   : > { %3938 = vst.msk [vmem:[#allocation2 + $0x8] sm:$0xff] %vm463_vm2, %v6560_v27 }
 0x181   : > { %3987 = vst.msk [vmem:[#allocation2 + $0x190] sm:$0xff] %vm463_vm2, %v6568_v62 }
 0x182   : > { %8768 = vst [vmem:[#allocation76_spill] sm:$0xff] %v6608_v4 }
 0x183   : > { %8769 = vst [vmem:[#allocation77_spill] sm:$0xff] %v6611_v36  ;;  %v6673_v36 = vmax.f32 %v6660_v56, %v1861_v46  ;;  %v6691_v46 = vld [vmem:[#allocation2 + $0x28] sm:$0xff] }
 0x184   : > { %8770 = vst [vmem:[#allocation78_spill] sm:$0xff] %v6613_v50  ;;  %v1859_v52 = vpop.xlane.xlu1 %1858 }
 0x185   : > { %8771 = vst [vmem:[#allocation79_spill] sm:$0xff] %v6615_v59  ;;  %v6676_v50 = vmax.f32 %v6662_v51, %v1859_v52  ;;  %v6693_v52 = vld [vmem:[#allocation2 + $0x1a0] sm:$0xff] }
 0x186   : > { %3939 = vst.msk [vmem:[#allocation2 + $0x10] sm:$0xff] %vm463_vm2, %v6584_v34 }
 0x187   : > { %8772 = vst [vmem:[#allocation80_spill] sm:$0xff] %v6619_v63  ;;  %v1893_v63 = vpop.xlane.xlu0 %1892 }
 0x188   : > { %3970 = vst.msk [vmem:[#allocation2 + $0x108] sm:$0xff] %vm463_vm2, %v6596_v32  ;;  %v6681_v59 = vmax.f32 %v6666_v55, %v1893_v63  ;;  %v6697_v63 = vld [vmem:[#allocation2 + $0xa8] sm:$0xff] }
 0x189   : > { %3972 = vst.msk [vmem:[#allocation2 + $0x118] sm:$0xff] %vm463_vm2, %v6601_v13 }
 0x18a   : > { %8773 = vst [vmem:[#allocation81_spill] sm:$0xff] %v6629_v38 }
 0x18b   : > { %8774 = vst [vmem:[#allocation82_spill] sm:$0xff] %v6632_v15  ;;  %2206 = vperm.xlu1 %5301, %v6368_v21  }
 0x18c   : > { %3971 = vst.msk [vmem:[#allocation2 + $0x110] sm:$0xff] %vm463_vm2, %v6608_v4  ;;  %2446 = vperm.xlu0 %5303, %v6485_v29  }
 0x18d   : > { %8775 = vst [vmem:[#allocation83_spill] sm:$0xff] %v6638_v17 }
 0x18e   : > { %8776 = vst [vmem:[#allocation84_spill] sm:$0xff] %v6642_v14 }
 0x18f   : > { %3941 = vst.msk [vmem:[#allocation2 + $0x20] sm:$0xff] %vm463_vm2, %v6626_v53 }
 0x190   : > { %8777 = vst [vmem:[#allocation85_spill] sm:$0xff] %v6651_v37  ;;  %v1863_v37 = vpop.xlane.xlu0 %1862 }
 0x191   : > { %3940 = vst.msk [vmem:[#allocation2 + $0x18] sm:$0xff] %vm463_vm2, %v6629_v38  ;;  %v6712_v14 = vmax.f32 %v6697_v63, %v1863_v37  ;;  %v6728_v37 = vld [vmem:[#allocation2 + $0x30] sm:$0xff] }
 0x192   : > { %3955 = vst.msk [vmem:[#allocation2 + $0x90] sm:$0xff] %vm463_vm2, %v6632_v15  ;;  %2286 = vperm.xlu2 %5302, %v6387_v54  }
 0x193   : > { %8778 = vst [vmem:[#allocation86_spill] sm:$0xff] %v6660_v56  ;;  %v1831_v56 = vpop.xlane.xlu2 %1830 }
 0x194   : > { %8779 = vst [vmem:[#allocation87_spill] sm:$0xff] %v6662_v51  ;;  %v1925_v51 = vpop.xlane.xlu1 %1924 }
 0x195   : > { %3988 = vst.msk [vmem:[#allocation2 + $0x198] sm:$0xff] %vm463_vm2, %v6645_v19  ;;  %v6707_v17 = vmax.f32 %v6693_v52, %v1925_v51  ;;  %v6724_v51 = vld [vmem:[#allocation2 + $0x128] sm:$0xff] }
 0x196   : > { %8780 = vst [vmem:[#allocation88_spill] sm:$0xff] %v6666_v55  ;;  %v6704_v55 = vmax.f32 %v6691_v46, %v1831_v56  ;;  %v6722_v56 = vld [vmem:[#allocation2 + $0x1a8] sm:$0xff] }
 0x197   : > { %576 = vst.msk [vmem:[#allocation3 + $0x180] sm:$0xff] %vm463_vm2, %v8607_v3 }
 0x198   : > { %528 = vst.msk [vmem:[#allocation3] sm:$0xff] %vm463_vm2, %v8607_v3  ;;  %v1833_v22 = vpop.xlane.xlu0 %1832 }
 0x199   : > { %529 = vst.msk [vmem:[#allocation3 + $0x8] sm:$0xff] %vm463_vm2, %v8607_v3  ;;  %v6744_v11 = vmax.f32 %v6728_v37, %v1833_v22  ;;  %v6758_v22 = vld [vmem:[#allocation2 + $0xb0] sm:$0xff] }
 0x19a   : > { %530 = vst.msk [vmem:[#allocation3 + $0x10] sm:$0xff] %vm463_vm2, %v8607_v3 }
 0x19b   : > { %3957 = vst.msk [vmem:[#allocation2 + $0xa0] sm:$0xff] %vm463_vm2, %v6673_v36 }
 0x19c   : > { %3956 = vst.msk [vmem:[#allocation2 + $0x98] sm:$0xff] %vm463_vm2, %v6676_v50 }
 0x19d   : > { %3973 = vst.msk [vmem:[#allocation2 + $0x120] sm:$0xff] %vm463_vm2, %v6681_v59 }
 0x19e   : > { %8781 = vst [vmem:[#allocation89_spill] sm:$0xff] %v6691_v46  ;;  %v1927_v46 = vpop.xlane.xlu2 %1926 }
 0x19f   : > { %8782 = vst [vmem:[#allocation90_spill] sm:$0xff] %v6693_v52  ;;  %v1895_v52 = vpop.xlane.xlu1 %1894 }
 0x1a0   : > { %531 = vst.msk [vmem:[#allocation3 + $0x18] sm:$0xff] %vm463_vm2, %v8607_v3  ;;  %v6738_v20 = vmax.f32 %v6724_v51, %v1895_v52  ;;  %v6762_v52 = vld [vmem:[#allocation2 + $0x1b0] sm:$0xff]  ;;  %v1929_v21 = vpop.xlane.xlu0 %1928 }
 0x1a1   : > { %8783 = vst [vmem:[#allocation91_spill] sm:$0xff] %v6697_v63  ;;  %v6735_v63 = vmax.f32 %v6722_v56, %v1927_v46  ;;  %v6756_v46 = vld [vmem:[#allocation2 + $0x130] sm:$0xff]  ;;  %v6777_v29 = vmax.f32 %v6762_v52, %v1929_v21  ;;  %v6793_v21 = vld [vmem:[#allocation2 + $0x138] sm:$0xff] }
 0x1a2   : > { %532 = vst.msk [vmem:[#allocation3 + $0x20] sm:$0xff] %vm463_vm2, %v8607_v3 }
 0x1a3   : > { %533 = vst.msk [vmem:[#allocation3 + $0x28] sm:$0xff] %vm463_vm2, %v8607_v3 }
 0x1a4   : > { %534 = vst.msk [vmem:[#allocation3 + $0x30] sm:$0xff] %vm463_vm2, %v8607_v3 }
 0x1a5   : > { %535 = vst.msk [vmem:[#allocation3 + $0x38] sm:$0xff] %vm463_vm2, %v8607_v3 }
 0x1a6   : > { %3942 = vst.msk [vmem:[#allocation2 + $0x28] sm:$0xff] %vm463_vm2, %v6704_v55 }
 0x1a7   : > { %3989 = vst.msk [vmem:[#allocation2 + $0x1a0] sm:$0xff] %vm463_vm2, %v6707_v17 }
 0x1a8   : > { %3958 = vst.msk [vmem:[#allocation2 + $0xa8] sm:$0xff] %vm463_vm2, %v6712_v14  ;;  %v1899_v6 = vpop.xlane.xlu0 %1898 }
 0x1a9   : > { %8784 = vst [vmem:[#allocation92_spill] sm:$0xff] %v6722_v56  ;;  %v1897_v56 = vpop.xlane.xlu2 %1896  ;;  %v6808_v30 = vmax.f32 %v6793_v21, %v1899_v6  ;;  %v6824_v6 = vld [vmem:[#allocation2 + $0xc0] sm:$0xff] }
 0x1aa   : > { %8785 = vst [vmem:[#allocation93_spill] sm:$0xff] %v6724_v51  ;;  %v1865_v51 = vpop.xlane.xlu1 %1864 }
 0x1ab   : > { %536 = vst.msk [vmem:[#allocation3 + $0x40] sm:$0xff] %vm463_vm2, %v8607_v3  ;;  %v6772_v54 = vmax.f32 %v6758_v22, %v1865_v51  ;;  %v6789_v51 = vld [vmem:[#allocation2 + $0x38] sm:$0xff] }
 0x1ac   : > { %8786 = vst [vmem:[#allocation94_spill] sm:$0xff] %v6728_v37  ;;  %v6769_v37 = vmax.f32 %v6756_v46, %v1897_v56  ;;  %v6787_v56 = vld [vmem:[#allocation2 + $0xb8] sm:$0xff] }
 0x1ad   : > { %537 = vst.msk [vmem:[#allocation3 + $0x48] sm:$0xff] %vm463_vm2, %v8607_v3 }
 0x1ae   : > { %538 = vst.msk [vmem:[#allocation3 + $0x50] sm:$0xff] %vm463_vm2, %v8607_v3 }
 0x1af   : > { %539 = vst.msk [vmem:[#allocation3 + $0x58] sm:$0xff] %vm463_vm2, %v8607_v3 }
 0x1b0   : > { %540 = vst.msk [vmem:[#allocation3 + $0x60] sm:$0xff] %vm463_vm2, %v8607_v3  ;;  %v1869_v1 = vpop.xlane.xlu0 %1868 }
 0x1b1   : > { %3990 = vst.msk [vmem:[#allocation2 + $0x1a8] sm:$0xff] %vm463_vm2, %v6735_v63  ;;  %v6839_v43 = vmax.f32 %v6824_v6, %v1869_v1  ;;  %v6855_v1 = vld [vmem:[#allocation2 + $0x48] sm:$0xff] }
 0x1b2   : > { %3974 = vst.msk [vmem:[#allocation2 + $0x128] sm:$0xff] %vm463_vm2, %v6738_v20 }
 0x1b3   : > { %3943 = vst.msk [vmem:[#allocation2 + $0x30] sm:$0xff] %vm463_vm2, %v6744_v11 }
 0x1b4   : > { %8787 = vst [vmem:[#allocation95_spill] sm:$0xff] %v6756_v46  ;;  %v1867_v46 = vpop.xlane.xlu2 %1866 }
 0x1b5   : > { %8788 = vst [vmem:[#allocation96_spill] sm:$0xff] %v6758_v22  ;;  %v1835_v22 = vpop.xlane.xlu1 %1834 }
 0x1b6   : > { %541 = vst.msk [vmem:[#allocation3 + $0x68] sm:$0xff] %vm463_vm2, %v8607_v3  ;;  %v6803_v49 = vmax.f32 %v6789_v51, %v1835_v22  ;;  %v6820_v22 = vld [vmem:[#allocation2 + $0x1b8] sm:$0xff] }
 0x1b7   : > { %8789 = vst [vmem:[#allocation97_spill] sm:$0xff] %v6762_v52  ;;  %v6800_v52 = vmax.f32 %v6787_v56, %v1867_v46  ;;  %v6818_v46 = vld [vmem:[#allocation2 + $0x40] sm:$0xff] }
 0x1b8   : > { %542 = vst.msk [vmem:[#allocation3 + $0x70] sm:$0xff] %vm463_vm2, %v8607_v3  ;;  %v1839_v2 = vpop.xlane.xlu0 %1838 }
 0x1b9   : > { %543 = vst.msk [vmem:[#allocation3 + $0x78] sm:$0xff] %vm463_vm2, %v8607_v3  ;;  %v6871_v8 = vmax.f32 %v6855_v1, %v1839_v2  ;;  %v5178_v2 = vunpack.c.h.bf16 %v6488_v42 }
 0x1ba   : > { %8790 = vst [vmem:[#allocation98_spill] sm:$0xff] %v6769_v37 }
 0x1bb   : > { %8791 = vst [vmem:[#allocation99_spill] sm:$0xff] %v6772_v54 }
 0x1bc   : > { %544 = vst.msk [vmem:[#allocation3 + $0x80] sm:$0xff] %vm463_vm2, %v8607_v3 }
 0x1bd   : > { %545 = vst.msk [vmem:[#allocation3 + $0x88] sm:$0xff] %vm463_vm2, %v8607_v3 }
 0x1be   : > { %3975 = vst.msk [vmem:[#allocation2 + $0x130] sm:$0xff] %vm463_vm2, %v6769_v37 }
 0x1bf   : > { %3959 = vst.msk [vmem:[#allocation2 + $0xb0] sm:$0xff] %vm463_vm2, %v6772_v54 }
 0x1c0   : > { %3991 = vst.msk [vmem:[#allocation2 + $0x1b0] sm:$0xff] %vm463_vm2, %v6777_v29 }
 0x1c1   : > { %8792 = vst [vmem:[#allocation100_spill] sm:$0xff] %v6787_v56  ;;  %v1837_v56 = vpop.xlane.xlu2 %1836 }
 0x1c2   : > { %8793 = vst [vmem:[#allocation101_spill] sm:$0xff] %v6789_v51  ;;  %v1931_v51 = vpop.xlane.xlu1 %1930 }
 0x1c3   : > { %546 = vst.msk [vmem:[#allocation3 + $0x90] sm:$0xff] %vm463_vm2, %v8607_v3  ;;  %v6834_v25 = vmax.f32 %v6820_v22, %v1931_v51  ;;  %v6851_v51 = vld [vmem:[#allocation2 + $0x140] sm:$0xff] }
 0x1c4   : > { %8794 = vst [vmem:[#allocation102_spill] sm:$0xff] %v6793_v21  ;;  %v6831_v21 = vmax.f32 %v6818_v46, %v1837_v56  ;;  %v6849_v56 = vld [vmem:[#allocation2 + $0x1c0] sm:$0xff] }
 0x1c5   : > { %547 = vst.msk [vmem:[#allocation3 + $0x98] sm:$0xff] %vm463_vm2, %v8607_v3 }
 0x1c6   : > { %548 = vst.msk [vmem:[#allocation3 + $0xa0] sm:$0xff] %vm463_vm2, %v8607_v3 }
 0x1c7   : > { %8795 = vst [vmem:[#allocation103_spill] sm:$0xff] %v6800_v52 }
 0x1c8   : > { %549 = vst.msk [vmem:[#allocation3 + $0xa8] sm:$0xff] %vm463_vm2, %v8607_v3 }
 0x1c9   : > { %550 = vst.msk [vmem:[#allocation3 + $0xb0] sm:$0xff] %vm463_vm2, %v8607_v3 }
 0x1ca   : > { %3960 = vst.msk [vmem:[#allocation2 + $0xb8] sm:$0xff] %vm463_vm2, %v6800_v52 }
 0x1cb   : > { %3944 = vst.msk [vmem:[#allocation2 + $0x38] sm:$0xff] %vm463_vm2, %v6803_v49 }
 0x1cc   : > { %3976 = vst.msk [vmem:[#allocation2 + $0x138] sm:$0xff] %vm463_vm2, %v6808_v30 }
 0x1cd   : > { %8796 = vst [vmem:[#allocation104_spill] sm:$0xff] %v6818_v46  ;;  %v1933_v46 = vpop.xlane.xlu2 %1932 }
 0x1ce   : > { %8797 = vst [vmem:[#allocation105_spill] sm:$0xff] %v6820_v22  ;;  %v1901_v22 = vpop.xlane.xlu1 %1900 }
 0x1cf   : > { %551 = vst.msk [vmem:[#allocation3 + $0xb8] sm:$0xff] %vm463_vm2, %v8607_v3  ;;  %v6865_v23 = vmax.f32 %v6851_v51, %v1901_v22  ;;  %v1522_v22 = vpop.f32.mrf.mxu2 }
 0x1d0   : > { %8798 = vst [vmem:[#allocation106_spill] sm:$0xff] %v6824_v6  ;;  %v6862_v6 = vmax.f32 %v6849_v56, %v1933_v46  ;;  %v5210_v46 = vunpack.c.h.bf16 %v6535_v41  ;;  %v6889_v41 = vld [vmem:[#allocation2 + $0x1c8] sm:$0xff] }
 0x1d1   : > { %552 = vst.msk [vmem:[#allocation3 + $0xc0] sm:$0xff] %vm463_vm2, %v8607_v3 }
 0x1d2   : > { %553 = vst.msk [vmem:[#allocation3 + $0xc8] sm:$0xff] %vm463_vm2, %v8607_v3  ;;  %v1523_v28 = vadd.f32 %v5210_v46, %v1522_v22  ;;  %v6903_v46 = vsel %vm1691_vm1, %v1684_v35, -1e+30  ;;  %v1935_v22 = vpop.xlane.xlu0 %1934  ;;  %v6930_v35 = vld [vmem:[#allocation2 + $0x50] sm:$0xff] }
 0x1d3   : > { %8799 = vst [vmem:[#allocation107_spill] sm:$0xff] %v6831_v21  ;;  %v6908_v24 = vmax.f32 %v6889_v41, %v1935_v22  ;;  %1946 = vmax.xlane.f32.xlu0 %v6903_v46 }
 0x1d4   : > { %8800 = vst [vmem:[#allocation108_spill] sm:$0xff] %v6834_v25 }
 0x1d5   : > { %554 = vst.msk [vmem:[#allocation3 + $0xd0] sm:$0xff] %vm463_vm2, %v8607_v3  ;;  %v1903_v60 = vpop.xlane.xlu2 %1902 }
 0x1d6   : > { %555 = vst.msk [vmem:[#allocation3 + $0xd8] sm:$0xff] %vm463_vm2, %v8607_v3  ;;  %v1871_v12 = vpop.xlane.xlu1 %1870 }
 0x1d7   : > { %3945 = vst.msk [vmem:[#allocation2 + $0x40] sm:$0xff] %vm463_vm2, %v6831_v21 }
 0x1d8   : > { %3992 = vst.msk [vmem:[#allocation2 + $0x1b8] sm:$0xff] %vm463_vm2, %v6834_v25 }
 0x1d9   : > { %3961 = vst.msk [vmem:[#allocation2 + $0xc0] sm:$0xff] %vm463_vm2, %v6839_v43 }
 0x1da   : > { %8801 = vst [vmem:[#allocation109_spill] sm:$0xff] %v6849_v56  ;;  %v6883_v56 = vld [vmem:[#allocation2 + $0x148] sm:$0xff] }
 0x1db   : > { %8802 = vst [vmem:[#allocation110_spill] sm:$0xff] %v6851_v51  ;;  %v6885_v51 = vld [vmem:[#allocation2 + $0xc8] sm:$0xff]  ;;  %v6896_v39 = vmax.f32 %v6883_v56, %v1903_v60  ;;  %v6916_v60 = vsel %vm1691_vm1, %v1523_v28, -1e+30  ;;  %v6934_v28 = vld [vmem:[#allocation2 + $0x150] sm:$0xff] }
 0x1dc   : > { %556 = vst.msk [vmem:[#allocation3 + $0xe0] sm:$0xff] %vm463_vm2, %v8607_v3  ;;  %v6899_v40 = vmax.f32 %v6885_v51, %v1871_v12  ;;  %1914 = vmax.xlane.f32.xlu2 %v6916_v60 }
 0x1dd   : > { %8803 = vst [vmem:[#allocation111_spill] sm:$0xff] %v6855_v1  ;;  %v8808_v1 = vmov 0.0   ;;  %v1873_v58 = vpop.xlane.xlu2 %1872 }
 0x1de   : > { %557 = vst.msk [vmem:[#allocation3 + $0xe8] sm:$0xff] %vm463_vm2, %v8607_v3 }
 0x1df   : > { %558 = vst.msk [vmem:[#allocation3 + $0xf0] sm:$0xff] %vm463_vm2, %v8607_v3 }
 0x1e0   : > { %8804 = vst [vmem:[#allocation112_spill] sm:$0xff] %v6862_v6 }
 0x1e1   : > { %8805 = vst [vmem:[#allocation113_spill] sm:$0xff] %v6865_v23 }
 0x1e2   : > { %559 = vst.msk [vmem:[#allocation3 + $0xf8] sm:$0xff] %vm463_vm2, %v8607_v3 }
 0x1e3   : > { %560 = vst.msk [vmem:[#allocation3 + $0x100] sm:$0xff] %vm463_vm2, %v8607_v3  ;;  %v1361_v3 = vpop.f32.mrf.mxu1 }
 0x1e4   : > { %3993 = vst.msk [vmem:[#allocation2 + $0x1c0] sm:$0xff] %vm463_vm2, %v6862_v6  ;;  %v1362_v42 = vadd.f32 %v5178_v2, %v1361_v3  ;;  %v6928_v3 = vld [vmem:[#allocation2 + $0xd0] sm:$0xff]  ;;  %v1841_v2 = vpop.xlane.xlu1 %1840 }
 0x1e5   : > { %3977 = vst.msk [vmem:[#allocation2 + $0x140] sm:$0xff] %vm463_vm2, %v6865_v23  ;;  %v6945_v22 = vmax.f32 %v6930_v35, %v1841_v2  ;;  %v6972_v2 = vld [vmem:[#allocation2 + $0xd8] sm:$0xff] }
 0x1e6   : > { %3946 = vst.msk [vmem:[#allocation2 + $0x48] sm:$0xff] %vm463_vm2, %v6871_v8  ;;  %v6923_v12 = vsel %vm1691_vm1, %v1362_v42, -1e+30  ;;  %v6942_v42 = vmax.f32 %v6928_v3, %v1873_v58  ;;  %v6968_v58 = vld [vmem:[#allocation2 + $0x1d0] sm:$0xff] }
 0x1e7   : > { %8806 = vst [vmem:[#allocation114_spill] sm:$0xff] %v6883_v56  ;;  %1882 = vmax.xlane.f32.xlu1 %v6923_v12  ;;  %v1905_v56 = vpop.xlane.xlu0 %1904  ;;  %2371 = vperm.xlu0 %5303, %v6596_v32   ;;  %v876_v32 = vld [vmem:[%s6964_s6 + $0xd8] sm:$0xff] }
 0x1e8   : > { %8807 = vst [vmem:[#allocation115_spill] sm:$0xff] %v6885_v51  ;;  %v6950_v51 = vmax.f32 %v6934_v28, %v1905_v56  ;;  %v6966_v56 = vld [vmem:[#allocation2 + $0x58] sm:$0xff] }
 0x1e9   : > { %561 = vst.msk [vmem:[#allocation3 + $0x108] sm:$0xff] %vm463_vm2, %v8808_v1 }
 0x1ea   : > { %8809 = vst [vmem:[#allocation116_spill] sm:$0xff] %v6889_v41  ;;  %v880_v41 = vld [vmem:[%s6964_s6 + $0xf8] sm:$0xff] }
 0x1eb   : > { %562 = vst.msk [vmem:[#allocation3 + $0x110] sm:$0xff] %vm463_vm2, %v8808_v1  ;;  %3614 = vmatpush.msrb.mxu1 %v880_v41  ;;  %v6999_v41 = vld [vmem:[#allocation2 + $0x1d8] sm:$0xff] }
 0x1ec   : > { %563 = vst.msk [vmem:[#allocation3 + $0x118] sm:$0xff] %vm463_vm2, %v8808_v1 }
 0x1ed   : > { %8810 = vst [vmem:[#allocation117_spill] sm:$0xff] %v6896_v39 }
 0x1ee   : > { %8811 = vst [vmem:[#allocation118_spill] sm:$0xff] %v6899_v40 }
 0x1ef   : > { %8812 = vst [vmem:[#allocation119_spill] sm:$0xff] %v6903_v46  ;;  %2216 = vperm.xlu0 %5303, %v6584_v34   ;;  %v911_v34 = vld [vmem:[%s6964_s6 + $0x1f0] sm:$0xff] }
 0x1f0   : > { %564 = vst.msk [vmem:[#allocation3 + $0x120] sm:$0xff] %vm463_vm2, %v8808_v1 }
 0x1f1   : > { %8813 = vst [vmem:[#allocation120_spill] sm:$0xff] %v6908_v24 }
 0x1f2   : > { %565 = vst.msk [vmem:[#allocation3 + $0x128] sm:$0xff] %vm463_vm2, %v8808_v1 }
 0x1f3   : > { %3978 = vst.msk [vmem:[#allocation2 + $0x148] sm:$0xff] %vm463_vm2, %v6896_v39 }
 0x1f4   : > { %8814 = vst [vmem:[#allocation121_spill] sm:$0xff] %v6916_v60  ;;  %2211 = vperm.xlu2 %5302, %v6560_v27  }
 0x1f5   : > { %3962 = vst.msk [vmem:[#allocation2 + $0xc8] sm:$0xff] %vm463_vm2, %v6899_v40 }
 0x1f6   : > { %8815 = vst [vmem:[#allocation122_spill] sm:$0xff] %v6923_v12  ;;  %v1875_v12 = vpop.xlane.xlu0 %1874 }
 0x1f7   : > { %3994 = vst.msk [vmem:[#allocation2 + $0x1c8] sm:$0xff] %vm463_vm2, %v6908_v24  ;;  %v6989_v47 = vmax.f32 %v6972_v2, %v1875_v12  ;;  %v7005_v12 = vld [vmem:[#allocation2 + $0x60] sm:$0xff]  ;;  %2296 = vperm.xlu0 %5303, %v6632_v15   ;;  %v860_v15 = vld [vmem:[%s6964_s6 + $0x58] sm:$0xff] }
 0x1f8   : > { %8816 = vst [vmem:[#allocation123_spill] sm:$0xff] %v6928_v3  ;;  %v1843_v3 = vpop.xlane.xlu2 %1842 }
 0x1f9   : > { %8817 = vst [vmem:[#allocation124_spill] sm:$0xff] %v6930_v35  ;;  %v879_v35 = vld [vmem:[%s6964_s6 + $0xf0] sm:$0xff]  ;;  %v6981_v60 = vmax.f32 %v6966_v56, %v1843_v3  ;;  %v7001_v3 = vld [vmem:[#allocation2 + $0x158] sm:$0xff] }
 0x1fa   : > { %566 = vst.msk [vmem:[#allocation3 + $0x130] sm:$0xff] %vm463_vm2, %v8808_v1  ;;  %3615 = vmatpush.msrb.mxu1 %v879_v35 }
 0x1fb   : > { %8818 = vst [vmem:[#allocation125_spill] sm:$0xff] %v6934_v28  ;;  %v1937_v28 = vpop.xlane.xlu1 %1936 }
 0x1fc   : > { %567 = vst.msk [vmem:[#allocation3 + $0x138] sm:$0xff] %vm463_vm2, %v8808_v1  ;;  %v6984_v46 = vmax.f32 %v6968_v58, %v1937_v28  ;;  %2451 = vperm.xlu2 %5302, %v6552_v0  }
 0x1fd   : > { %568 = vst.msk [vmem:[#allocation3 + $0x140] sm:$0xff] %vm463_vm2, %v8808_v1 }
 0x1fe   : > { %8819 = vst [vmem:[#allocation126_spill] sm:$0xff] %v6942_v42  ;;  %v1845_v57 = vpop.xlane.xlu0 %1844 }
 0x1ff   : > { %8820 = vst [vmem:[#allocation127_spill] sm:$0xff] %v6945_v22  ;;  %v7023_v26 = vmax.f32 %v7005_v12, %v1845_v57  ;;  %v7036_v57 = vld [vmem:[#allocation2 + $0x160] sm:$0xff]  ;;  %2461 = vperm.xlu0 %5303, %v6645_v19  }
 0x200   : > { %569 = vst.msk [vmem:[#allocation3 + $0x148] sm:$0xff] %vm463_vm2, %v8808_v1  ;;  %v1939_v35 = vpop.xlane.xlu2 %1938  ;;  %2366 = vperm.xlu1 %5301, %v6519_v45  }
 0x201   : > { %8821 = vst [vmem:[#allocation128_spill] sm:$0xff] %v6950_v51 }
 0x202   : > { %570 = vst.msk [vmem:[#allocation3 + $0x150] sm:$0xff] %vm463_vm2, %v8808_v1 }
 0x203   : > { %3963 = vst.msk [vmem:[#allocation2 + $0xd0] sm:$0xff] %vm463_vm2, %v6942_v42  ;;  %v1907_v28 = vpop.xlane.xlu1 %1906 }
 0x204   : > { %3947 = vst.msk [vmem:[#allocation2 + $0x50] sm:$0xff] %vm463_vm2, %v6945_v22  ;;  %v7018_v61 = vmax.f32 %v7001_v3, %v1907_v28  ;;  %2376 = vperm.xlu2 %5302, %v6608_v4  }
 0x205   : > { %3979 = vst.msk [vmem:[#allocation2 + $0x150] sm:$0xff] %vm463_vm2, %v6950_v51 }
 0x206   : > { %8822 = vst [vmem:[#allocation129_spill] sm:$0xff] %v6966_v56  ;;  %v877_v56 = vld [vmem:[%s6964_s6 + $0xe0] sm:$0xff]  ;;  %v1941_v10 = vpop.xlane.xlu0 %1940 }
 0x207   : > { %8823 = vst [vmem:[#allocation130_spill] sm:$0xff] %v6968_v58  ;;  %v878_v58 = vld [vmem:[%s6964_s6 + $0xe8] sm:$0xff]  ;;  %2386 = vperm.xlu0 %5303, %v6681_v59  }
 0x208   : > { %571 = vst.msk [vmem:[#allocation3 + $0x158] sm:$0xff] %vm463_vm2, %v8808_v1  ;;  %3616 = vmatpush.msrb.mxu1 %v878_v58  ;;  %v875_v58 = vld [vmem:[%s6964_s6 + $0xd0] sm:$0xff]  ;;  %v1909_v28 = vpop.xlane.xlu2 %1908  ;;  %2291 = vperm.xlu1 %5301, %v6541_v7   ;;  %v865_v7 = vld [vmem:[%s6964_s6 + $0x80] sm:$0xff] }
 0x209   : > { %8824 = vst [vmem:[#allocation131_spill] sm:$0xff] %v6972_v2  ;;  %v7015_v2 = vmax.f32 %v6999_v41, %v1939_v35  ;;  %v7038_v35 = vld [vmem:[#allocation2 + $0xe0] sm:$0xff]  ;;  %v7053_v27 = vmax.f32 %v7036_v57, %v1909_v28  ;;  %v872_v28 = vld [vmem:[%s6964_s6 + $0xb8] sm:$0xff] }
 0x20a   : > { %572 = vst.msk [vmem:[#allocation3 + $0x160] sm:$0xff] %vm463_vm2, %v8808_v1  ;;  %3617 = vmatpush.msrb.mxu1 %v877_v56  ;;  %v7042_v56 = vld [vmem:[#allocation2 + $0x1e0] sm:$0xff] }
 0x20b   : > { %573 = vst.msk [vmem:[#allocation3 + $0x168] sm:$0xff] %vm463_vm2, %v8808_v1 }
 0x20c   : > { %8825 = vst [vmem:[#allocation132_spill] sm:$0xff] %v6981_v60  ;;  %3618 = vmatpush.msrb.mxu1 %v876_v32  ;;  %v874_v32 = vld [vmem:[%s6964_s6 + $0xc8] sm:$0xff]  ;;  %2221 = vperm.xlu2 %5302, %v6629_v38   ;;  %v899_v38 = vld [vmem:[%s6964_s6 + $0x190] sm:$0xff] }
 0x20d   : > { %8826 = vst [vmem:[#allocation133_spill] sm:$0xff] %v6984_v46 }
 0x20e   : > { %574 = vst.msk [vmem:[#allocation3 + $0x170] sm:$0xff] %vm463_vm2, %v8808_v1  ;;  %3619 = vmatpush.msrb.mxu1 %v875_v58  ;;  %v1911_v45 = vpop.xlane.xlu0 %1910 }
 0x20f   : > { %8827 = vst [vmem:[#allocation134_spill] sm:$0xff] %v6989_v47  ;;  %2311 = vperm.xlu0 %5303, %v6712_v14  }
 0x210   : > { %575 = vst.msk [vmem:[#allocation3 + $0x178] sm:$0xff] %vm463_vm2, %v8808_v1  ;;  %3620 = vmatpush.msrb.mxu1 %v874_v32  ;;  %v910_v32 = vld [vmem:[%s6964_s6 + $0x1e8] sm:$0xff]  ;;  %2456 = vperm.xlu1 %5301, %v6568_v62  }
 0x211   : > { %3948 = vst.msk [vmem:[#allocation2 + $0x58] sm:$0xff] %vm463_vm2, %v6981_v60 }
 0x212   : > { %3995 = vst.msk [vmem:[#allocation2 + $0x1d0] sm:$0xff] %vm463_vm2, %v6984_v46 }
 0x213   : > { %3964 = vst.msk [vmem:[#allocation2 + $0xd8] sm:$0xff] %vm463_vm2, %v6989_v47 }
 0x214   : > { %8828 = vst [vmem:[#allocation135_spill] sm:$0xff] %v6999_v41  ;;  %v1877_v41 = vpop.xlane.xlu1 %1876  ;;  %2301 = vperm.xlu2 %5302, %v6676_v50  }
 0x215   : > { %8829 = vst [vmem:[#allocation136_spill] sm:$0xff] %v7001_v3  ;;  %v912_v3 = vld [vmem:[%s6964_s6 + $0x1f8] sm:$0xff]  ;;  %v7056_v58 = vmax.f32 %v7038_v35, %v1877_v41  ;;  %v863_v41 = vld [vmem:[%s6964_s6 + $0x70] sm:$0xff] }
 0x216   : > { %577 = vst.msk [vmem:[#allocation3 + $0x188] sm:$0xff] %vm463_vm2, %v8808_v1  ;;  %3744 = vmatpush.msrb.mxu3 %v912_v3  ;;  %v862_v3 = vld [vmem:[%s6964_s6 + $0x68] sm:$0xff]  ;;  %v1881_v4 = vpop.xlane.xlu0 %1880 }
 0x217   : > { %8830 = vst [vmem:[#allocation137_spill] sm:$0xff] %v7005_v12  ;;  %v873_v12 = vld [vmem:[%s6964_s6 + $0xc0] sm:$0xff]  ;;  %2476 = vperm.xlu0 %5303, %v6777_v29  }
 0x218   : > { %578 = vst.msk [vmem:[#allocation3 + $0x190] sm:$0xff] %vm463_vm2, %v8808_v1  ;;  %3621 = vmatpush.msrb.mxu1 %v873_v12  ;;  %3745 = vmatpush.msrb.mxu3 %v911_v34  ;;  %v7083_v12 = vld [vmem:[#allocation2 + $0x68] sm:$0xff] }
 0x219   : > { %579 = vst.msk [vmem:[#allocation3 + $0x198] sm:$0xff] %vm463_vm2, %v8808_v1  ;;  %v7088_v34 = vld [vmem:[#allocation2 + $0x168] sm:$0xff]  ;;  %2381 = vperm.xlu1 %5301, %v6601_v13  }
 0x21a   : > { %8831 = vst [vmem:[#allocation138_spill] sm:$0xff] %v7015_v2  ;;  %3622 = vmatpush.msrb.mxu1 %v872_v28  ;;  %3746 = vmatpush.msrb.mxu3 %v910_v32  ;;  %v908_v28 = vld [vmem:[%s6964_s6 + $0x1d8] sm:$0xff]  ;;  %v869_v32 = vld [vmem:[%s6964_s6 + $0xa0] sm:$0xff] }
 0x21b   : > { %8832 = vst [vmem:[#allocation139_spill] sm:$0xff] %v7018_v61 }
 0x21c   : > { %580 = vst.msk [vmem:[#allocation3 + $0x1a0] sm:$0xff] %vm463_vm2, %v8808_v1  ;;  %v1847_v0 = vpop.xlane.xlu1 %1846  ;;  %2466 = vperm.xlu2 %5302, %v6707_v17  }
 0x21d   : > { %8833 = vst [vmem:[#allocation140_spill] sm:$0xff] %v7023_v26 }
 0x21e   : > { %581 = vst.msk [vmem:[#allocation3 + $0x1a8] sm:$0xff] %vm463_vm2, %v8808_v1 }
 0x21f   : > { %3996 = vst.msk [vmem:[#allocation2 + $0x1d8] sm:$0xff] %vm463_vm2, %v7015_v2  ;;  %v864_v2 = vld [vmem:[%s6964_s6 + $0x78] sm:$0xff]  ;;  %2401 = vperm.xlu0 %5303, %v6808_v30  }
 0x220   : > { %3980 = vst.msk [vmem:[#allocation2 + $0x158] sm:$0xff] %vm463_vm2, %v7018_v61  ;;  %v7064_v61 = vmax.f32 %v7042_v56, %v1941_v10  ;;  %3549 = vmatpush.msrb.mxu0 %v864_v2  ;;  %v871_v10 = vld [vmem:[%s6964_s6 + $0xb0] sm:$0xff]  ;;  %v909_v2 = vld [vmem:[%s6964_s6 + $0x1e0] sm:$0xff] }
 0x221   : > { %3949 = vst.msk [vmem:[#allocation2 + $0x60] sm:$0xff] %vm463_vm2, %v7023_v26  ;;  %3623 = vmatpush.msrb.mxu1 %v871_v10  ;;  %3747 = vmatpush.msrb.mxu3 %v909_v2  ;;  %v7110_v2 = vmax.f32 %v7088_v34, %v1911_v45  ;;  %v859_v45 = vld [vmem:[%s6964_s6 + $0x50] sm:$0xff] }
 0x222   : > { %8834 = vst [vmem:[#allocation141_spill] sm:$0xff] %v7036_v57  ;;  %3550 = vmatpush.msrb.mxu0 %v863_v41  ;;  %v7081_v57 = vld [vmem:[#allocation2 + $0xe8] sm:$0xff]  ;;  %v861_v41 = vld [vmem:[%s6964_s6 + $0x60] sm:$0xff]  ;;  %2226 = vperm.xlu1 %5301, %v6626_v53  }
 0x223   : > { %8835 = vst [vmem:[#allocation142_spill] sm:$0xff] %v7038_v35  ;;  %v870_v35 = vld [vmem:[%s6964_s6 + $0xa8] sm:$0xff]  ;;  %3748 = vmatpush.msrb.mxu3 %v908_v28  ;;  %v905_v28 = vld [vmem:[%s6964_s6 + $0x1c0] sm:$0xff] }
 0x224   : > { %582 = vst.msk [vmem:[#allocation3 + $0x1b0] sm:$0xff] %vm463_vm2, %v8808_v1  ;;  %3551 = vmatpush.msrb.mxu0 %v862_v3  ;;  %v7102_v3 = vmax.f32 %v7083_v12, %v1847_v0  ;;  %3624 = vmatpush.msrb.mxu1 %v870_v35  ;;  %v906_v0 = vld [vmem:[%s6964_s6 + $0x1c8] sm:$0xff]  ;;  %v867_v35 = vld [vmem:[%s6964_s6 + $0x90] sm:$0xff] }
 0x225   : > { %8836 = vst [vmem:[#allocation143_spill] sm:$0xff] %v7042_v56  ;;  %v1879_v56 = vpop.xlane.xlu2 %1878  ;;  %2231 = vperm.xlu2 %5302, %v6704_v55  }
 0x226   : > { %583 = vst.msk [vmem:[#allocation3 + $0x1b8] sm:$0xff] %vm463_vm2, %v8808_v1  ;;  %v7099_v10 = vmax.f32 %v7081_v57, %v1879_v56  ;;  %3552 = vmatpush.msrb.mxu0 %v861_v41  ;;  %v868_v56 = vld [vmem:[%s6964_s6 + $0x98] sm:$0xff]  ;;  %3625 = vmatpush.msrb.mxu1 %v869_v32  ;;  %v7126_v41 = vld [vmem:[#allocation2 + $0x70] sm:$0xff]  ;;  %v7128_v32 = vld [vmem:[#allocation2 + $0x1e8] sm:$0xff] }
 0x227   : > { %584 = vst.msk [vmem:[#allocation3 + $0x1c0] sm:$0xff] %vm463_vm2, %v8808_v1  ;;  %2326 = vperm.xlu0 %5303, %v6839_v43  }
 0x228   : > { %8837 = vst [vmem:[#allocation144_spill] sm:$0xff] %v7053_v27  ;;  %3553 = vmatpush.msrb.mxu0 %v860_v15  ;;  %3626 = vmatpush.msrb.mxu1 %v868_v56  ;;  %v866_v15 = vld [vmem:[%s6964_s6 + $0x88] sm:$0xff]  ;;  %v904_v56 = vld [vmem:[%s6964_s6 + $0x1b8] sm:$0xff] }
 0x229   : > { %8838 = vst [vmem:[#allocation145_spill] sm:$0xff] %v7056_v58 }
 0x22a   : > { %585 = vst.msk [vmem:[#allocation3 + $0x1c8] sm:$0xff] %vm463_vm2, %v8808_v1  ;;  %3554 = vmatpush.msrb.mxu0 %v859_v45  ;;  %3627 = vmatpush.msrb.mxu1 %v867_v35 }
 0x22b   : > { %8839 = vst [vmem:[#allocation146_spill] sm:$0xff] %v7064_v61  ;;  %2306 = vperm.xlu1 %5301, %v6673_v36  }
 0x22c   : > { %586 = vst.msk [vmem:[#allocation3 + $0x1d0] sm:$0xff] %vm463_vm2, %v8808_v1  ;;  %3628 = vmatpush.msrb.mxu1 %v866_v15  ;;  %v7170_v15 = vld [vmem:[#allocation2 + $0x1f0] sm:$0xff] }
 0x22d   : > { %3981 = vst.msk [vmem:[#allocation2 + $0x160] sm:$0xff] %vm463_vm2, %v7053_v27  ;;  %v907_v27 = vld [vmem:[%s6964_s6 + $0x1d0] sm:$0xff]  ;;  %2391 = vperm.xlu2 %5302, %v6738_v20  }
 0x22e   : > { %3965 = vst.msk [vmem:[#allocation2 + $0xe0] sm:$0xff] %vm463_vm2, %v7056_v58  ;;  %3749 = vmatpush.msrb.mxu3 %v907_v27  ;;  %v7133_v27 = vld [vmem:[#allocation2 + $0xf0] sm:$0xff]  ;;  %3629 = vmatpush.msrb.mxu1 %v865_v7  ;;  %v7177_v7 = vld [vmem:[#allocation2 + $0x78] sm:$0xff] }
 0x22f   : > { %3997 = vst.msk [vmem:[#allocation2 + $0x1e0] sm:$0xff] %vm463_vm2, %v7064_v61  ;;  %2251 = vperm.xlu0 %5303, %v6871_v8  }
 0x230   : > { %8840 = vst [vmem:[#allocation147_spill] sm:$0xff] %v7081_v57  ;;  %3750 = vmatpush.msrb.mxu3 %v906_v0  ;;  %v858_v57 = vld [vmem:[%s6964_s6 + $0x48] sm:$0xff]  ;;  %v857_v0 = vld [vmem:[%s6964_s6 + $0x40] sm:$0xff] }
 0x231   : > { %8841 = vst [vmem:[#allocation148_spill] sm:$0xff] %v7083_v12  ;;  %v1943_v12 = vpop.xlane.xlu1 %1942  ;;  %3555 = vmatpush.msrb.mxu0 %v858_v57  ;;  %v902_v57 = vld [vmem:[%s6964_s6 + $0x1a8] sm:$0xff] }
 0x232   : > { %587 = vst.msk [vmem:[#allocation3 + $0x1d8] sm:$0xff] %vm463_vm2, %v8808_v1  ;;  %3751 = vmatpush.msrb.mxu3 %v905_v28  ;;  %v7147_v35 = vmax.f32 %v7128_v32, %v1943_v12  ;;  %v7155_v28 = vmax.f32 %v7133_v27, %v1881_v4  ;;  %v855_v4 = vld [vmem:[%s6964_s6 + $0x30] sm:$0xff]  ;;  %v901_v12 = vld [vmem:[%s6964_s6 + $0x1a0] sm:$0xff] }
 0x233   : > { %8842 = vst [vmem:[#allocation149_spill] sm:$0xff] %v7088_v34  ;;  %v1849_v34 = vpop.xlane.xlu2 %1848  ;;  %3556 = vmatpush.msrb.mxu0 %v857_v0  ;;  %v854_v0 = vld [vmem:[%s6964_s6 + $0x28] sm:$0xff]  ;;  %2471 = vperm.xlu1 %5301, %v6735_v63  }
 0x234   : > { %588 = vst.msk [vmem:[#allocation3 + $0x1e0] sm:$0xff] %vm463_vm2, %v8808_v1  ;;  %v7144_v45 = vmax.f32 %v7126_v41, %v1849_v34  ;;  %3752 = vmatpush.msrb.mxu3 %v904_v56  ;;  %v856_v34 = vld [vmem:[%s6964_s6 + $0x38] sm:$0xff]  ;;  %v7172_v56 = vld [vmem:[#allocation2 + $0x170] sm:$0xff] }
 0x235   : > { %589 = vst.msk [vmem:[#allocation3 + $0x1e8] sm:$0xff] %vm463_vm2, %v8808_v1  ;;  %3557 = vmatpush.msrb.mxu0 %v856_v34  ;;  %2316 = vperm.xlu2 %5302, %v6772_v54  }
 0x236   : > { %8843 = vst [vmem:[#allocation150_spill] sm:$0xff] %v7099_v10 }
 0x237   : > { %8844 = vst [vmem:[#allocation151_spill] sm:$0xff] %v7102_v3  ;;  %3558 = vmatpush.msrb.mxu0 %v855_v4  ;;  %2491 = vperm.xlu0 %5303, %v6908_v24  }
 0x238   : > { %590 = vst.msk [vmem:[#allocation3 + $0x1f0] sm:$0xff] %vm463_vm2, %v8808_v1 }
 0x239   : > { %8845 = vst [vmem:[#allocation152_spill] sm:$0xff] %v7110_v2  ;;  %3559 = vmatpush.msrb.mxu0 %v854_v0  ;;  %v851_v0 = vld [vmem:[%s6964_s6 + $0x10] sm:$0xff] }
 0x23a   : > { %591 = vst.msk [vmem:[#allocation3 + $0x1f8] sm:$0xff] %vm463_vm2, %v8808_v1 }
 0x23b   : > { %3966 = vst.msk [vmem:[#allocation2 + $0xe8] sm:$0xff] %vm463_vm2, %v7099_v10  ;;  %v903_v10 = vld [vmem:[%s6964_s6 + $0x1b0] sm:$0xff]  ;;  %v1945_v34 = vpop.xlane.xlu2 %1944  ;;  %2236 = vperm.xlu1 %5301, %v6744_v11  }
 0x23c   : > { %3950 = vst.msk [vmem:[#allocation2 + $0x68] sm:$0xff] %vm463_vm2, %v7102_v3  ;;  %3753 = vmatpush.msrb.mxu3 %v903_v10  ;;  %v900_v10 = vld [vmem:[%s6964_s6 + $0x198] sm:$0xff] }
 0x23d   : > { %3982 = vst.msk [vmem:[#allocation2 + $0x168] sm:$0xff] %vm463_vm2, %v7110_v2  ;;  %2241 = vperm.xlu2 %5302, %v6803_v49  }
 0x23e   : > { %8846 = vst [vmem:[#allocation153_spill] sm:$0xff] %v7126_v41  ;;  %3754 = vmatpush.msrb.mxu3 %v902_v57  ;;  %v853_v57 = vld [vmem:[%s6964_s6 + $0x20] sm:$0xff]  ;;  %v1851_v41 = vpop.xlane.xlu0 %1850 }
 0x23f   : > { %8847 = vst [vmem:[#allocation154_spill] sm:$0xff] %v7128_v32  ;;  %v1913_v32 = vpop.xlane.xlu1 %1912  ;;  %3560 = vmatpush.msrb.mxu0 %v853_v57  ;;  %2416 = vperm.xlu0 %5303, %v6950_v51  }
 0x240   : > { %593 = vst.msk [vmem:[#allocation4] sm:$0xff] %vm592_vm0, %v8808_v1  ;;  %3755 = vmatpush.msrb.mxu3 %v901_v12  ;;  %v7190_v4 = vmax.f32 %v7172_v56, %v1913_v32  ;;  %v7197_v12 = vmax.f32 %v7177_v7, %v1851_v41  ;;  %v898_v32 = vld [vmem:[%s6964_s6 + $0x188] sm:$0xff]  ;;  %v897_v41 = vld [vmem:[%s6964_s6 + $0x180] sm:$0xff] }
 0x241   : > { %8848 = vst [vmem:[#allocation155_spill] sm:$0xff] %v7133_v27  ;;  %v7187_v27 = vmax.f32 %v7170_v15, %v1945_v34  ;;  %v852_v34 = vld [vmem:[%s6964_s6 + $0x18] sm:$0xff] }
 0x242   : > { %594 = vst.msk [vmem:[#allocation4 + $0x8] sm:$0xff] %vm592_vm0, %v8808_v1  ;;  %3756 = vmatpush.msrb.mxu3 %v900_v10  ;;  %3561 = vmatpush.msrb.mxu0 %v852_v34  ;;  %v850_v10 = vld [vmem:[%s6964_s6 + $0x8] sm:$0xff] }
 0x243   : > { %595 = vst.msk [vmem:[#allocation4 + $0x10] sm:$0xff] %vm592_vm0, %v8808_v1  ;;  %v2287_v57 = vpop.permute.xlu2 %2286  ;;  %2396 = vperm.xlu1 %5301, %v6769_v37  }
 0x244   : > { %8849 = vst [vmem:[#allocation156_spill] sm:$0xff] %v7144_v45  ;;  %3757 = vmatpush.msrb.mxu3 %v899_v38  ;;  %3562 = vmatpush.msrb.mxu0 %v851_v0  ;;  %v849_v38 = vld [vmem:[%s6964_s6] sm:$0xff]  ;;  %v2540_v34 = vsub.f32 %v6045_v9, %v2287_v57 }
 0x245   : > { %8850 = vst [vmem:[#allocation157_spill] sm:$0xff] %v7147_v35  ;;  %2481 = vperm.xlu2 %5302, %v6834_v25  }
 0x246   : > { %596 = vst.msk [vmem:[#allocation4 + $0x18] sm:$0xff] %vm592_vm0, %v8808_v1  ;;  %3758 = vmatpush.msrb.mxu3 %v898_v32  ;;  %3563 = vmatpush.msrb.mxu0 %v850_v10  ;;  %v2620_v32 = vmul.f32 1.442695, %v2540_v34  ;;  %v2447_v0 = vpop.permute.xlu0 %2446 }
 0x247   : > { %8851 = vst [vmem:[#allocation158_spill] sm:$0xff] %v7155_v28  ;;  %v2207_v57 = vpop.permute.xlu1 %2206  ;;  %2341 = vperm.xlu0 %5303, %v6989_v47   ;;  %v8886_v47 = vld [vmem:[#allocation21_spill] sm:$0xff] }
 0x248   : > { %597 = vst.msk [vmem:[#allocation4 + $0x20] sm:$0xff] %vm592_vm0, %v8808_v1  ;;  %3759 = vmatpush.msrb.mxu3 %v897_v41  ;;  %3564 = vmatpush.msrb.mxu0 %v849_v38  ;;  %5304 = vpow2.f32 %v2620_v32  ;;  %v2572_v41 = vsub.f32 %v6055_v18, %v2447_v0  ;;  %v2524_v18 = vsub.f32 %v6039_v5, %v2207_v57  ;;  %v896_v32 = vld [vmem:[%s6964_s6 + $0x178] sm:$0xff]  ;;  %v895_v0 = vld [vmem:[%s6964_s6 + $0x170] sm:$0xff] }
 0x249   : > { %3951 = vst.msk [vmem:[#allocation2 + $0x70] sm:$0xff] %vm463_vm2, %v7144_v45  ;;  %3679 = vmatpush.msrb.mxu2 %v896_v32  ;;  %v892_v57 = vld [vmem:[%s6964_s6 + $0x158] sm:$0xff]  ;;  %v889_v32 = vld [vmem:[%s6964_s6 + $0x140] sm:$0xff] }
 0x24a   : > { %3998 = vst.msk [vmem:[#allocation2 + $0x1e8] sm:$0xff] %vm463_vm2, %v7147_v35  ;;  %v2684_v10 = vmul.f32 1.442695, %v2572_v41  ;;  %v2588_v38 = vmul.f32 1.442695, %v2524_v18  ;;  %v894_v41 = vld [vmem:[%s6964_s6 + $0x168] sm:$0xff] }
 0x24b   : > { %3967 = vst.msk [vmem:[#allocation2 + $0xf0] sm:$0xff] %vm463_vm2, %v7155_v28  ;;  %3680 = vmatpush.msrb.mxu2 %v895_v0  ;;  %2321 = vperm.xlu1 %5301, %v6800_v52   ;;  %v891_v18 = vld [vmem:[%s6964_s6 + $0x150] sm:$0xff]  ;;  %v888_v0 = vld [vmem:[%s6964_s6 + $0x138] sm:$0xff] }
 0x24c   : > { %8852 = vst [vmem:[#allocation159_spill] sm:$0xff] %v7170_v15  ;;  %5306 = vpow2.f32 %v2684_v10  ;;  %v893_v10 = vld [vmem:[%s6964_s6 + $0x160] sm:$0xff] }
 0x24d   : > { %8853 = vst [vmem:[#allocation160_spill] sm:$0xff] %v7172_v56  ;;  %5308 = vpow2.f32 %v2588_v38  ;;  %3681 = vmatpush.msrb.mxu2 %v894_v41  ;;  %v890_v38 = vld [vmem:[%s6964_s6 + $0x148] sm:$0xff]  ;;  %v7363_v41 = vld [vmem:[#allocation2 + $0x1f8] sm:$0xff]  ;;  %2406 = vperm.xlu2 %5302, %v6865_v23   ;;  %v885_v15 = vld [vmem:[%s6964_s6 + $0x120] sm:$0xff] }
 0x24e   : > { %598 = vst.msk [vmem:[#allocation4 + $0x28] sm:$0xff] %vm592_vm0, %v8808_v1  ;;  %v7246_v9 = vpop.eup %5304 }
 0x24f   : > { %8854 = vst [vmem:[#allocation161_spill] sm:$0xff] %v7177_v7  ;;  %3630 = vmatmul.f32.vlgmr.msrb.gmra.mxu1 %v7246_v9  ;;  %3682 = vmatpush.msrb.mxu2 %v893_v10  ;;  %v887_v10 = vld [vmem:[%s6964_s6 + $0x130] sm:$0xff]  ;;  %v1915_v56 = vpop.xlane.xlu2 %1914 }
 0x250   : > { %599 = vst.msk [vmem:[#allocation4 + $0x30] sm:$0xff] %vm592_vm0, %v8808_v1  ;;  %2266 = vperm.xlu0 %5303, %v7023_v26  }
 0x251   : > { %600 = vst.msk [vmem:[#allocation4 + $0x38] sm:$0xff] %vm592_vm0, %v8808_v1  ;;  %3683 = vmatpush.msrb.mxu2 %v892_v57  ;;  %v7367_v57 = vld [vmem:[#allocation2 + $0x178] sm:$0xff] }
 0x252   : > { %8855 = vst [vmem:[#allocation162_spill] sm:$0xff] %v7187_v27  ;;  %v7279_v5 = vpop.eup %5306 }
 0x253   : > { %8856 = vst [vmem:[#allocation163_spill] sm:$0xff] %v7190_v4  ;;  %3760 = vmatmul.f32.vlgmr.msrb.gmra.mxu3 %v7279_v5  ;;  %v7292_v34 = vpop.eup %5308  ;;  %3684 = vmatpush.msrb.mxu2 %v891_v18  ;;  %v1947_v18 = vpop.xlane.xlu0 %1946 }
 0x254   : > { %601 = vst.msk [vmem:[#allocation4 + $0x40] sm:$0xff] %vm592_vm0, %v8808_v1  ;;  %3565 = vmatmul.f32.vlgmr.msrb.gmra.mxu0 %v7292_v34  ;;  %2246 = vperm.xlu1 %5301, %v6831_v21  }
 0x255   : > { %8857 = vst [vmem:[#allocation164_spill] sm:$0xff] %v7197_v12  ;;  %3685 = vmatpush.msrb.mxu2 %v890_v38  ;;  %v7371_v38 = vmax.f32 %v7363_v41, %v1947_v18  ;;  %v884_v18 = vld [vmem:[%s6964_s6 + $0x118] sm:$0xff]  ;;  %2331 = vperm.xlu2 %5302, %v6899_v40  }
 0x256   : > { %602 = vst.msk [vmem:[#allocation4 + $0x48] sm:$0xff] %vm592_vm0, %v8808_v1 }
 0x257   : > { %3999 = vst.msk [vmem:[#allocation2 + $0x1f0] sm:$0xff] %vm463_vm2, %v7187_v27  ;;  %3686 = vmatpush.msrb.mxu2 %v889_v32  ;;  %v886_v32 = vld [vmem:[%s6964_s6 + $0x128] sm:$0xff] }
 0x258   : > { %3983 = vst.msk [vmem:[#allocation2 + $0x170] sm:$0xff] %vm463_vm2, %v7190_v4  ;;  %2506 = vperm.xlu0 %5303, %v7064_v61  }
 0x259   : > { %3952 = vst.msk [vmem:[#allocation2 + $0x78] sm:$0xff] %vm463_vm2, %v7197_v12  ;;  %3687 = vmatpush.msrb.mxu2 %v888_v0  ;;  %v7379_v0 = vmax.f32 %v7367_v57, %v1915_v56 }
 0x25a   : > { %603 = vst.msk [vmem:[#allocation4 + $0x50] sm:$0xff] %vm592_vm0, %v8808_v1  ;;  %v1883_v7 = vpop.xlane.xlu1 %1882 }
 0x25b   : > { %604 = vst.msk [vmem:[#allocation4 + $0x58] sm:$0xff] %vm592_vm0, %v8808_v1  ;;  %3688 = vmatpush.msrb.mxu2 %v887_v10  ;;  %v881_v10 = vld [vmem:[%s6964_s6 + $0x100] sm:$0xff] }
 0x25c   : > { %605 = vst.msk [vmem:[#allocation4 + $0x60] sm:$0xff] %vm592_vm0, %v8808_v1  ;;  %2486 = vperm.xlu1 %5301, %v6862_v6  }
 0x25d   : > { %606 = vst.msk [vmem:[#allocation4 + $0x68] sm:$0xff] %vm592_vm0, %v8808_v1  ;;  %3689 = vmatpush.msrb.mxu2 %v886_v32  ;;  %v883_v32 = vld [vmem:[%s6964_s6 + $0x110] sm:$0xff]  ;;  %2256 = vperm.xlu2 %5302, %v6945_v22  }
 0x25e   : > { %607 = vst.msk [vmem:[#allocation4 + $0x70] sm:$0xff] %vm592_vm0, %v8808_v1 }
 0x25f   : > { %608 = vst.msk [vmem:[#allocation4 + $0x78] sm:$0xff] %vm592_vm0, %v8808_v1  ;;  %3690 = vmatpush.msrb.mxu2 %v885_v15  ;;  %v882_v15 = vld [vmem:[%s6964_s6 + $0x108] sm:$0xff] }
 0x260   : > { %609 = vst.msk [vmem:[#allocation4 + $0x80] sm:$0xff] %vm592_vm0, %v8808_v1  ;;  %2431 = vperm.xlu0 %5303, %v7110_v2   ;;  %v8865_v2 = vld [vmem:[#allocation138_spill] sm:$0xff] }
 0x261   : > { %610 = vst.msk [vmem:[#allocation4 + $0x88] sm:$0xff] %vm592_vm0, %v8808_v1  ;;  %3691 = vmatpush.msrb.mxu2 %v884_v18 }
 0x262   : > { %611 = vst.msk [vmem:[#allocation4 + $0x90] sm:$0xff] %vm592_vm0, %v8808_v1 }
 0x263   : > { %612 = vst.msk [vmem:[#allocation4 + $0x98] sm:$0xff] %vm592_vm0, %v8808_v1  ;;  %3692 = vmatpush.msrb.mxu2 %v883_v32 }
 0x264   : > { %613 = vst.msk [vmem:[#allocation4 + $0xa0] sm:$0xff] %vm592_vm0, %v8808_v1  ;;  %2411 = vperm.xlu1 %5301, %v6896_v39  }
 0x265   : > { %614 = vst.msk [vmem:[#allocation4 + $0xa8] sm:$0xff] %vm592_vm0, %v8808_v1  ;;  %3693 = vmatpush.msrb.mxu2 %v882_v15  ;;  %2496 = vperm.xlu2 %5302, %v6984_v46  }
 0x266   : > { %615 = vst.msk [vmem:[#allocation4 + $0xb0] sm:$0xff] %vm592_vm0, %v8808_v1 }
 0x267   : > { %616 = vst.msk [vmem:[#allocation4 + $0xb8] sm:$0xff] %vm592_vm0, %v8808_v1  ;;  %3694 = vmatpush.msrb.mxu2 %v881_v10 }
 0x268   : > { %617 = vst.msk [vmem:[#allocation4 + $0xc0] sm:$0xff] %vm592_vm0, %v8808_v1  ;;  %2356 = vperm.xlu0 %5303, %v7155_v28  }
 0x269   : > { %618 = vst.msk [vmem:[#allocation4 + $0xc8] sm:$0xff] %vm592_vm0, %v8808_v1 }
 0x26a   : > { %619 = vst.msk [vmem:[#allocation4 + $0xd0] sm:$0xff] %vm592_vm0, %v8808_v1 }
 0x26b   : > { %620 = vst.msk [vmem:[#allocation4 + $0xd8] sm:$0xff] %vm592_vm0, %v8808_v1 }
 0x26c   : > { %621 = vst.msk [vmem:[#allocation4 + $0xe0] sm:$0xff] %vm592_vm0, %v8808_v1  ;;  %2336 = vperm.xlu1 %5301, %v6942_v42  }
 0x26d   : > { %622 = vst.msk [vmem:[#allocation4 + $0xe8] sm:$0xff] %vm592_vm0, %v8808_v1 }
 0x26e   : > { %623 = vst.msk [vmem:[#allocation4 + $0xf0] sm:$0xff] %vm592_vm0, %v8808_v1 }
 0x26f   : > { %624 = vst.msk [vmem:[#allocation4 + $0xf8] sm:$0xff] %vm592_vm0, %v8808_v1 }
 0x270   : > { %625 = vst.msk [vmem:[#allocation4 + $0x100] sm:$0xff] %vm592_vm0, %v8808_v1  ;;  %2281 = vperm.xlu0 %5303, %v7197_v12  }
 0x271   : > { %626 = vst.msk [vmem:[#allocation4 + $0x108] sm:$0xff] %vm592_vm0, %v8808_v1 }
 0x272   : > { %627 = vst.msk [vmem:[#allocation4 + $0x110] sm:$0xff] %vm592_vm0, %v8808_v1  ;;  %v2367_v10 = vpop.permute.xlu1 %2366 }
 0x273   : > { %628 = vst.msk [vmem:[#allocation4 + $0x118] sm:$0xff] %vm592_vm0, %v8808_v1 }
 0x274   : > { %629 = vst.msk [vmem:[#allocation4 + $0x120] sm:$0xff] %vm592_vm0, %v8808_v1  ;;  %2261 = vperm.xlu1 %5301, %v6981_v60  }
 0x275   : > { %630 = vst.msk [vmem:[#allocation4 + $0x128] sm:$0xff] %vm592_vm0, %v8808_v1 }
 0x276   : > { %631 = vst.msk [vmem:[#allocation4 + $0x130] sm:$0xff] %vm592_vm0, %v8808_v1 }
 0x277   : > { %632 = vst.msk [vmem:[#allocation4 + $0x138] sm:$0xff] %vm592_vm0, %v8808_v1 }
 0x278   : > { %633 = vst.msk [vmem:[#allocation4 + $0x140] sm:$0xff] %vm592_vm0, %v8808_v1  ;;  %2521 = vperm.xlu0 %5303, %v7371_v38  }
 0x279   : > { %634 = vst.msk [vmem:[#allocation4 + $0x148] sm:$0xff] %vm592_vm0, %v8808_v1 }
 0x27a   : > { %635 = vst.msk [vmem:[#allocation4 + $0x150] sm:$0xff] %vm592_vm0, %v8808_v1 }
 0x27b   : > { %636 = vst.msk [vmem:[#allocation4 + $0x158] sm:$0xff] %vm592_vm0, %v8808_v1 }
 0x27c   : > { %637 = vst.msk [vmem:[#allocation4 + $0x160] sm:$0xff] %vm592_vm0, %v8808_v1  ;;  %2501 = vperm.xlu1 %5301, %v8865_v2  }
 0x27d   : > { %638 = vst.msk [vmem:[#allocation4 + $0x168] sm:$0xff] %vm592_vm0, %v8808_v1 }
 0x27e   : > { %639 = vst.msk [vmem:[#allocation4 + $0x170] sm:$0xff] %vm592_vm0, %v8808_v1 }
 0x27f   : > { %640 = vst.msk [vmem:[#allocation4 + $0x178] sm:$0xff] %vm592_vm0, %v8808_v1 }
 0x280   : > { %641 = vst.msk [vmem:[#allocation4 + $0x180] sm:$0xff] %vm592_vm0, %v8808_v1 }
 0x281   : > { %642 = vst.msk [vmem:[#allocation4 + $0x188] sm:$0xff] %vm592_vm0, %v8808_v1 }
 0x282   : > { %643 = vst.msk [vmem:[#allocation4 + $0x190] sm:$0xff] %vm592_vm0, %v8808_v1 }
 0x283   : > { %644 = vst.msk [vmem:[#allocation4 + $0x198] sm:$0xff] %vm592_vm0, %v8808_v1 }
 0x284   : > { %645 = vst.msk [vmem:[#allocation4 + $0x1a0] sm:$0xff] %vm592_vm0, %v8808_v1 }
 0x285   : > { %646 = vst.msk [vmem:[#allocation4 + $0x1a8] sm:$0xff] %vm592_vm0, %v8808_v1 }
 0x286   : > { %647 = vst.msk [vmem:[#allocation4 + $0x1b0] sm:$0xff] %vm592_vm0, %v8808_v1 }
 0x287   : > { %648 = vst.msk [vmem:[#allocation4 + $0x1b8] sm:$0xff] %vm592_vm0, %v8808_v1 }
 0x288   : > { %649 = vst.msk [vmem:[#allocation4 + $0x1c0] sm:$0xff] %vm592_vm0, %v8808_v1 }
 0x289   : > { %650 = vst.msk [vmem:[#allocation4 + $0x1c8] sm:$0xff] %vm592_vm0, %v8808_v1 }
 0x28a   : > { %651 = vst.msk [vmem:[#allocation4 + $0x1d0] sm:$0xff] %vm592_vm0, %v8808_v1 }
 0x28b   : > { %652 = vst.msk [vmem:[#allocation4 + $0x1d8] sm:$0xff] %vm592_vm0, %v8808_v1 }
 0x28c   : > { %653 = vst.msk [vmem:[#allocation4 + $0x1e0] sm:$0xff] %vm592_vm0, %v8808_v1 }
 0x28d   : > { %654 = vst.msk [vmem:[#allocation4 + $0x1e8] sm:$0xff] %vm592_vm0, %v8808_v1 }
 0x28e   : > { %655 = vst.msk [vmem:[#allocation4 + $0x1f0] sm:$0xff] %vm592_vm0, %v8808_v1 }
 0x28f   : > { %656 = vst.msk [vmem:[#allocation4 + $0x1f8] sm:$0xff] %vm592_vm0, %v8808_v1  ;;  %v7376_v1 = vld [vmem:[#allocation2 + $0xf8] sm:$0xff] }
 0x290   : > { %8858 = vst [vmem:[#allocation165_spill] sm:$0xff] %v7363_v41  ;;  %v7389_v6 = vmax.f32 %v7376_v1, %v1883_v7  ;;  %v2372_v41 = vpop.permute.xlu0 %2371 }
 0x291   : > { %8859 = vst [vmem:[#allocation166_spill] sm:$0xff] %v7367_v57  ;;  %v2212_v57 = vpop.permute.xlu2 %2211 }
 0x292   : > { %8860 = vst [vmem:[#allocation167_spill] sm:$0xff] %v7371_v38  ;;  %v2525_v7 = vsub.f32 %v6072_v33, %v2212_v57 }
 0x293   : > { %8861 = vst [vmem:[#allocation168_spill] sm:$0xff] %v7376_v1 }
 0x294   : > { %8862 = vst [vmem:[#allocation169_spill] sm:$0xff] %v7379_v0  ;;  %v2590_v18 = vmul.f32 1.442695, %v2525_v7 }
 0x295   : > { %4000 = vst.msk [vmem:[#allocation2 + $0x1f8] sm:$0xff] %vm463_vm2, %v7371_v38 }
 0x296   : > { %3984 = vst.msk [vmem:[#allocation2 + $0x178] sm:$0xff] %vm463_vm2, %v7379_v0  ;;  %5310 = vpow2.f32 %v2590_v18 }
 0x297   : > { %8863 = vst [vmem:[#allocation170_spill] sm:$0xff] %v7389_v6 }
 0x298   : > { %3968 = vst.msk [vmem:[#allocation2 + $0xf8] sm:$0xff] %vm463_vm2, %v7389_v6  ;;  %v2217_v57 = vpop.permute.xlu0 %2216 }
 0x299   : > { %v2452_v56 = vpop.permute.xlu2 %2451  ;;  %v2526_v15 = vsub.f32 %v6079_v44, %v2217_v57  ;;  %v8866_v57 = vld [vmem:[#allocation11_spill] sm:$0xff] }
 0x29a   : > { %v2573_v32 = vsub.f32 %v6067_v31, %v2452_v56  ;;  %v2556_v31 = vsub.f32 %v6050_v16, %v2367_v10  ;;  %v2292_v16 = vpop.permute.xlu1 %2291 }
 0x29b   : > { %v2592_v56 = vmul.f32 1.442695, %v2526_v15  ;;  %v8867_v15 = vld [vmem:[#allocation5_spill] sm:$0xff] }
 0x29c   : > { %v7406_v1 = vpop.eup %5310  ;;  %v2686_v40 = vmul.f32 1.442695, %v2573_v32  ;;  %v2652_v18 = vmul.f32 1.442695, %v2556_v31  ;;  %v8864_v32 = vld [vmem:[#allocation139_spill] sm:$0xff]  ;;  %v2541_v60 = vsub.f32 %v8867_v15, %v2292_v16  ;;  %v8871_v15 = vld [vmem:[#allocation6_spill] sm:$0xff] }
 0x29d   : > { %3568 = vmatmul.f32.gmra.mxu0 %v7406_v1  ;;  %2421 = vperm.xlu2 %5302, %v8864_v32  }
 0x29e   : > { %5312 = vpow2.f32 %v2686_v40  ;;  %v2557_v40 = vsub.f32 %v6089_v48, %v2372_v41  ;;  %v8868_v41 = vld [vmem:[#allocation7_spill] sm:$0xff] }
 0x29f   : > { %5314 = vpow2.f32 %v2592_v56  ;;  %v2622_v56 = vmul.f32 1.442695, %v2541_v60 }
 0x2a0   : > { %5316 = vpow2.f32 %v2652_v18  ;;  %v2654_v44 = vmul.f32 1.442695, %v2557_v40  ;;  %v2297_v61 = vpop.permute.xlu0 %2296  ;;  %v8869_v40 = vld [vmem:[#allocation9_spill] sm:$0xff]  ;;  %v8870_v18 = vld [vmem:[#allocation144_spill] sm:$0xff] }
 0x2a1   : > { %v2377_v33 = vpop.permute.xlu2 %2376  ;;  %2426 = vperm.xlu1 %5301, %v8870_v18  }
 0x2a2   : > { %5318 = vpow2.f32 %v2654_v44  ;;  %v2558_v31 = vsub.f32 %v8868_v41, %v2377_v33  ;;  %v2457_v33 = vpop.permute.xlu1 %2456  ;;  %2940 = vadd.xlane.f32.xlu0 %v7279_v5 }
 0x2a3   : > { %v2574_v41 = vsub.f32 %v8871_v15, %v2457_v33  ;;  %v8874_v15 = vld [vmem:[#allocation150_spill] sm:$0xff] }
 0x2a4   : > { %v7413_v7 = vpop.eup %5312 }
 0x2a5   : > { %3763 = vmatmul.f32.gmra.mxu3 %v7413_v7  ;;  %v7423_v39 = vpop.eup %5314  ;;  %2346 = vperm.xlu2 %5302, %v7056_v58  }
 0x2a6   : > { %v7425_v48 = vpop.eup %5316  ;;  %3571 = vmatmul.f32.gmra.mxu0 %v7423_v39 }
 0x2a7   : > { %3695 = vmatmul.f32.vlgmr.msrb.gmra.mxu2 %v7425_v48 }
 0x2a8   : > { %v2462_v44 = vpop.permute.xlu0 %2461  ;;  %v7434_v60 = vpop.eup %5318 }
 0x2a9   : > { %v2222_v46 = vpop.permute.xlu2 %2221  ;;  %2351 = vperm.xlu1 %5301, %v8874_v15  }
 0x2aa   : > { %v2527_v42 = vsub.f32 %v8866_v57, %v2222_v46  ;;  %v2542_v46 = vsub.f32 %v8869_v40, %v2297_v61  ;;  %v2656_v57 = vmul.f32 1.442695, %v2558_v31  ;;  %v2688_v61 = vmul.f32 1.442695, %v2574_v41  ;;  %v8873_v40 = vld [vmem:[#allocation12_spill] sm:$0xff]  ;;  %v2382_v18 = vpop.permute.xlu1 %2381  ;;  %2910 = vadd.xlane.f32.xlu0 %v7434_v60 }
 0x2ac   : > { %v2594_v10 = vmul.f32 1.442695, %v2527_v42  ;;  %v2624_v16 = vmul.f32 1.442695, %v2542_v46  ;;  %v2575_v46 = vsub.f32 %v8873_v40, %v2462_v44  ;;  %v8876_v44 = vld [vmem:[#allocation15_spill] sm:$0xff] }
 0x2ad   : > { %2271 = vperm.xlu2 %5302, %v7102_v3  }
 0x2ae   : > { %5320 = vpow2.f32 %v2594_v10 }
 0x2af   : > { %5322 = vpow2.f32 %v2622_v56  ;;  %v8872_v56 = vld [vmem:[#allocation14_spill] sm:$0xff]  ;;  %3698 = vmatmul.f32.gmra.mxu2 %v7434_v60  ;;  %v8893_v60 = vld [vmem:[#allocation32_spill] sm:$0xff] }
 0x2b0   : > { %5324 = vpow2.f32 %v2656_v57  ;;  %v2387_v57 = vpop.permute.xlu0 %2386 }
 0x2b1   : > { %v2302_v42 = vpop.permute.xlu2 %2301  ;;  %5326 = vpow2.f32 %v2624_v16  ;;  %v8875_v16 = vld [vmem:[#allocation8_spill] sm:$0xff]  ;;  %v2560_v40 = vsub.f32 %v8876_v44, %v2387_v57  ;;  %2276 = vperm.xlu1 %5301, %v7144_v45  }
 0x2b2   : > { %v2543_v31 = vsub.f32 %v8872_v56, %v2302_v42  ;;  %5328 = vpow2.f32 %v2688_v61  ;;  %v2559_v28 = vsub.f32 %v8875_v16, %v2382_v18  ;;  %v2690_v56 = vmul.f32 1.442695, %v2575_v46  ;;  %v8877_v18 = vld [vmem:[#allocation17_spill] sm:$0xff]  ;;  %v2227_v15 = vpop.permute.xlu1 %2226  ;;  %2848 = vadd.xlane.f32.xlu0 %v7423_v39 }
 0x2b4   : > { %v7437_v2 = vpop.eup %5320  ;;  %v2626_v41 = vmul.f32 1.442695, %v2543_v31  ;;  %v2658_v61 = vmul.f32 1.442695, %v2559_v28  ;;  %v2660_v28 = vmul.f32 1.442695, %v2560_v40 }
 0x2b5   : > { %v7439_v10 = vpop.eup %5322  ;;  %3574 = vmatmul.f32.gmra.mxu0 %v7437_v2  ;;  %2511 = vperm.xlu2 %5302, %v7147_v35   ;;  %v8878_v35 = vld [vmem:[#allocation10_spill] sm:$0xff] }
 0x2b6   : > { %3633 = vmatmul.f32.gmra.mxu1 %v7439_v10  ;;  %v7449_v32 = vpop.eup %5324  ;;  %5330 = vpow2.f32 %v2626_v41  ;;  %v2528_v41 = vsub.f32 %v8878_v35, %v2227_v15  ;;  %v8880_v15 = vld [vmem:[#allocation20_spill] sm:$0xff] }
 0x2b7   : > { %v7452_v42 = vpop.eup %5326  ;;  %3701 = vmatmul.f32.gmra.mxu2 %v7449_v32  ;;  %5332 = vpow2.f32 %v2658_v61 }
 0x2b8   : > { %v7454_v58 = vpop.eup %5328  ;;  %5334 = vpow2.f32 %v2690_v56  ;;  %v2312_v46 = vpop.permute.xlu0 %2311  ;;  %v2596_v12 = vmul.f32 1.442695, %v2528_v41 }
 0x2b9   : > { %v2467_v33 = vpop.permute.xlu2 %2466  ;;  %3766 = vmatmul.f32.gmra.mxu3 %v7454_v58  ;;  %5336 = vpow2.f32 %v2660_v28  ;;  %2516 = vperm.xlu1 %5301, %v7187_v27  }
 0x2ba   : > { %v2576_v31 = vsub.f32 %v8877_v18, %v2467_v33  ;;  %v8879_v33 = vld [vmem:[#allocation16_spill] sm:$0xff]  ;;  %5338 = vpow2.f32 %v2596_v12  ;;  %v2307_v41 = vpop.permute.xlu1 %2306  ;;  %2880 = vadd.xlane.f32.xlu0 %v7452_v42 }
 0x2bc   : > { %v7464_v38 = vpop.eup %5330  ;;  %v2692_v57 = vmul.f32 1.442695, %v2576_v31 }
 0x2bd   : > { %v7466_v44 = vpop.eup %5332  ;;  %2436 = vperm.xlu2 %5302, %v7190_v4   ;;  %v8881_v4 = vld [vmem:[#allocation13_spill] sm:$0xff] }
 0x2be   : > { %3636 = vmatmul.f32.gmra.mxu1 %v7452_v42  ;;  %v7469_v61 = vpop.eup %5334  ;;  %5340 = vpow2.f32 %v2692_v57  ;;  %v2544_v28 = vsub.f32 %v8881_v4, %v2307_v41  ;;  %v8882_v57 = vld [vmem:[#allocation18_spill] sm:$0xff] }
 0x2bf   : > { %3704 = vmatmul.f32.gmra.mxu2 %v7466_v44  ;;  %v7478_v45 = vpop.eup %5336  ;;  %v2545_v27 = vsub.f32 %v8882_v57, %v2312_v46 }
 0x2c0   : > { %v2477_v18 = vpop.permute.xlu0 %2476  ;;  %v2628_v26 = vmul.f32 1.442695, %v2544_v28 }
 0x2c1   : > { %v2232_v16 = vpop.permute.xlu2 %2231  ;;  %3769 = vmatmul.f32.gmra.mxu3 %v7469_v61  ;;  %2441 = vperm.xlu1 %5301, %v7379_v0  }
 0x2c2   : > { %v2529_v56 = vsub.f32 %v8879_v33, %v2232_v16  ;;  %v7480_v33 = vpop.eup %5338  ;;  %2946 = vadd.xlane.f32.xlu0 %v7469_v61 }
 0x2c3   : > { %3577 = vmatmul.f32.gmra.mxu0 %v7480_v33 }
 0x2c4   : > { %v2598_v31 = vmul.f32 1.442695, %v2529_v56  ;;  %v7483_v12 = vpop.eup %5340 }
 0x2c5   : > { %2361 = vperm.xlu2 %5302, %v7389_v6  }
 0x2c6   : > { %3639 = vmatmul.f32.gmra.mxu1 %v7464_v38  ;;  %5342 = vpow2.f32 %v2598_v31 }
 0x2c7   : > { %3707 = vmatmul.f32.gmra.mxu2 %v7478_v45  ;;  %5344 = vpow2.f32 %v2628_v26  ;;  %v8884_v26 = vld [vmem:[#allocation23_spill] sm:$0xff] }
 0x2c8   : > { %v2402_v56 = vpop.permute.xlu0 %2401 }
 0x2c9   : > { %v2392_v35 = vpop.permute.xlu2 %2391  ;;  %3772 = vmatmul.f32.gmra.mxu3 %v7483_v12 }
 0x2ca   : > { %v2561_v40 = vsub.f32 %v8880_v15, %v2392_v35  ;;  %v2630_v35 = vmul.f32 1.442695, %v2545_v27  ;;  %v2472_v15 = vpop.permute.xlu1 %2471  ;;  %v8885_v27 = vld [vmem:[#allocation24_spill] sm:$0xff]  ;;  %2916 = vadd.xlane.f32.xlu0 %v7478_v45 }
 0x2cb   : > { %v8905_v45 = vld [vmem:[#allocation48_spill] sm:$0xff] }
 0x2cc   : > { %v2662_v16 = vmul.f32 1.442695, %v2561_v40  ;;  %v8883_v40 = vld [vmem:[#allocation19_spill] sm:$0xff]  ;;  %v7491_v28 = vpop.eup %5342 }
 0x2cd   : > { %v2577_v41 = vsub.f32 %v8883_v40, %v2472_v15  ;;  %v7493_v31 = vpop.eup %5344  ;;  %3580 = vmatmul.f32.gmra.mxu0 %v7491_v28 }
 0x2ce   : > { %5346 = vpow2.f32 %v2662_v16  ;;  %3642 = vmatmul.f32.gmra.mxu1 %v7493_v31  ;;  %v2578_v16 = vsub.f32 %v8885_v27, %v2477_v18  ;;  %v8889_v27 = vld [vmem:[#allocation22_spill] sm:$0xff] }
 0x2cf   : > { %v2694_v46 = vmul.f32 1.442695, %v2577_v41  ;;  %5348 = vpow2.f32 %v2630_v35 }
 0x2d0   : > { %v2327_v40 = vpop.permute.xlu0 %2326  ;;  %v2696_v35 = vmul.f32 1.442695, %v2578_v16 }
 0x2d1   : > { %v2317_v4 = vpop.permute.xlu2 %2316  ;;  %5350 = vpow2.f32 %v2694_v46 }
 0x2d2   : > { %v2546_v6 = vsub.f32 %v8884_v26, %v2317_v4  ;;  %v2237_v23 = vpop.permute.xlu1 %2236  ;;  %v8887_v26 = vld [vmem:[#allocation26_spill] sm:$0xff] }
 0x2d3   : > { %v2530_v41 = vsub.f32 %v8886_v47, %v2237_v23 }
 0x2d4   : > { %v7495_v57 = vpop.eup %5346  ;;  %v2632_v0 = vmul.f32 1.442695, %v2546_v6  ;;  %v8888_v6 = vld [vmem:[#allocation29_spill] sm:$0xff] }
 0x2d5   : > { %3710 = vmatmul.f32.gmra.mxu2 %v7495_v57  ;;  %v7503_v21 = vpop.eup %5348  ;;  %v2600_v4 = vmul.f32 1.442695, %v2530_v41 }
 0x2d6   : > { %5352 = vpow2.f32 %v2632_v0  ;;  %3645 = vmatmul.f32.gmra.mxu1 %v7503_v21  ;;  %2886 = vadd.xlane.f32.xlu0 %v7503_v21  ;;  %v8908_v21 = vld [vmem:[#allocation51_spill] sm:$0xff] }
 0x2d7   : > { %v7505_v25 = vpop.eup %5350  ;;  %5354 = vpow2.f32 %v2600_v4 }
 0x2d8   : > { %3775 = vmatmul.f32.gmra.mxu3 %v7505_v25  ;;  %5356 = vpow2.f32 %v2696_v35  ;;  %v2252_v52 = vpop.permute.xlu0 %2251 }
 0x2d9   : > { %v2242_v15 = vpop.permute.xlu2 %2241 }
 0x2da   : > { %v2531_v51 = vsub.f32 %v8887_v26, %v2242_v15  ;;  %v2397_v23 = vpop.permute.xlu1 %2396 }
 0x2db   : > { %v2562_v16 = vsub.f32 %v8889_v27, %v2397_v23 }
 0x2dc   : > { %v2602_v47 = vmul.f32 1.442695, %v2531_v51  ;;  %v7513_v41 = vpop.eup %5352  ;;  %v8890_v51 = vld [vmem:[#allocation27_spill] sm:$0xff] }
 0x2dd   : > { %v7515_v15 = vpop.eup %5354  ;;  %v2664_v26 = vmul.f32 1.442695, %v2562_v16  ;;  %v2563_v5 = vsub.f32 %v8890_v51, %v2402_v56 }
 0x2de   : > { %v7517_v3 = vpop.eup %5356  ;;  %5358 = vpow2.f32 %v2602_v47  ;;  %3583 = vmatmul.f32.gmra.mxu0 %v7515_v15  ;;  %3648 = vmatmul.f32.gmra.mxu1 %v7513_v41 }
 0x2df   : > { %5360 = vpow2.f32 %v2664_v26  ;;  %v2666_v23 = vmul.f32 1.442695, %v2563_v5  ;;  %v8892_v26 = vld [vmem:[#allocation30_spill] sm:$0xff]  ;;  %2856 = vadd.xlane.f32.xlu0 %v7515_v15 }
 0x2e0   : > { %3778 = vmatmul.f32.gmra.mxu3 %v7517_v3  ;;  %v2492_v16 = vpop.permute.xlu0 %2491  ;;  %v2548_v37 = vsub.f32 %v8892_v26, %v2327_v40 }
 0x2e1   : > { %v2482_v18 = vpop.permute.xlu2 %2481 }
 0x2e2   : > { %v2579_v46 = vsub.f32 %v8888_v6, %v2482_v18  ;;  %v2322_v4 = vpop.permute.xlu1 %2321  ;;  %v8891_v18 = vld [vmem:[#allocation25_spill] sm:$0xff]  ;;  %v2636_v51 = vmul.f32 1.442695, %v2548_v37  ;;  %v8896_v37 = vld [vmem:[#allocation35_spill] sm:$0xff] }
 0x2e3   : > { %v2547_v6 = vsub.f32 %v8891_v18, %v2322_v4  ;;  %v8894_v4 = vld [vmem:[#allocation28_spill] sm:$0xff] }
 0x2e4   : > { %v2698_v0 = vmul.f32 1.442695, %v2579_v46  ;;  %v7525_v46 = vpop.eup %5358 }
 0x2e5   : > { %v7527_v47 = vpop.eup %5360  ;;  %v2634_v27 = vmul.f32 1.442695, %v2547_v6 }
 0x2e6   : > { %5362 = vpow2.f32 %v2698_v0  ;;  %3586 = vmatmul.f32.gmra.mxu0 %v7525_v46  ;;  %3713 = vmatmul.f32.gmra.mxu2 %v7527_v47 }
 0x2e7   : > { %5364 = vpow2.f32 %v2634_v27  ;;  %v8895_v27 = vld [vmem:[#allocation33_spill] sm:$0xff]  ;;  %2952 = vadd.xlane.f32.xlu0 %v7517_v3  ;;  %v8914_v3 = vld [vmem:[#allocation71_spill] sm:$0xff] }
 0x2e8   : > { %5366 = vpow2.f32 %v2666_v23  ;;  %v2533_v54 = vsub.f32 %v8895_v27, %v2252_v52 }
 0x2e9   : > { %v2407_v35 = vpop.permute.xlu2 %2406  ;;  %5368 = vpow2.f32 %v2636_v51  ;;  %v8897_v51 = vld [vmem:[#allocation31_spill] sm:$0xff] }
 0x2ea   : > { %v2564_v56 = vsub.f32 %v8893_v60, %v2407_v35  ;;  %v2247_v5 = vpop.permute.xlu1 %2246  ;;  %v2417_v35 = vpop.permute.xlu0 %2416  ;;  %v2606_v60 = vmul.f32 1.442695, %v2533_v54  ;;  %v8899_v54 = vld [vmem:[#allocation36_spill] sm:$0xff] }
 0x2eb   : > { %v2532_v18 = vsub.f32 %v8894_v4, %v2247_v5  ;;  %2876 = vadd.xlane.f32.xlu1 %v7246_v9  ;;  %v2581_v9 = vsub.f32 %v8899_v54, %v2492_v16  ;;  %v8901_v16 = vld [vmem:[#allocation39_spill] sm:$0xff] }
 0x2ec   : > { %v7529_v24 = vpop.eup %5362  ;;  %v2668_v6 = vmul.f32 1.442695, %v2564_v56 }
 0x2ed   : > { %3781 = vmatmul.f32.gmra.mxu3 %v7529_v24  ;;  %v7538_v22 = vpop.eup %5364  ;;  %v2604_v40 = vmul.f32 1.442695, %v2532_v18 }
 0x2ee   : > { %v7540_v26 = vpop.eup %5366  ;;  %2844 = vadd.xlane.f32.xlu2 %v7292_v34  ;;  %3651 = vmatmul.f32.gmra.mxu1 %v7538_v22 }
 0x2ef   : > { %5370 = vpow2.f32 %v2604_v40  ;;  %3716 = vmatmul.f32.gmra.mxu2 %v7540_v26  ;;  %v7550_v5 = vpop.eup %5368  ;;  %2922 = vadd.xlane.f32.xlu0 %v7540_v26 }
 0x2f0   : > { %5372 = vpow2.f32 %v2668_v6  ;;  %v8898_v6 = vld [vmem:[#allocation38_spill] sm:$0xff] }
 0x2f1   : > { %v2332_v0 = vpop.permute.xlu2 %2331  ;;  %5374 = vpow2.f32 %v2606_v60 }
 0x2f2   : > { %v2549_v39 = vsub.f32 %v8896_v37, %v2332_v0  ;;  %v2487_v56 = vpop.permute.xlu1 %2486  ;;  %v2342_v27 = vpop.permute.xlu0 %2341 }
 0x2f3   : > { %v2580_v52 = vsub.f32 %v8897_v51, %v2487_v56  ;;  %2846 = vadd.xlane.f32.xlu1 %v7406_v1  ;;  %v2702_v56 = vmul.f32 1.442695, %v2581_v9  ;;  %v8902_v1 = vld [vmem:[#allocation44_spill] sm:$0xff]  ;;  %v8903_v9 = vld [vmem:[#allocation37_spill] sm:$0xff] }
 0x2f4   : > { %v2638_v34 = vmul.f32 1.442695, %v2549_v39 }
 0x2f5   : > { %v7552_v4 = vpop.eup %5370  ;;  %v2700_v18 = vmul.f32 1.442695, %v2580_v52 }
 0x2f6   : > { %v7554_v40 = vpop.eup %5372  ;;  %2908 = vadd.xlane.f32.xlu2 %v7425_v48  ;;  %3589 = vmatmul.f32.gmra.mxu0 %v7552_v4 }
 0x2f7   : > { %5376 = vpow2.f32 %v2700_v18  ;;  %3654 = vmatmul.f32.gmra.mxu1 %v7550_v5  ;;  %3719 = vmatmul.f32.gmra.mxu2 %v7554_v40  ;;  %v7565_v60 = vpop.eup %5374 }
 0x2f8   : > { %5378 = vpow2.f32 %v2638_v34  ;;  %v2566_v34 = vsub.f32 %v8901_v16, %v2417_v35  ;;  %2892 = vadd.xlane.f32.xlu0 %v7550_v5 }
 0x2f9   : > { %v2257_v23 = vpop.permute.xlu2 %2256 }
 0x2fa   : > { %v2534_v0 = vsub.f32 %v8898_v6, %v2257_v23  ;;  %v2412_v39 = vpop.permute.xlu1 %2411  ;;  %v8900_v23 = vld [vmem:[#allocation34_spill] sm:$0xff]  ;;  %v2267_v54 = vpop.permute.xlu0 %2266 }
 0x2fb   : > { %v2565_v48 = vsub.f32 %v8900_v23, %v2412_v39  ;;  %2942 = vadd.xlane.f32.xlu1 %v7413_v7 }
 0x2fc   : > { %v2608_v37 = vmul.f32 1.442695, %v2534_v0  ;;  %v2672_v0 = vmul.f32 1.442695, %v2566_v34 }
 0x2fd   : > { %v7567_v51 = vpop.eup %5376  ;;  %v2670_v52 = vmul.f32 1.442695, %v2565_v48 }
 0x2fe   : > { %v7569_v18 = vpop.eup %5378  ;;  %5380 = vpow2.f32 %v2608_v37  ;;  %2878 = vadd.xlane.f32.xlu2 %v7439_v10  ;;  %3592 = vmatmul.f32.gmra.mxu0 %v7565_v60 }
 0x2ff   : > { %5382 = vpow2.f32 %v2670_v52  ;;  %3657 = vmatmul.f32.gmra.mxu1 %v7569_v18  ;;  %3784 = vmatmul.f32.gmra.mxu3 %v7567_v51 }
 0x300   : > { %5384 = vpow2.f32 %v2702_v56  ;;  %2862 = vadd.xlane.f32.xlu0 %v7565_v60 }
 0x301   : > { %v2497_v42 = vpop.permute.xlu2 %2496  ;;  %5386 = vpow2.f32 %v2672_v0 }
 0x302   : > { %v2582_v61 = vsub.f32 %v8902_v1, %v2497_v42  ;;  %v2337_v35 = vpop.permute.xlu1 %2336  ;;  %v8904_v42 = vld [vmem:[#allocation45_spill] sm:$0xff] }
 0x303   : > { %v2550_v10 = vsub.f32 %v8903_v9, %v2337_v35  ;;  %v2551_v56 = vsub.f32 %v8904_v42, %v2342_v27  ;;  %2912 = vadd.xlane.f32.xlu1 %v7449_v32  ;;  %v8906_v27 = vld [vmem:[#allocation41_spill] sm:$0xff]  ;;  %v2507_v9 = vpop.permute.xlu0 %2506 }
 0x304   : > { %v7580_v37 = vpop.eup %5380  ;;  %v2704_v39 = vmul.f32 1.442695, %v2582_v61 }
 0x305   : > { %v7582_v23 = vpop.eup %5382  ;;  %v2640_v48 = vmul.f32 1.442695, %v2550_v10  ;;  %v2642_v34 = vmul.f32 1.442695, %v2551_v56 }
 0x306   : > { %v7584_v52 = vpop.eup %5384  ;;  %2944 = vadd.xlane.f32.xlu2 %v7454_v58  ;;  %3595 = vmatmul.f32.gmra.mxu0 %v7580_v37 }
 0x307   : > { %5388 = vpow2.f32 %v2640_v48  ;;  %3722 = vmatmul.f32.gmra.mxu2 %v7582_v23  ;;  %3787 = vmatmul.f32.gmra.mxu3 %v7584_v52  ;;  %v7595_v58 = vpop.eup %5386 }
 0x308   : > { %5390 = vpow2.f32 %v2704_v39  ;;  %2958 = vadd.xlane.f32.xlu0 %v7584_v52  ;;  %v8928_v52 = vld [vmem:[#allocation68_spill] sm:$0xff] }
 0x309   : > { %v2422_v6 = vpop.permute.xlu2 %2421  ;;  %5392 = vpow2.f32 %v2642_v34 }
 0x30a   : > { %v2567_v7 = vsub.f32 %v8905_v45, %v2422_v6  ;;  %v2262_v1 = vpop.permute.xlu1 %2261  ;;  %v8907_v6 = vld [vmem:[#allocation49_spill] sm:$0xff] }
 0x30b   : > { %v2535_v61 = vsub.f32 %v8906_v27, %v2262_v1  ;;  %v2536_v39 = vsub.f32 %v8907_v6, %v2267_v54  ;;  %2882 = vadd.xlane.f32.xlu1 %v7464_v38  ;;  %v8909_v54 = vld [vmem:[#allocation47_spill] sm:$0xff]  ;;  %v2432_v15 = vpop.permute.xlu0 %2431  ;;  %v8911_v38 = vld [vmem:[#allocation52_spill] sm:$0xff] }
 0x30c   : > { %v2674_v0 = vmul.f32 1.442695, %v2567_v7 }
 0x30d   : > { %v7597_v35 = vpop.eup %5388  ;;  %v2610_v10 = vmul.f32 1.442695, %v2535_v61  ;;  %v2612_v56 = vmul.f32 1.442695, %v2536_v39 }
 0x30e   : > { %v7599_v48 = vpop.eup %5390  ;;  %2850 = vadd.xlane.f32.xlu2 %v7437_v2  ;;  %3660 = vmatmul.f32.gmra.mxu1 %v7597_v35 }
 0x30f   : > { %5394 = vpow2.f32 %v2610_v10  ;;  %3725 = vmatmul.f32.gmra.mxu2 %v7595_v58  ;;  %3790 = vmatmul.f32.gmra.mxu3 %v7599_v48  ;;  %v7610_v2 = vpop.eup %5392  ;;  %v2584_v10 = vsub.f32 %v8911_v38, %v2507_v9  ;;  %v8915_v38 = vld [vmem:[#allocation56_spill] sm:$0xff] }
 0x310   : > { %5396 = vpow2.f32 %v2674_v0  ;;  %v8910_v0 = vld [vmem:[#allocation57_spill] sm:$0xff]  ;;  %2928 = vadd.xlane.f32.xlu0 %v7595_v58 }
 0x311   : > { %v2347_v16 = vpop.permute.xlu2 %2346  ;;  %5398 = vpow2.f32 %v2612_v56  ;;  %v2708_v56 = vmul.f32 1.442695, %v2584_v10  ;;  %v2764_v58 = vld [vmem:[#allocation3 + $0x180] sm:$0xff] }
 0x312   : > { %v2552_v32 = vsub.f32 %v8908_v21, %v2347_v16  ;;  %v2502_v45 = vpop.permute.xlu1 %2501 }
 0x313   : > { %v2583_v7 = vsub.f32 %v8909_v54, %v2502_v45  ;;  %2852 = vadd.xlane.f32.xlu1 %v7480_v33 }
 0x314   : > { %v2644_v34 = vmul.f32 1.442695, %v2552_v32  ;;  %v8912_v32 = vld [vmem:[#allocation50_spill] sm:$0xff] }
 0x315   : > { %v7612_v1 = vpop.eup %5394  ;;  %v2706_v27 = vmul.f32 1.442695, %v2583_v7 }
 0x316   : > { %v7614_v61 = vpop.eup %5396  ;;  %2914 = vadd.xlane.f32.xlu2 %v7466_v44  ;;  %3598 = vmatmul.f32.gmra.mxu0 %v7612_v1 }
 0x317   : > { %5400 = vpow2.f32 %v2706_v27  ;;  %3663 = vmatmul.f32.gmra.mxu1 %v7610_v2  ;;  %3728 = vmatmul.f32.gmra.mxu2 %v7614_v61  ;;  %v8913_v27 = vld [vmem:[#allocation58_spill] sm:$0xff] }
 0x318   : > { %5402 = vpow2.f32 %v2644_v34  ;;  %v2569_v9 = vsub.f32 %v8913_v27, %v2432_v15  ;;  %v2357_v34 = vpop.permute.xlu0 %2356  ;;  %2898 = vadd.xlane.f32.xlu0 %v7610_v2  ;;  %v2749_v2 = vld [vmem:[#allocation3 + $0x108] sm:$0xff] }
 0x319   : > { %v2272_v42 = vpop.permute.xlu2 %2271 }
 0x31a   : > { %v2537_v16 = vsub.f32 %v8910_v0, %v2272_v42  ;;  %v2427_v21 = vpop.permute.xlu1 %2426  ;;  %v7625_v42 = vpop.eup %5398  ;;  %v2678_v0 = vmul.f32 1.442695, %v2569_v9 }
 0x31b   : > { %v2568_v44 = vsub.f32 %v8912_v32, %v2427_v21  ;;  %2948 = vadd.xlane.f32.xlu1 %v7483_v12  ;;  %v8917_v12 = vld [vmem:[#allocation84_spill] sm:$0xff] }
 0x31c   : > { %v2614_v39 = vmul.f32 1.442695, %v2537_v16 }
 0x31d   : > { %v7627_v45 = vpop.eup %5400  ;;  %v2676_v54 = vmul.f32 1.442695, %v2568_v44 }
 0x31e   : > { %v7629_v7 = vpop.eup %5402  ;;  %5404 = vpow2.f32 %v2614_v39  ;;  %2884 = vadd.xlane.f32.xlu2 %v7493_v31  ;;  %3601 = vmatmul.f32.gmra.mxu0 %v7625_v42 }
 0x31f   : > { %5406 = vpow2.f32 %v2676_v54  ;;  %3666 = vmatmul.f32.gmra.mxu1 %v7629_v7  ;;  %3793 = vmatmul.f32.gmra.mxu3 %v7627_v45 }
 0x320   : > { %5408 = vpow2.f32 %v2708_v56  ;;  %v2282_v9 = vpop.permute.xlu0 %2281  ;;  %2868 = vadd.xlane.f32.xlu0 %v7625_v42  ;;  %v8938_v42 = vld [vmem:[#allocation46_spill] sm:$0xff] }
 0x321   : > { %v2512_v6 = vpop.permute.xlu2 %2511  ;;  %5410 = vpow2.f32 %v2678_v0 }
 0x322   : > { %v2585_v33 = vsub.f32 %v8914_v3, %v2512_v6  ;;  %v2352_v16 = vpop.permute.xlu1 %2351  ;;  %v8916_v6 = vld [vmem:[#allocation74_spill] sm:$0xff] }
 0x323   : > { %v2553_v31 = vsub.f32 %v8915_v38, %v2352_v16  ;;  %v2554_v56 = vsub.f32 %v8916_v6, %v2357_v34  ;;  %2918 = vadd.xlane.f32.xlu1 %v7495_v57  ;;  %v8918_v3 = vld [vmem:[#allocation70_spill] sm:$0xff] }
 0x324   : > { %v7640_v10 = vpop.eup %5404  ;;  %v2710_v39 = vmul.f32 1.442695, %v2585_v33  ;;  %v8920_v57 = vld [vmem:[#allocation122_spill] sm:$0xff] }
 0x325   : > { %v7642_v21 = vpop.eup %5406  ;;  %v2646_v32 = vmul.f32 1.442695, %v2553_v31  ;;  %v2648_v54 = vmul.f32 1.442695, %v2554_v56  ;;  %v8921_v56 = vld [vmem:[#allocation83_spill] sm:$0xff] }
 0x326   : > { %v7644_v44 = vpop.eup %5408  ;;  %2854 = vadd.xlane.f32.xlu2 %v7491_v28  ;;  %3604 = vmatmul.f32.gmra.mxu0 %v7640_v10 }
 0x327   : > { %5412 = vpow2.f32 %v2646_v32  ;;  %3731 = vmatmul.f32.gmra.mxu2 %v7642_v21  ;;  %3796 = vmatmul.f32.gmra.mxu3 %v7644_v44  ;;  %v7655_v28 = vpop.eup %5410 }
 0x328   : > { %5414 = vpow2.f32 %v2710_v39  ;;  %2964 = vadd.xlane.f32.xlu0 %v7644_v44  ;;  %v8943_v44 = vld [vmem:[#allocation63_spill] sm:$0xff] }
 0x329   : > { %v2437_v15 = vpop.permute.xlu2 %2436  ;;  %5416 = vpow2.f32 %v2648_v54 }
 0x32a   : > { %v2570_v26 = vsub.f32 %v8917_v12, %v2437_v15  ;;  %v2277_v27 = vpop.permute.xlu1 %2276  ;;  %v8919_v15 = vld [vmem:[#allocation85_spill] sm:$0xff] }
 0x32b   : > { %v2538_v33 = vsub.f32 %v8918_v3, %v2277_v27  ;;  %v2539_v39 = vsub.f32 %v8919_v15, %v2282_v9  ;;  %2888 = vadd.xlane.f32.xlu1 %v7513_v41  ;;  %v2522_v27 = vpop.permute.xlu0 %2521  ;;  %v8922_v41 = vld [vmem:[#allocation119_spill] sm:$0xff] }
 0x32c   : > { %v2680_v34 = vmul.f32 1.442695, %v2570_v26  ;;  %v2587_v60 = vsub.f32 %v8922_v41, %v2522_v27  ;;  %v8929_v41 = vld [vmem:[#allocation72_spill] sm:$0xff] }
 0x32d   : > { %v7657_v0 = vpop.eup %5412  ;;  %v2616_v38 = vmul.f32 1.442695, %v2538_v33  ;;  %v2618_v32 = vmul.f32 1.442695, %v2539_v39 }
 0x32e   : > { %v7659_v31 = vpop.eup %5414  ;;  %2950 = vadd.xlane.f32.xlu2 %v7505_v25  ;;  %3669 = vmatmul.f32.gmra.mxu1 %v7657_v0 }
 0x32f   : > { %5418 = vpow2.f32 %v2616_v38  ;;  %3734 = vmatmul.f32.gmra.mxu2 %v7655_v28  ;;  %3799 = vmatmul.f32.gmra.mxu3 %v7659_v31  ;;  %v7670_v26 = vpop.eup %5416 }
 0x330   : > { %5420 = vpow2.f32 %v2680_v34  ;;  %v8923_v34 = vld [vmem:[#allocation121_spill] sm:$0xff]  ;;  %2934 = vadd.xlane.f32.xlu0 %v7655_v28 }
 0x331   : > { %v2362_v16 = vpop.permute.xlu2 %2361  ;;  %5422 = vpow2.f32 %v2618_v32  ;;  %v8925_v32 = vld [vmem:[#allocation54_spill] sm:$0xff] }
 0x332   : > { %v2555_v5 = vsub.f32 %v8920_v57, %v2362_v16  ;;  %v2517_v6 = vpop.permute.xlu1 %2516 }
 0x333   : > { %v2586_v12 = vsub.f32 %v8921_v56, %v2517_v6  ;;  %2858 = vadd.xlane.f32.xlu1 %v7525_v46  ;;  %v8927_v46 = vld [vmem:[#allocation75_spill] sm:$0xff] }
 0x334   : > { %v2650_v25 = vmul.f32 1.442695, %v2555_v5  ;;  %v8924_v5 = vld [vmem:[#allocation53_spill] sm:$0xff] }
 0x335   : > { %v7672_v54 = vpop.eup %5418  ;;  %v2712_v9 = vmul.f32 1.442695, %v2586_v12  ;;  %v8926_v6 = vsub.f32 %v8924_v5, %v8925_v32  ;;  %v2045_v12 = vsub.f32 %v8928_v52, %v8927_v46 }
 0x336   : > { %v7674_v3 = vpop.eup %5420  ;;  %2920 = vadd.xlane.f32.xlu2 %v7527_v47  ;;  %3607 = vmatmul.f32.gmra.mxu0 %v7672_v54  ;;  %v2714_v47 = vmul.f32 1.442695, %v2587_v60  ;;  %v8930_v60 = vld [vmem:[#allocation66_spill] sm:$0xff] }
 0x337   : > { %5424 = vpow2.f32 %v2712_v9  ;;  %3672 = vmatmul.f32.gmra.mxu1 %v7670_v26  ;;  %3737 = vmatmul.f32.gmra.mxu2 %v7674_v3  ;;  %v7684_v38 = vpop.eup %5422  ;;  %v2172_v56 = vmul.f32 1.442695, %v8926_v6  ;;  %v8933_v6 = vld [vmem:[#allocation82_spill] sm:$0xff] }
 0x338   : > { %5426 = vpow2.f32 %v2650_v25  ;;  %2904 = vadd.xlane.f32.xlu0 %v7670_v26 }
 0x33a   : > { %v2442_v33 = vpop.permute.xlu1 %2441 }
 0x33b   : > { %v2571_v16 = vsub.f32 %v8923_v34, %v2442_v33  ;;  %2954 = vadd.xlane.f32.xlu1 %v7529_v24  ;;  %v2014_v33 = vsub.f32 %v8930_v60, %v8929_v41  ;;  %v2941_v34 = vpop.xlane.xlu0 %2940  ;;  %v8936_v41 = vld [vmem:[#allocation55_spill] sm:$0xff] }
 0x33d   : > { %v7686_v15 = vpop.eup %5424  ;;  %v2682_v39 = vmul.f32 1.442695, %v2571_v16 }
 0x33e   : > { %v7688_v57 = vpop.eup %5426  ;;  %2890 = vadd.xlane.f32.xlu2 %v7538_v22  ;;  %3610 = vmatmul.f32.gmra.mxu0 %v7684_v38  ;;  %v2142_v22 = vmul.f32 1.442695, %v2045_v12 }
 0x33f   : > { %5428 = vpow2.f32 %v2682_v39  ;;  %3675 = vmatmul.f32.gmra.mxu1 %v7688_v57  ;;  %3802 = vmatmul.f32.gmra.mxu3 %v7686_v15  ;;  %v8932_v39 = vld [vmem:[#allocation40_spill] sm:$0xff] }
 0x340   : > { %5430 = vpow2.f32 %v2714_v47  ;;  %v8931_v47 = vld [vmem:[#allocation43_spill] sm:$0xff]  ;;  %2874 = vadd.xlane.f32.xlu0 %v7684_v38 }
 0x341   : > { %5432 = vpow2.f32 %v2172_v56  ;;  %v2012_v5 = vsub.f32 %v8932_v39, %v8931_v47  ;;  %v8941_v39 = vld [vmem:[#allocation67_spill] sm:$0xff] }
 0x342   : > { %5434 = vpow2.f32 %v2142_v22 }
 0x343   : > { %2924 = vadd.xlane.f32.xlu1 %v7554_v40  ;;  %v8934_v40 = vld [vmem:[#allocation79_spill] sm:$0xff]  ;;  %v2076_v46 = vmul.f32 1.442695, %v2012_v5  ;;  %v8942_v5 = vld [vmem:[#allocation62_spill] sm:$0xff] }
 0x344   : > { %v2030_v56 = vsub.f32 %v8934_v40, %v8933_v6 }
 0x345   : > { %v7701_v25 = vpop.eup %5428 }
 0x346   : > { %v7703_v27 = vpop.eup %5430  ;;  %2860 = vadd.xlane.f32.xlu2 %v7552_v4  ;;  %3740 = vmatmul.f32.gmra.mxu2 %v7701_v25  ;;  %v2080_v4 = vmul.f32 1.442695, %v2014_v33  ;;  %v2112_v22 = vmul.f32 1.442695, %v2030_v56  ;;  %v8937_v33 = vld [vmem:[#allocation42_spill] sm:$0xff] }
 0x347   : > { %3805 = vmatmul.f32.gmra.mxu3 %v7703_v27  ;;  %v7708_v9 = vpop.eup %5432 }
 0x348   : > { %v2828_v24 = vmul.f32 %v7708_v9, %v2764_v58  ;;  %v7719_v32 = vpop.eup %5434  ;;  %5436 = vpow2.f32 %v2080_v4  ;;  %v8935_v58 = vld [vmem:[#allocation59_spill] sm:$0xff]  ;;  %v8940_v4 = vld [vmem:[#allocation80_spill] sm:$0xff]  ;;  %2970 = vadd.xlane.f32.xlu0 %v7703_v27 }
 0x349   : > { %v2813_v52 = vmul.f32 %v7719_v32, %v2749_v2  ;;  %5438 = vpow2.f32 %v2076_v46  ;;  %v2044_v60 = vsub.f32 %v8936_v41, %v8935_v58  ;;  %v2063_v47 = vsub.f32 %v8940_v4, %v6645_v19  ;;  %v8944_v19 = vld [vmem:[#allocation60_spill] sm:$0xff]  ;;  %v2734_v41 = vld [vmem:[#allocation3 + $0x90] sm:$0xff]  ;;  %v8946_v4 = vld [vmem:[#allocation65_spill] sm:$0xff] }
 0x34a   : > { %v3020_v16 = vadd.f32 %v2941_v34, %v2828_v24  ;;  %v8939_v24 = vsub.f32 %v8937_v33, %v8938_v42  ;;  %5440 = vpow2.f32 %v2112_v22  ;;  %v2013_v2 = vsub.f32 %v8942_v5, %v8941_v39  ;;  %v2732_v42 = vld [vmem:[#allocation3 + $0x80] sm:$0xff] }
 0x34b   : > { %2894 = vadd.xlane.f32.xlu1 %v7569_v18  ;;  %v2718_v18 = vld [vmem:[#allocation3 + $0x10] sm:$0xff] }
 0x34c   : > { %3085 = vst.msk [vmem:[#allocation3 + $0x180] sm:$0xff] %vm463_vm2, %v3020_v16  ;;  %v2108_v34 = vmul.f32 1.442695, %v8939_v24 }
 0x34e   : > { %2956 = vadd.xlane.f32.xlu2 %v7567_v51  ;;  %v2911_v51 = vpop.xlane.xlu0 %2910  ;;  %v7733_v16 = vpop.eup %5436  ;;  %5442 = vpow2.f32 %v2108_v34 }
 0x34f   : > { %v3005_v12 = vadd.f32 %v2911_v51, %v2813_v52  ;;  %v2782_v6 = vmul.f32 %v7733_v16, %v2718_v18  ;;  %v7742_v56 = vpop.eup %5438  ;;  %v2716_v52 = vld [vmem:[#allocation3] sm:$0xff]  ;;  %v2178_v51 = vmul.f32 1.442695, %v2063_v47 }
 0x350   : > { %v7748_v22 = vpop.eup %5440  ;;  %v2780_v58 = vmul.f32 %v7742_v56, %v2716_v52  ;;  %v8947_v47 = vld [vmem:[#allocation61_spill] sm:$0xff] }
 0x351   : > { %3070 = vst.msk [vmem:[#allocation3 + $0x108] sm:$0xff] %vm463_vm2, %v3005_v12  ;;  %v2029_v12 = vsub.f32 %v8944_v19, %v8943_v44  ;;  %v2798_v39 = vmul.f32 %v7748_v22, %v2734_v41 }
 0x353   : > { %2864 = vadd.xlane.f32.xlu1 %v7580_v37  ;;  %v2078_v37 = vmul.f32 1.442695, %v2013_v2  ;;  %v2110_v18 = vmul.f32 1.442695, %v2029_v12 }
 0x356   : > { %2926 = vadd.xlane.f32.xlu2 %v7582_v23  ;;  %v2140_v23 = vmul.f32 1.442695, %v2044_v60  ;;  %v2849_v40 = vpop.xlane.xlu0 %2848  ;;  %v7751_v60 = vpop.eup %5442 }
 0x357   : > { %v2974_v46 = vadd.f32 %v2849_v40, %v2782_v6  ;;  %v2796_v5 = vmul.f32 %v7751_v60, %v2732_v42 }
 0x358   : > { %5444 = vpow2.f32 %v2140_v23  ;;  %v2061_v23 = vsub.f32 %v8947_v47, %v8946_v4 }
 0x359   : > { %3039 = vst.msk [vmem:[#allocation3 + $0x10] sm:$0xff] %vm463_vm2, %v2974_v46  ;;  %5446 = vpow2.f32 %v2178_v51  ;;  %v8948_v51 = vld [vmem:[#allocation64_spill] sm:$0xff] }
 0x35a   : > { %5448 = vpow2.f32 %v2078_v37  ;;  %v2062_v44 = vsub.f32 %v8948_v51, %v6568_v62  ;;  %v2767_v37 = vld [vmem:[#allocation3 + $0x198] sm:$0xff]  ;;  %v2752_v51 = vld [vmem:[#allocation3 + $0x120] sm:$0xff] }
 0x35b   : > { %2960 = vadd.xlane.f32.xlu1 %v7599_v48  ;;  %5450 = vpow2.f32 %v2110_v18  ;;  %v2174_v48 = vmul.f32 1.442695, %v2061_v23 }
 0x35c   : > { %3177 = vperm.xlu0 %5303, %v7733_v16  }
 0x35e   : > { %2896 = vadd.xlane.f32.xlu2 %v7597_v35  ;;  %v8945_v35 = vld [vmem:[#allocation88_spill] sm:$0xff]  ;;  %v2881_v28 = vpop.xlane.xlu0 %2880  ;;  %v7762_v2 = vpop.eup %5444 }
 0x35f   : > { %v2048_v24 = vsub.f32 %v8945_v35, %v6681_v59  ;;  %v2877_v6 = vpop.xlane.xlu1 %2876  ;;  %v2990_v40 = vadd.f32 %v2881_v28, %v2798_v39  ;;  %v2748_v59 = vld [vmem:[#allocation3 + $0x100] sm:$0xff]  ;;  %v7768_v19 = vpop.eup %5446  ;;  %v2176_v35 = vmul.f32 1.442695, %v2062_v44 }
 0x360   : > { %v2988_v52 = vadd.f32 %v2877_v6, %v2796_v5  ;;  %v2812_v12 = vmul.f32 %v7762_v2, %v2748_v59  ;;  %v2831_v4 = vmul.f32 %v7768_v19, %v2767_v37  ;;  %v8953_v59 = vld [vmem:[#allocation78_spill] sm:$0xff] }
 0x361   : > { %v2845_v33 = vpop.xlane.xlu2 %2844  ;;  %v2148_v46 = vmul.f32 1.442695, %v2048_v24  ;;  %3055 = vst.msk [vmem:[#allocation3 + $0x90] sm:$0xff] %vm463_vm2, %v2990_v40  ;;  %v8950_v24 = vld [vmem:[#allocation76_spill] sm:$0xff]  ;;  %v8952_v40 = vld [vmem:[#allocation81_spill] sm:$0xff]  ;;  %v8954_v37 = vld [vmem:[#allocation94_spill] sm:$0xff] }
 0x362   : > { %v2972_v34 = vadd.f32 %v2845_v33, %v2780_v58  ;;  %3053 = vst.msk [vmem:[#allocation3 + $0x80] sm:$0xff] %vm463_vm2, %v2988_v52  ;;  %v7772_v58 = vpop.eup %5448  ;;  %v8949_v33 = vld [vmem:[#allocation91_spill] sm:$0xff] }
 0x363   : > { %5452 = vpow2.f32 %v2148_v46  ;;  %v2033_v42 = vsub.f32 %v8949_v33, %v6712_v14  ;;  %2930 = vadd.xlane.f32.xlu1 %v7614_v61  ;;  %v7783_v23 = vpop.eup %5450  ;;  %v2733_v14 = vld [vmem:[#allocation3 + $0x88] sm:$0xff]  ;;  %v2015_v46 = vsub.f32 %v8953_v59, %v8952_v40 }
 0x364   : > { %3037 = vst.msk [vmem:[#allocation3] sm:$0xff] %vm463_vm2, %v2972_v34  ;;  %5454 = vpow2.f32 %v2174_v48  ;;  %v8951_v34 = vld [vmem:[#allocation73_spill] sm:$0xff]  ;;  %v2797_v48 = vmul.f32 %v7783_v23, %v2733_v14 }
 0x365   : > { %v2046_v18 = vsub.f32 %v8951_v34, %v8950_v24  ;;  %v2118_v28 = vmul.f32 1.442695, %v2033_v42  ;;  %5456 = vpow2.f32 %v2176_v35  ;;  %v2082_v33 = vmul.f32 1.442695, %v2015_v46  ;;  %v8955_v42 = vld [vmem:[#allocation87_spill] sm:$0xff] }
 0x366   : > { %2866 = vadd.xlane.f32.xlu2 %v7612_v1  ;;  %v2717_v1 = vld [vmem:[#allocation3 + $0x8] sm:$0xff]  ;;  %v2947_v26 = vpop.xlane.xlu0 %2946 }
 0x367   : > { %v2781_v47 = vmul.f32 %v7772_v58, %v2717_v1  ;;  %v2847_v39 = vpop.xlane.xlu1 %2846  ;;  %v3023_v5 = vadd.f32 %v2947_v26, %v2831_v4  ;;  %v2144_v61 = vmul.f32 1.442695, %v2046_v18  ;;  %5458 = vpow2.f32 %v2118_v28  ;;  %v2737_v28 = vld [vmem:[#allocation3 + $0xa8] sm:$0xff] }
 0x369   : > { %v2909_v41 = vpop.xlane.xlu2 %2908  ;;  %v2973_v6 = vadd.f32 %v2847_v39, %v2781_v47  ;;  %3088 = vst.msk [vmem:[#allocation3 + $0x198] sm:$0xff] %vm463_vm2, %v3023_v5  ;;  %v7789_v52 = vpop.eup %5452  ;;  %5460 = vpow2.f32 %v2144_v61 }
 0x36a   : > { %v3004_v62 = vadd.f32 %v2909_v41, %v2812_v12  ;;  %v7793_v44 = vpop.eup %5454  ;;  %v2018_v41 = vsub.f32 %v8954_v37, %v6744_v11  ;;  %v2816_v35 = vmul.f32 %v7789_v52, %v2752_v51  ;;  %v2766_v11 = vld [vmem:[#allocation3 + $0x190] sm:$0xff]  ;;  %5462 = vpow2.f32 %v2082_v33 }
 0x36b   : > { %3038 = vst.msk [vmem:[#allocation3 + $0x8] sm:$0xff] %vm463_vm2, %v2973_v6  ;;  %2900 = vadd.xlane.f32.xlu1 %v7629_v7  ;;  %v7804_v34 = vpop.eup %5456  ;;  %v8956_v7 = vld [vmem:[#allocation69_spill] sm:$0xff] }
 0x36c   : > { %3069 = vst.msk [vmem:[#allocation3 + $0x100] sm:$0xff] %vm463_vm2, %v3004_v62  ;;  %v2031_v62 = vsub.f32 %v8955_v42, %v6676_v50  ;;  %v2088_v47 = vmul.f32 1.442695, %v2018_v41  ;;  %v2047_v39 = vsub.f32 %v8956_v7, %v6601_v13  ;;  %v2830_v14 = vmul.f32 %v7804_v34, %v2766_v11  ;;  %v8957_v13 = vld [vmem:[#allocation97_spill] sm:$0xff]  ;;  %v2735_v11 = vld [vmem:[#allocation3 + $0x98] sm:$0xff]  ;;  %v8961_v7 = vld [vmem:[#allocation90_spill] sm:$0xff] }
 0x36d   : > { %v7810_v5 = vpop.eup %5458  ;;  %v2066_v40 = vsub.f32 %v8957_v13, %v6777_v29  ;;  %v2719_v29 = vld [vmem:[#allocation3 + $0x18] sm:$0xff] }
 0x36e   : > { %2962 = vadd.xlane.f32.xlu2 %v7627_v45  ;;  %v2765_v45 = vld [vmem:[#allocation3 + $0x188] sm:$0xff]  ;;  %v2917_v38 = vpop.xlane.xlu0 %2916  ;;  %v2114_v50 = vmul.f32 1.442695, %v2031_v62  ;;  %5464 = vpow2.f32 %v2088_v47  ;;  %v2146_v46 = vmul.f32 1.442695, %v2047_v39  ;;  %v2064_v39 = vsub.f32 %v8961_v7, %v6707_v17 }
 0x36f   : > { %v2829_v24 = vmul.f32 %v7793_v44, %v2765_v45  ;;  %v2943_v18 = vpop.xlane.xlu1 %2942  ;;  %v3008_v4 = vadd.f32 %v2917_v38, %v2816_v35  ;;  %v7814_v6 = vpop.eup %5460  ;;  %v2184_v33 = vmul.f32 1.442695, %v2066_v40  ;;  %v2722_v38 = vld [vmem:[#allocation3 + $0x30] sm:$0xff] }
 0x370   : > { %5466 = vpow2.f32 %v2114_v50  ;;  %v7825_v37 = vpop.eup %5462 }
 0x371   : > { %v2879_v12 = vpop.xlane.xlu2 %2878  ;;  %v3021_v26 = vadd.f32 %v2943_v18, %v2829_v24  ;;  %3073 = vst.msk [vmem:[#allocation3 + $0x120] sm:$0xff] %vm463_vm2, %v3008_v4  ;;  %5468 = vpow2.f32 %v2146_v46  ;;  %v2783_v24 = vmul.f32 %v7825_v37, %v2719_v29  ;;  %v2180_v46 = vmul.f32 1.442695, %v2064_v39  ;;  %v2755_v39 = vld [vmem:[#allocation3 + $0x138] sm:$0xff] }
 0x372   : > { %v2989_v1 = vadd.f32 %v2879_v12, %v2797_v48  ;;  %v8958_v48 = vld [vmem:[#allocation77_spill] sm:$0xff]  ;;  %v2801_v12 = vmul.f32 %v7810_v5, %v2737_v28  ;;  %5470 = vpow2.f32 %v2184_v33 }
 0x373   : > { %3086 = vst.msk [vmem:[#allocation3 + $0x188] sm:$0xff] %vm463_vm2, %v3021_v26  ;;  %2870 = vadd.xlane.f32.xlu1 %v7640_v10  ;;  %v2016_v51 = vsub.f32 %v8958_v48, %v6626_v53  ;;  %v8959_v53 = vld [vmem:[#allocation86_spill] sm:$0xff]  ;;  %v8964_v33 = vld [vmem:[#allocation93_spill] sm:$0xff] }
 0x374   : > { %3054 = vst.msk [vmem:[#allocation3 + $0x88] sm:$0xff] %vm463_vm2, %v2989_v1  ;;  %v2032_v62 = vsub.f32 %v8959_v53, %v6673_v36  ;;  %v7831_v35 = vpop.eup %5464 }
 0x375   : > { %v2084_v10 = vmul.f32 1.442695, %v2016_v51  ;;  %v2786_v50 = vmul.f32 %v7831_v35, %v2722_v38 }
 0x376   : > { %2932 = vadd.xlane.f32.xlu2 %v7642_v21  ;;  %v2750_v21 = vld [vmem:[#allocation3 + $0x110] sm:$0xff]  ;;  %v2887_v27 = vpop.xlane.xlu0 %2886  ;;  %v7835_v18 = vpop.eup %5466  ;;  %v2116_v36 = vmul.f32 1.442695, %v2032_v62 }
 0x377   : > { %v2814_v45 = vmul.f32 %v7814_v6, %v2750_v21  ;;  %v2913_v41 = vpop.xlane.xlu1 %2912  ;;  %v2993_v1 = vadd.f32 %v2887_v27, %v2801_v12  ;;  %5472 = vpow2.f32 %v2084_v10  ;;  %v2770_v12 = vld [vmem:[#allocation3 + $0x1b0] sm:$0xff] }
 0x378   : > { %5474 = vpow2.f32 %v2116_v36 }
 0x379   : > { %v2945_v61 = vpop.xlane.xlu2 %2944  ;;  %v3006_v42 = vadd.f32 %v2913_v41, %v2814_v45  ;;  %3058 = vst.msk [vmem:[#allocation3 + $0xa8] sm:$0xff] %vm463_vm2, %v2993_v1  ;;  %v2720_v41 = vld [vmem:[#allocation3 + $0x20] sm:$0xff] }
 0x37a   : > { %v3022_v59 = vadd.f32 %v2945_v61, %v2830_v14  ;;  %v2799_v14 = vmul.f32 %v7835_v18, %v2735_v11  ;;  %v7845_v61 = vpop.eup %5468 }
 0x37b   : > { %3071 = vst.msk [vmem:[#allocation3 + $0x110] sm:$0xff] %vm463_vm2, %v3006_v42  ;;  %2966 = vadd.xlane.f32.xlu1 %v7659_v31  ;;  %v8962_v31 = vld [vmem:[#allocation89_spill] sm:$0xff]  ;;  %v7851_v48 = vpop.eup %5470  ;;  %v2049_v42 = vsub.f32 %v8964_v33, %v6738_v20  ;;  %v8966_v20 = vld [vmem:[#allocation92_spill] sm:$0xff]  ;;  %v8973_v33 = vld [vmem:[#allocation95_spill] sm:$0xff] }
 0x37c   : > { %3087 = vst.msk [vmem:[#allocation3 + $0x190] sm:$0xff] %vm463_vm2, %v3022_v59  ;;  %v2017_v17 = vsub.f32 %v8962_v31, %v6704_v55  ;;  %v2834_v10 = vmul.f32 %v7851_v48, %v2770_v12 }
 0x37d   : > { %v5473_v45 = vpop.eup %5472  ;;  %v2150_v36 = vmul.f32 1.442695, %v2049_v42 }
 0x37e   : > { %2902 = vadd.xlane.f32.xlu2 %v7657_v0  ;;  %v8960_v0 = vld [vmem:[#allocation102_spill] sm:$0xff]  ;;  %v2857_v28 = vpop.xlane.xlu0 %2856  ;;  %v2086_v55 = vmul.f32 1.442695, %v2017_v17  ;;  %v2784_v53 = vmul.f32 %v5473_v45, %v2720_v41  ;;  %3187 = vperm.xlu0 %5303, %v5473_v45   ;;  %v8970_v41 = vld [vmem:[#allocation127_spill] sm:$0xff] }
 0x37f   : > { %v2051_v47 = vsub.f32 %v8960_v0, %v6808_v30  ;;  %v2883_v21 = vpop.xlane.xlu1 %2882  ;;  %v2978_v13 = vadd.f32 %v2857_v28, %v2786_v50  ;;  %v2751_v30 = vld [vmem:[#allocation3 + $0x118] sm:$0xff] }
 0x380   : > { %v2991_v59 = vadd.f32 %v2883_v21, %v2799_v14  ;;  %v2815_v51 = vmul.f32 %v7845_v61, %v2751_v30  ;;  %v2768_v14 = vld [vmem:[#allocation3 + $0x1a0] sm:$0xff]  ;;  %v8968_v30 = vld [vmem:[#allocation99_spill] sm:$0xff] }
 0x381   : > { %v2851_v4 = vpop.xlane.xlu2 %2850  ;;  %v2154_v40 = vmul.f32 1.442695, %v2051_v47  ;;  %3043 = vst.msk [vmem:[#allocation3 + $0x30] sm:$0xff] %vm463_vm2, %v2978_v13 }
 0x382   : > { %v2975_v26 = vadd.f32 %v2851_v4, %v2783_v24  ;;  %3056 = vst.msk [vmem:[#allocation3 + $0x98] sm:$0xff] %vm463_vm2, %v2991_v59  ;;  %v7862_v24 = vpop.eup %5474 }
 0x383   : > { %5476 = vpow2.f32 %v2154_v40  ;;  %2936 = vadd.xlane.f32.xlu1 %v7674_v3  ;;  %v8965_v3 = vld [vmem:[#allocation101_spill] sm:$0xff]  ;;  %v8969_v40 = vld [vmem:[#allocation96_spill] sm:$0xff] }
 0x384   : > { %3040 = vst.msk [vmem:[#allocation3 + $0x18] sm:$0xff] %vm463_vm2, %v2975_v26  ;;  %5478 = vpow2.f32 %v2180_v46  ;;  %v2019_v11 = vsub.f32 %v8965_v3, %v6803_v49  ;;  %v2065_v26 = vsub.f32 %v8966_v20, %v6735_v63  ;;  %v2034_v59 = vsub.f32 %v8969_v40, %v8968_v30  ;;  %v8974_v3 = vld [vmem:[#allocation120_spill] sm:$0xff] }
 0x385   : > { %5480 = vpow2.f32 %v2086_v55  ;;  %v8972_v55 = vld [vmem:[#allocation98_spill] sm:$0xff] }
 0x386   : > { %2872 = vadd.xlane.f32.xlu2 %v7672_v54  ;;  %v8963_v54 = vld [vmem:[#allocation106_spill] sm:$0xff]  ;;  %v2953_v62 = vpop.xlane.xlu0 %2952  ;;  %v2090_v28 = vmul.f32 1.442695, %v2019_v11  ;;  %v2182_v13 = vmul.f32 1.442695, %v2065_v26  ;;  %v2050_v42 = vsub.f32 %v8973_v33, %v8972_v55  ;;  %v8975_v11 = vld [vmem:[#allocation116_spill] sm:$0xff] }
 0x387   : > { %v2036_v1 = vsub.f32 %v8963_v54, %v6839_v43  ;;  %v2853_v38 = vpop.xlane.xlu1 %2852  ;;  %v3026_v4 = vadd.f32 %v2953_v62, %v2834_v10  ;;  %v2736_v43 = vld [vmem:[#allocation3 + $0xa0] sm:$0xff]  ;;  %v8971_v54 = vld [vmem:[#allocation124_spill] sm:$0xff]  ;;  %v2120_v10 = vmul.f32 1.442695, %v2034_v59  ;;  %v8978_v59 = vld [vmem:[#allocation103_spill] sm:$0xff] }
 0x388   : > { %v2976_v47 = vadd.f32 %v2853_v38, %v2784_v53  ;;  %v2800_v16 = vmul.f32 %v7862_v24, %v2736_v43  ;;  %v2740_v62 = vld [vmem:[#allocation3 + $0xc0] sm:$0xff]  ;;  %v2753_v43 = vld [vmem:[#allocation3 + $0x128] sm:$0xff]  ;;  %v2152_v20 = vmul.f32 1.442695, %v2050_v42 }
 0x389   : > { %v2915_v27 = vpop.xlane.xlu2 %2914  ;;  %v2124_v0 = vmul.f32 1.442695, %v2036_v1  ;;  %3091 = vst.msk [vmem:[#allocation3 + $0x1b0] sm:$0xff] %vm463_vm2, %v3026_v4  ;;  %v7871_v7 = vpop.eup %5476  ;;  %v2022_v1 = vsub.f32 %v8971_v54, %v8970_v41  ;;  %v2738_v41 = vld [vmem:[#allocation3 + $0xb0] sm:$0xff]  ;;  %v8980_v54 = vld [vmem:[#allocation128_spill] sm:$0xff] }
 0x38a   : > { %v3007_v29 = vadd.f32 %v2915_v27, %v2815_v51  ;;  %3041 = vst.msk [vmem:[#allocation3 + $0x20] sm:$0xff] %vm463_vm2, %v2976_v47  ;;  %v7875_v50 = vpop.eup %5478  ;;  %v2819_v31 = vmul.f32 %v7871_v7, %v2755_v39 }
 0x38b   : > { %5482 = vpow2.f32 %v2124_v0  ;;  %2906 = vadd.xlane.f32.xlu1 %v7688_v57  ;;  %v2832_v17 = vmul.f32 %v7875_v50, %v2768_v14  ;;  %v7885_v51 = vpop.eup %5480  ;;  %v2069_v0 = vsub.f32 %v8975_v11, %v8974_v3 }
 0x38c   : > { %3072 = vst.msk [vmem:[#allocation3 + $0x118] sm:$0xff] %vm463_vm2, %v3007_v29  ;;  %5484 = vpow2.f32 %v2150_v36 }
 0x38d   : > { %5486 = vpow2.f32 %v2090_v28 }
 0x38e   : > { %2968 = vadd.xlane.f32.xlu2 %v7686_v15  ;;  %v8967_v15 = vld [vmem:[#allocation111_spill] sm:$0xff]  ;;  %v2923_v46 = vpop.xlane.xlu0 %2922  ;;  %5488 = vpow2.f32 %v2182_v13  ;;  %v8977_v13 = vld [vmem:[#allocation148_spill] sm:$0xff] }
 0x38f   : > { %v2021_v21 = vsub.f32 %v8967_v15, %v6871_v8  ;;  %v2949_v12 = vpop.xlane.xlu1 %2948  ;;  %v3011_v27 = vadd.f32 %v2923_v46, %v2819_v31  ;;  %v2721_v8 = vld [vmem:[#allocation3 + $0x28] sm:$0xff]  ;;  %v8979_v31 = vld [vmem:[#allocation100_spill] sm:$0xff] }
 0x390   : > { %v3024_v29 = vadd.f32 %v2949_v12, %v2832_v17  ;;  %v2785_v45 = vmul.f32 %v7885_v51, %v2721_v8  ;;  %v2769_v15 = vld [vmem:[#allocation3 + $0x1a8] sm:$0xff]  ;;  %v2035_v17 = vsub.f32 %v8979_v31, %v8978_v59  ;;  %v8987_v31 = vld [vmem:[#allocation131_spill] sm:$0xff] }
 0x391   : > { %v2885_v49 = vpop.xlane.xlu2 %2884  ;;  %v2094_v57 = vmul.f32 1.442695, %v2021_v21  ;;  %3076 = vst.msk [vmem:[#allocation3 + $0x138] sm:$0xff] %vm463_vm2, %v3011_v27  ;;  %v7893_v53 = vpop.eup %5482  ;;  %v2190_v21 = vmul.f32 1.442695, %v2069_v0  ;;  %v2725_v27 = vld [vmem:[#allocation3 + $0x48] sm:$0xff] }
 0x392   : > { %v2992_v63 = vadd.f32 %v2885_v49, %v2800_v16  ;;  %3089 = vst.msk [vmem:[#allocation3 + $0x1a0] sm:$0xff] %vm463_vm2, %v3024_v29  ;;  %v7897_v38 = vpop.eup %5484  ;;  %v2804_v26 = vmul.f32 %v7893_v53, %v2740_v62  ;;  %v2122_v42 = vmul.f32 1.442695, %v2035_v17  ;;  %v8986_v59 = vld [vmem:[#allocation134_spill] sm:$0xff] }
 0x393   : > { %5490 = vpow2.f32 %v2094_v57  ;;  %v7902_v36 = vpop.eup %5486  ;;  %v2817_v16 = vmul.f32 %v7897_v38, %v2753_v43  ;;  %v2039_v17 = vsub.f32 %v8987_v31, %v8986_v59  ;;  %v8995_v59 = vld [vmem:[#allocation115_spill] sm:$0xff] }
 0x394   : > { %3057 = vst.msk [vmem:[#allocation3 + $0xa0] sm:$0xff] %vm463_vm2, %v2992_v63  ;;  %5492 = vpow2.f32 %v2120_v10  ;;  %v7906_v49 = vpop.eup %5488  ;;  %3202 = vperm.xlu0 %5303, %v7902_v36   ;;  %v8976_v63 = vld [vmem:[#allocation151_spill] sm:$0xff]  ;;  %v8982_v10 = vld [vmem:[#allocation108_spill] sm:$0xff] }
 0x395   : > { %v2025_v30 = vsub.f32 %v8977_v13, %v8976_v63  ;;  %v2833_v12 = vmul.f32 %v7906_v49, %v2769_v15  ;;  %v2773_v13 = vld [vmem:[#allocation3 + $0x1c8] sm:$0xff] }
 0x396   : > { %2938 = vadd.xlane.f32.xlu2 %v7701_v25  ;;  %v2096_v25 = vmul.f32 1.442695, %v2022_v1  ;;  %v2893_v39 = vpop.xlane.xlu0 %2892  ;;  %v8981_v1 = vld [vmem:[#allocation125_spill] sm:$0xff] }
 0x397   : > { %v2919_v14 = vpop.xlane.xlu1 %2918  ;;  %v2996_v28 = vadd.f32 %v2893_v39, %v2804_v26  ;;  %v2054_v29 = vsub.f32 %v8981_v1, %v8980_v54  ;;  %v2102_v55 = vmul.f32 1.442695, %v2025_v30  ;;  %v8984_v39 = vld [vmem:[#allocation107_spill] sm:$0xff]  ;;  %v7943_v1 = vpop.f32.mrf.mxu0 }
 0x398   : > { %5494 = vpow2.f32 %v2096_v25  ;;  %v3009_v40 = vadd.f32 %v2919_v14, %v2817_v16  ;;  %v8985_v14 = vld [vmem:[#allocation104_spill] sm:$0xff] }
 0x399   : > { %v2855_v4 = vpop.xlane.xlu2 %2854  ;;  %5496 = vpow2.f32 %v2152_v20  ;;  %3061 = vst.msk [vmem:[#allocation3 + $0xc0] sm:$0xff] %vm463_vm2, %v2996_v28  ;;  %v7914_v46 = vpop.eup %5490  ;;  %v2754_v20 = vld [vmem:[#allocation3 + $0x130] sm:$0xff]  ;;  %v2160_v26 = vmul.f32 1.442695, %v2054_v29  ;;  %v2020_v28 = vsub.f32 %v8985_v14, %v8984_v39 }
 0x39a   : > { %v2977_v47 = vadd.f32 %v2855_v4, %v2785_v45  ;;  %3074 = vst.msk [vmem:[#allocation3 + $0x128] sm:$0xff] %vm463_vm2, %v3009_v40  ;;  %v7918_v8 = vpop.eup %5492  ;;  %5498 = vpow2.f32 %v2190_v21  ;;  %v8983_v45 = vld [vmem:[#allocation105_spill] sm:$0xff]  ;;  %v2789_v4 = vmul.f32 %v7914_v46, %v2725_v27  ;;  %v2723_v40 = vld [vmem:[#allocation3 + $0x38] sm:$0xff] }
 0x39b   : > { %v2067_v62 = vsub.f32 %v8983_v45, %v8982_v10  ;;  %v2802_v25 = vmul.f32 %v7918_v8, %v2738_v41  ;;  %5500 = vpow2.f32 %v2102_v55  ;;  %v2092_v27 = vmul.f32 1.442695, %v2020_v28  ;;  %v8989_v41 = vld [vmem:[#allocation110_spill] sm:$0xff]  ;;  %v2771_v28 = vld [vmem:[#allocation3 + $0x1b8] sm:$0xff] }
 0x39c   : > { %3042 = vst.msk [vmem:[#allocation3 + $0x28] sm:$0xff] %vm463_vm2, %v2977_v47  ;;  %5502 = vpow2.f32 %v2122_v42 }
 0x39d   : > { %v2186_v15 = vmul.f32 1.442695, %v2067_v62  ;;  %5504 = vpow2.f32 %v2160_v26 }
 0x39e   : > { %v7925_v43 = vpop.eup %5494  ;;  %v2863_v3 = vpop.xlane.xlu0 %2862 }
 0x39f   : > { %v7929_v11 = vpop.eup %5496  ;;  %v2889_v0 = vpop.xlane.xlu1 %2888  ;;  %v2981_v47 = vadd.f32 %v2863_v3, %v2789_v4  ;;  %3217 = vperm.xlu0 %5303, %v7925_v43   ;;  %5506 = vpow2.f32 %v2186_v15  ;;  %v2739_v4 = vld [vmem:[#allocation3 + $0xb8] sm:$0xff]  ;;  %v8993_v15 = vld [vmem:[#allocation137_spill] sm:$0xff] }
 0x3a0   : > { %v2994_v16 = vadd.f32 %v2889_v0, %v2802_v25  ;;  %v7935_v21 = vpop.eup %5498  ;;  %v2818_v63 = vmul.f32 %v7929_v11, %v2754_v20  ;;  %v2130_v25 = vmul.f32 1.442695, %v2039_v17  ;;  %5508 = vpow2.f32 %v2092_v27  ;;  %v8991_v0 = vld [vmem:[#allocation109_spill] sm:$0xff]  ;;  %v7968_v17 = vpop.f32.mrf.mxu0 }
 0x3a1   : > { %v2951_v57 = vpop.xlane.xlu2 %2950  ;;  %3046 = vst.msk [vmem:[#allocation3 + $0x48] sm:$0xff] %vm463_vm2, %v2981_v47  ;;  %v2837_v29 = vmul.f32 %v7935_v21, %v2773_v13  ;;  %v7947_v55 = vpop.eup %5500 }
 0x3a2   : > { %v3025_v33 = vadd.f32 %v2951_v57, %v2833_v12  ;;  %3059 = vst.msk [vmem:[#allocation3 + $0xb0] sm:$0xff] %vm463_vm2, %v2994_v16  ;;  %v8988_v57 = vld [vmem:[#allocation113_spill] sm:$0xff]  ;;  %v7951_v10 = vpop.eup %5502  ;;  %v2758_v16 = vld [vmem:[#allocation3 + $0x150] sm:$0xff]  ;;  %5510 = vpow2.f32 %v2130_v25 }
 0x3a3   : > { %v2052_v54 = vsub.f32 %v8989_v41, %v8988_v57  ;;  %v2803_v26 = vmul.f32 %v7951_v10, %v2739_v4 }
 0x3a4   : > { %3090 = vst.msk [vmem:[#allocation3 + $0x1a8] sm:$0xff] %vm463_vm2, %v3025_v33  ;;  %3167 = vperm.xlu1 %5301, %v7742_v56   ;;  %v2787_v33 = vmul.f32 %v7902_v36, %v2723_v40  ;;  %v8990_v56 = vld [vmem:[#allocation112_spill] sm:$0xff]  ;;  %v7958_v36 = vpop.eup %5504  ;;  %v8994_v40 = vld [vmem:[#allocation118_spill] sm:$0xff] }
 0x3a5   : > { %v2068_v47 = vsub.f32 %v8991_v0, %v8990_v56  ;;  %v2156_v20 = vmul.f32 1.442695, %v2052_v54  ;;  %v7962_v39 = vpop.eup %5506  ;;  %v2037_v31 = vsub.f32 %v8995_v59, %v8994_v40  ;;  %v8999_v56 = vld [vmem:[#allocation129_spill] sm:$0xff] }
 0x3a6   : > { %v2959_v42 = vpop.xlane.xlu0 %2958  ;;  %v2835_v27 = vmul.f32 %v7962_v39, %v2771_v28  ;;  %v5509_v41 = vpop.eup %5508 }
 0x3a7   : > { %v2859_v45 = vpop.xlane.xlu1 %2858  ;;  %v3029_v62 = vadd.f32 %v2959_v42, %v2837_v29  ;;  %3232 = vperm.xlu0 %5303, %v7947_v55   ;;  %5512 = vpow2.f32 %v2156_v20  ;;  %v8996_v42 = vld [vmem:[#allocation117_spill] sm:$0xff]  ;;  %v2743_v20 = vld [vmem:[#allocation3 + $0xd8] sm:$0xff] }
 0x3a8   : > { %v2979_v3 = vadd.f32 %v2859_v45, %v2787_v33  ;;  %v2724_v33 = vld [vmem:[#allocation3 + $0x40] sm:$0xff]  ;;  %v8997_v45 = vld [vmem:[#allocation114_spill] sm:$0xff] }
 0x3a9   : > { %v2921_v30 = vpop.xlane.xlu2 %2920  ;;  %3094 = vst.msk [vmem:[#allocation3 + $0x1c8] sm:$0xff] %vm463_vm2, %v3029_v62  ;;  %v2053_v62 = vsub.f32 %v8997_v45, %v8996_v42 }
 0x3aa   : > { %v3010_v12 = vadd.f32 %v2921_v30, %v2818_v63  ;;  %3044 = vst.msk [vmem:[#allocation3 + $0x38] sm:$0xff] %vm463_vm2, %v2979_v3  ;;  %v2188_v30 = vmul.f32 1.442695, %v2068_v47  ;;  %v8998_v3 = vld [vmem:[#allocation132_spill] sm:$0xff]  ;;  %v7981_v47 = vpop.eup %5510 }
 0x3ab   : > { %v2023_v0 = vsub.f32 %v8999_v56, %v8998_v3  ;;  %v2158_v28 = vmul.f32 1.442695, %v2053_v62  ;;  %v2807_v40 = vmul.f32 %v7981_v47, %v2743_v20  ;;  %v9004_v62 = vld [vmem:[#allocation156_spill] sm:$0xff] }
 0x3ac   : > { %3075 = vst.msk [vmem:[#allocation3 + $0x130] sm:$0xff] %vm463_vm2, %v3010_v12  ;;  %3182 = vperm.xlu1 %5301, %v7825_v37   ;;  %v2822_v12 = vmul.f32 %v7958_v36, %v2758_v16  ;;  %5514 = vpow2.f32 %v2188_v30  ;;  %v2126_v37 = vmul.f32 1.442695, %v2037_v31  ;;  %v7988_v30 = vpop.f32.mrf.mxu0 }
 0x3ae   : > { %3172 = vperm.xlu2 %5302, %v7772_v58   ;;  %v8992_v58 = vld [vmem:[#allocation140_spill] sm:$0xff]  ;;  %v2929_v57 = vpop.xlane.xlu0 %2928 }
 0x3af   : > { %v2024_v63 = vsub.f32 %v8993_v15, %v8992_v58  ;;  %v2955_v54 = vpop.xlane.xlu1 %2954  ;;  %v3014_v29 = vadd.f32 %v2929_v57, %v2822_v12  ;;  %3247 = vperm.xlu0 %5303, %v7751_v60   ;;  %v2788_v60 = vmul.f32 %v5509_v41, %v2724_v33  ;;  %v9001_v58 = vld [vmem:[#allocation143_spill] sm:$0xff] }
 0x3b0   : > { %v3027_v25 = vadd.f32 %v2955_v54, %v2835_v27  ;;  %v2772_v54 = vld [vmem:[#allocation3 + $0x1c0] sm:$0xff]  ;;  %v9003_v33 = vld [vmem:[#allocation123_spill] sm:$0xff] }
 0x3b1   : > { %v2891_v14 = vpop.xlane.xlu2 %2890  ;;  %v2100_v4 = vmul.f32 1.442695, %v2024_v63  ;;  %3079 = vst.msk [vmem:[#allocation3 + $0x150] sm:$0xff] %vm463_vm2, %v3014_v29  ;;  %v9002_v29 = vld [vmem:[#allocation126_spill] sm:$0xff] }
 0x3b2   : > { %v2995_v13 = vadd.f32 %v2891_v14, %v2803_v26  ;;  %3092 = vst.msk [vmem:[#allocation3 + $0x1b8] sm:$0xff] %vm463_vm2, %v3027_v25  ;;  %v7984_v26 = vpop.eup %5512  ;;  %v2756_v14 = vld [vmem:[#allocation3 + $0x140] sm:$0xff]  ;;  %v2038_v42 = vsub.f32 %v9003_v33, %v9002_v29 }
 0x3b3   : > { %5516 = vpow2.f32 %v2100_v4  ;;  %v2820_v59 = vmul.f32 %v7984_v26, %v2756_v14  ;;  %v7994_v12 = vpop.eup %5514  ;;  %v9005_v4 = vld [vmem:[#allocation153_spill] sm:$0xff] }
 0x3b4   : > { %3060 = vst.msk [vmem:[#allocation3 + $0xb8] sm:$0xff] %vm463_vm2, %v2995_v13  ;;  %5518 = vpow2.f32 %v2126_v37  ;;  %v2098_v13 = vmul.f32 1.442695, %v2023_v0  ;;  %3197 = vperm.xlu1 %5301, %v7831_v35   ;;  %v2026_v25 = vsub.f32 %v9005_v4, %v9004_v62  ;;  %v2836_v3 = vmul.f32 %v7994_v12, %v2772_v54  ;;  %v9007_v14 = vld [vmem:[#allocation149_spill] sm:$0xff]  ;;  %v9013_v4 = vld [vmem:[#allocation142_spill] sm:$0xff] }
 0x3b5   : > { %5520 = vpow2.f32 %v2158_v28  ;;  %v2128_v20 = vmul.f32 1.442695, %v2038_v42  ;;  %v8018_v42 = vpop.f32.mrf.mxu0  ;;  %v9012_v62 = vld [vmem:[#allocation145_spill] sm:$0xff] }
 0x3b6   : > { %3192 = vperm.xlu2 %5302, %v7885_v51   ;;  %v9000_v51 = vld [vmem:[#allocation146_spill] sm:$0xff]  ;;  %v2899_v31 = vpop.xlane.xlu0 %2898  ;;  %5522 = vpow2.f32 %v2098_v13 }
 0x3b7   : > { %v2072_v15 = vsub.f32 %v9001_v58, %v9000_v51  ;;  %v2925_v27 = vpop.xlane.xlu1 %2924  ;;  %v2999_v57 = vadd.f32 %v2899_v31, %v2807_v40  ;;  %3262 = vperm.xlu0 %5303, %v7835_v18   ;;  %v2728_v18 = vld [vmem:[#allocation3 + $0x60] sm:$0xff]  ;;  %v9009_v58 = vld [vmem:[#allocation130_spill] sm:$0xff] }
 0x3b8   : > { %v3012_v35 = vadd.f32 %v2925_v27, %v2820_v59  ;;  %v9008_v51 = vld [vmem:[#allocation133_spill] sm:$0xff]  ;;  %v9010_v59 = vld [vmem:[#allocation164_spill] sm:$0xff] }
 0x3b9   : > { %v2861_v16 = vpop.xlane.xlu2 %2860  ;;  %v2196_v45 = vmul.f32 1.442695, %v2072_v15  ;;  %3064 = vst.msk [vmem:[#allocation3 + $0xd8] sm:$0xff] %vm463_vm2, %v2999_v57  ;;  %v5517_v37 = vpop.eup %5516  ;;  %v2070_v15 = vsub.f32 %v9009_v58, %v9008_v51  ;;  %v9011_v31 = vld [vmem:[#allocation161_spill] sm:$0xff]  ;;  %v9016_v58 = vld [vmem:[#allocation155_spill] sm:$0xff] }
 0x3ba   : > { %v2980_v63 = vadd.f32 %v2861_v16, %v2788_v60  ;;  %3077 = vst.msk [vmem:[#allocation3 + $0x140] sm:$0xff] %vm463_vm2, %v3012_v35  ;;  %v5519_v56 = vpop.eup %5518  ;;  %v2741_v60 = vld [vmem:[#allocation3 + $0xc8] sm:$0xff]  ;;  %v9006_v16 = vld [vmem:[#allocation152_spill] sm:$0xff]  ;;  %v2792_v13 = vmul.f32 %v5517_v37, %v2728_v18  ;;  %v2027_v27 = vsub.f32 %v9011_v31, %v9010_v59  ;;  %v8013_v57 = vpop.f32.mrf.mxu1 }
 0x3bb   : > { %5524 = vpow2.f32 %v2196_v45  ;;  %v8009_v40 = vpop.eup %5520  ;;  %v2805_v54 = vmul.f32 %v5519_v56, %v2741_v60 }
 0x3bc   : > { %3045 = vst.msk [vmem:[#allocation3 + $0x40] sm:$0xff] %vm463_vm2, %v2980_v63  ;;  %v2104_v63 = vmul.f32 1.442695, %v2026_v25  ;;  %3212 = vperm.xlu1 %5301, %v7914_v46   ;;  %v8016_v33 = vpop.eup %5522  ;;  %v2757_v46 = vld [vmem:[#allocation3 + $0x148] sm:$0xff]  ;;  %5526 = vpow2.f32 %v2128_v20  ;;  %v2040_v25 = vsub.f32 %v9013_v4, %v9012_v62 }
 0x3bd   : > { %v8042_v62 = vpop.f32.mrf.mxu0 }
 0x3be   : > { %3207 = vperm.xlu2 %5302, %v5509_v41   ;;  %v2057_v41 = vsub.f32 %v9007_v14, %v9006_v16  ;;  %v2869_v29 = vpop.xlane.xlu0 %2868  ;;  %5528 = vpow2.f32 %v2104_v63  ;;  %v2106_v16 = vmul.f32 1.442695, %v2027_v27  ;;  %v2776_v14 = vld [vmem:[#allocation3 + $0x1e0] sm:$0xff]  ;;  %v2132_v51 = vmul.f32 1.442695, %v2040_v25  ;;  %v9018_v63 = vld [vmem:[#allocation136_spill] sm:$0xff] }
 0x3bf   : > { %v2895_v45 = vpop.xlane.xlu1 %2894  ;;  %v2984_v35 = vadd.f32 %v2869_v29, %v2792_v13  ;;  %3277 = vperm.xlu0 %5303, %v7918_v8   ;;  %v2821_v8 = vmul.f32 %v8009_v40, %v2757_v46 }
 0x3c0   : > { %v2997_v18 = vadd.f32 %v2895_v45, %v2805_v54 }
 0x3c1   : > { %v2957_v0 = vpop.xlane.xlu2 %2956  ;;  %3049 = vst.msk [vmem:[#allocation3 + $0x60] sm:$0xff] %vm463_vm2, %v2984_v35  ;;  %v8025_v60 = vpop.eup %5524 }
 0x3c2   : > { %v3028_v28 = vadd.f32 %v2957_v0, %v2836_v3  ;;  %v2166_v3 = vmul.f32 1.442695, %v2057_v41  ;;  %v2192_v0 = vmul.f32 1.442695, %v2070_v15  ;;  %9014 = vst [vmem:[#allocation11_spill] sm:$0xff] %v8025_v60  ;;  %v9015_v41 = vld [vmem:[#allocation158_spill] sm:$0xff]  ;;  %v2840_v27 = vmul.f32 %v8025_v60, %v2776_v14  ;;  %v8034_v54 = vpop.eup %5526  ;;  %v8036_v29 = vpop.f32.mrf.mxu1 }
 0x3c3   : > { %3062 = vst.msk [vmem:[#allocation3 + $0xc8] sm:$0xff] %vm463_vm2, %v2997_v18  ;;  %v2042_v13 = vsub.f32 %v9016_v58, %v9015_v41  ;;  %v9017_v15 = vld [vmem:[#allocation139_spill] sm:$0xff]  ;;  %v2760_v60 = vld [vmem:[#allocation3 + $0x160] sm:$0xff] }
 0x3c4   : > { %3093 = vst.msk [vmem:[#allocation3 + $0x1c0] sm:$0xff] %vm463_vm2, %v3028_v28  ;;  %v2726_v28 = vld [vmem:[#allocation3 + $0x50] sm:$0xff]  ;;  %5530 = vpow2.f32 %v2166_v3  ;;  %v2055_v31 = vsub.f32 %v9018_v63, %v9017_v15  ;;  %3227 = vperm.xlu1 %5301, %v5517_v37   ;;  %v8040_v46 = vpop.eup %5528 }
 0x3c5   : > { %5532 = vpow2.f32 %v2192_v0  ;;  %v2790_v45 = vmul.f32 %v7925_v43, %v2726_v28  ;;  %v2742_v37 = vld [vmem:[#allocation3 + $0xd0] sm:$0xff]  ;;  %v2136_v3 = vmul.f32 1.442695, %v2042_v13  ;;  %v9019_v0 = vld [vmem:[#allocation138_spill] sm:$0xff]  ;;  %v9021_v13 = vld [vmem:[#allocation168_spill] sm:$0xff] }
 0x3c6   : > { %3222 = vperm.xlu2 %5302, %v8016_v33   ;;  %5534 = vpow2.f32 %v2106_v16  ;;  %v2965_v35 = vpop.xlane.xlu0 %2964  ;;  %v9020_v16 = vld [vmem:[#allocation135_spill] sm:$0xff]  ;;  %v2162_v14 = vmul.f32 1.442695, %v2055_v31  ;;  %v2761_v28 = vld [vmem:[#allocation3 + $0x168] sm:$0xff] }
 0x3c7   : > { %v2865_v4 = vpop.xlane.xlu1 %2864  ;;  %v3032_v25 = vadd.f32 %v2965_v35, %v2840_v27  ;;  %3292 = vperm.xlu0 %5303, %v5519_v56   ;;  %5536 = vpow2.f32 %v2132_v51  ;;  %v2774_v41 = vld [vmem:[#allocation3 + $0x1d0] sm:$0xff] }
 0x3c8   : > { %v2982_v18 = vadd.f32 %v2865_v4, %v2790_v45  ;;  %5538 = vpow2.f32 %v2136_v3  ;;  %v2727_v3 = vld [vmem:[#allocation3 + $0x58] sm:$0xff] }
 0x3c9   : > { %v2927_v20 = vpop.xlane.xlu2 %2926  ;;  %3097 = vst.msk [vmem:[#allocation3 + $0x1e0] sm:$0xff] %vm463_vm2, %v3032_v25  ;;  %5540 = vpow2.f32 %v2162_v14  ;;  %v9026_v14 = vld [vmem:[#allocation141_spill] sm:$0xff] }
 0x3ca   : > { %v3013_v59 = vadd.f32 %v2927_v20, %v2821_v8  ;;  %v2071_v8 = vsub.f32 %v9020_v16, %v9019_v0  ;;  %v8048_v43 = vpop.eup %5530  ;;  %3047 = vst.msk [vmem:[#allocation3 + $0x50] sm:$0xff] %vm463_vm2, %v2982_v18  ;;  %v2806_v20 = vmul.f32 %v8034_v54, %v2742_v37  ;;  %v8060_v0 = vpop.f32.mrf.mxu1 }
 0x3cb   : > { %v8052_v56 = vpop.eup %5532  ;;  %v2825_v45 = vmul.f32 %v8048_v43, %v2761_v28  ;;  %9024 = vst [vmem:[#allocation5_spill] sm:$0xff] %v8060_v0  ;;  %v8065_v28 = vpop.f32.mrf.mxu0 }
 0x3cc   : > { %3078 = vst.msk [vmem:[#allocation3 + $0x148] sm:$0xff] %vm463_vm2, %v3013_v59  ;;  %v5535_v58 = vpop.eup %5534  ;;  %v9022_v59 = vld [vmem:[#allocation170_spill] sm:$0xff]  ;;  %v2194_v27 = vmul.f32 1.442695, %v2071_v8  ;;  %v2838_v4 = vmul.f32 %v8052_v56, %v2774_v41  ;;  %v9025_v8 = vld [vmem:[#allocation144_spill] sm:$0xff]  ;;  %v2791_v41 = vmul.f32 %v8016_v33, %v2727_v3 }
 0x3cd   : > { %v9023_v15 = vsub.f32 %v9021_v13, %v9022_v59  ;;  %3242 = vperm.xlu1 %5301, %v5535_v58   ;;  %v5537_v35 = vpop.eup %5536  ;;  %v2746_v13 = vld [vmem:[#allocation3 + $0xf0] sm:$0xff]  ;;  %v2775_v3 = vld [vmem:[#allocation3 + $0x1d8] sm:$0xff] }
 0x3ce   : > { %3237 = vperm.xlu2 %5302, %v8040_v46   ;;  %v2935_v25 = vpop.xlane.xlu0 %2934 }
 0x3cf   : > { %v2138_v63 = vmul.f32 1.442695, %v9023_v15  ;;  %v2961_v37 = vpop.xlane.xlu1 %2960  ;;  %v3017_v18 = vadd.f32 %v2935_v25, %v2825_v45  ;;  %3307 = vperm.xlu0 %5303, %v5537_v35  }
 0x3d0   : > { %v3030_v16 = vadd.f32 %v2961_v37, %v2838_v4 }
 0x3d1   : > { %v2897_v51 = vpop.xlane.xlu2 %2896  ;;  %5542 = vpow2.f32 %v2138_v63  ;;  %3082 = vst.msk [vmem:[#allocation3 + $0x168] sm:$0xff] %vm463_vm2, %v3017_v18  ;;  %v2759_v63 = vld [vmem:[#allocation3 + $0x158] sm:$0xff] }
 0x3d2   : > { %v2998_v31 = vadd.f32 %v2897_v51, %v2806_v20  ;;  %5544 = vpow2.f32 %v2194_v27  ;;  %v2056_v20 = vsub.f32 %v9026_v14, %v9025_v8  ;;  %v8068_v51 = vpop.eup %5538  ;;  %3095 = vst.msk [vmem:[#allocation3 + $0x1d0] sm:$0xff] %vm463_vm2, %v3030_v16  ;;  %v9027_v16 = vld [vmem:[#allocation165_spill] sm:$0xff]  ;;  %v9028_v8 = vld [vmem:[#allocation167_spill] sm:$0xff] }
 0x3d3   : > { %v8072_v59 = vpop.eup %5540  ;;  %v2810_v27 = vmul.f32 %v8068_v51, %v2746_v13  ;;  %v9029_v14 = vsub.f32 %v9027_v16, %v9028_v8  ;;  %v9031_v13 = vld [vmem:[#allocation147_spill] sm:$0xff]  ;;  %v2744_v8 = vld [vmem:[#allocation3 + $0xe0] sm:$0xff] }
 0x3d4   : > { %3063 = vst.msk [vmem:[#allocation3 + $0xd0] sm:$0xff] %vm463_vm2, %v2998_v31  ;;  %v2164_v31 = vmul.f32 1.442695, %v2056_v20  ;;  %v2823_v4 = vmul.f32 %v8072_v59, %v2759_v63  ;;  %v8089_v63 = vpop.f32.mrf.mxu0 }
 0x3d5   : > { %3257 = vperm.xlu1 %5301, %v7748_v22   ;;  %v2202_v22 = vmul.f32 1.442695, %v9029_v14 }
 0x3d6   : > { %3252 = vperm.xlu2 %5302, %v7783_v23   ;;  %v2905_v25 = vpop.xlane.xlu0 %2904  ;;  %5546 = vpow2.f32 %v2164_v31  ;;  %v9032_v31 = vld [vmem:[#allocation157_spill] sm:$0xff] }
 0x3d7   : > { %v8076_v45 = vpop.eup %5542  ;;  %v2931_v33 = vpop.xlane.xlu1 %2930  ;;  %v3002_v18 = vadd.f32 %v2905_v25, %v2810_v27  ;;  %v2731_v25 = vld [vmem:[#allocation3 + $0x78] sm:$0xff]  ;;  %5548 = vpow2.f32 %v2202_v22 }
 0x3d8   : > { %v8080_v37 = vpop.eup %5544  ;;  %3322 = vperm.xlu0 %5303, %v8076_v45   ;;  %v3015_v20 = vadd.f32 %v2931_v33, %v2823_v4  ;;  %v9033_v33 = vld [vmem:[#allocation154_spill] sm:$0xff] }
 0x3d9   : > { %v2867_v15 = vpop.xlane.xlu2 %2866  ;;  %3067 = vst.msk [vmem:[#allocation3 + $0xf0] sm:$0xff] %vm463_vm2, %v3002_v18  ;;  %v2839_v27 = vmul.f32 %v8080_v37, %v2775_v3  ;;  %v2073_v14 = vsub.f32 %v9033_v33, %v9032_v31  ;;  %v2808_v18 = vmul.f32 %v5537_v35, %v2744_v8 }
 0x3da   : > { %v2983_v23 = vadd.f32 %v2867_v15, %v2791_v41  ;;  %v9030_v41 = vld [vmem:[#allocation150_spill] sm:$0xff]  ;;  %3080 = vst.msk [vmem:[#allocation3 + $0x158] sm:$0xff] %vm463_vm2, %v3015_v20 }
 0x3db   : > { %v2041_v15 = vsub.f32 %v9031_v13, %v9030_v41  ;;  %v2795_v41 = vmul.f32 %v5535_v58, %v2731_v25 }
 0x3dc   : > { %3048 = vst.msk [vmem:[#allocation3 + $0x58] sm:$0xff] %vm463_vm2, %v2983_v23  ;;  %v8092_v23 = vpop.f32.mrf.mxu1  ;;  %v8100_v0 = vpop.eup %5546 }
 0x3dd   : > { %3272 = vperm.xlu1 %5301, %v7810_v5   ;;  %v8105_v5 = vpop.eup %5548  ;;  %v2824_v35 = vmul.f32 %v8100_v0, %v2760_v60  ;;  %v8111_v25 = vpop.f32.mrf.mxu0 }
 0x3de   : > { %3267 = vperm.xlu2 %5302, %v7862_v24   ;;  %v2134_v24 = vmul.f32 1.442695, %v2041_v15  ;;  %v2875_v13 = vpop.xlane.xlu0 %2874  ;;  %v2198_v15 = vmul.f32 1.442695, %v2073_v14 }
 0x3df   : > { %v2901_v20 = vpop.xlane.xlu1 %2900  ;;  %v2987_v3 = vadd.f32 %v2875_v13, %v2795_v41  ;;  %v2745_v13 = vld [vmem:[#allocation3 + $0xe8] sm:$0xff] }
 0x3e0   : > { %3337 = vperm.xlu0 %5303, %v7814_v6   ;;  %v3000_v22 = vadd.f32 %v2901_v20, %v2808_v18  ;;  %5550 = vpow2.f32 %v2134_v24 }
 0x3e1   : > { %v2963_v16 = vpop.xlane.xlu2 %2962  ;;  %3052 = vst.msk [vmem:[#allocation3 + $0x78] sm:$0xff] %vm463_vm2, %v2987_v3  ;;  %5552 = vpow2.f32 %v2198_v15  ;;  %v9036_v3 = vld [vmem:[#allocation162_spill] sm:$0xff] }
 0x3e2   : > { %v3031_v4 = vadd.f32 %v2963_v16, %v2839_v27  ;;  %3065 = vst.msk [vmem:[#allocation3 + $0xe0] sm:$0xff] %vm463_vm2, %v3000_v22  ;;  %v2779_v27 = vld [vmem:[#allocation3 + $0x1f8] sm:$0xff]  ;;  %v2729_v16 = vld [vmem:[#allocation3 + $0x68] sm:$0xff]  ;;  %v9037_v22 = vld [vmem:[#allocation159_spill] sm:$0xff] }
 0x3e3   : > { %v2843_v31 = vmul.f32 %v8105_v5, %v2779_v27  ;;  %v2793_v33 = vmul.f32 %v7947_v55, %v2729_v16  ;;  %v2074_v15 = vsub.f32 %v9037_v22, %v9036_v3  ;;  %v2777_v16 = vld [vmem:[#allocation3 + $0x1e8] sm:$0xff]  ;;  %v2762_v3 = vld [vmem:[#allocation3 + $0x170] sm:$0xff] }
 0x3e4   : > { %3096 = vst.msk [vmem:[#allocation3 + $0x1d8] sm:$0xff] %vm463_vm2, %v3031_v4  ;;  %v8107_v58 = vpop.f32.mrf.mxu1  ;;  %v9035_v4 = vld [vmem:[#allocation160_spill] sm:$0xff] }
 0x3e5   : > { %3287 = vperm.xlu1 %5301, %v7893_v53   ;;  %v8127_v27 = vpop.f32.mrf.mxu0 }
 0x3e6   : > { %3282 = vperm.xlu2 %5302, %v7951_v10   ;;  %v9034_v10 = vld [vmem:[#allocation163_spill] sm:$0xff]  ;;  %v2971_v14 = vpop.xlane.xlu0 %2970  ;;  %v5551_v60 = vpop.eup %5550 }
 0x3e7   : > { %v2058_v24 = vsub.f32 %v9035_v4, %v9034_v10  ;;  %v2871_v41 = vpop.xlane.xlu1 %2870  ;;  %v3035_v18 = vadd.f32 %v2971_v14, %v2843_v31  ;;  %v8125_v55 = vpop.eup %5552  ;;  %v2200_v10 = vmul.f32 1.442695, %v2074_v15  ;;  %v2730_v31 = vld [vmem:[#allocation3 + $0x70] sm:$0xff]  ;;  %v9038_v14 = vld [vmem:[#allocation169_spill] sm:$0xff] }
 0x3e8   : > { %3352 = vperm.xlu0 %5303, %v7897_v38   ;;  %v2985_v20 = vadd.f32 %v2871_v41, %v2793_v33  ;;  %v2841_v4 = vmul.f32 %v8125_v55, %v2777_v16  ;;  %v9039_v41 = vld [vmem:[#allocation166_spill] sm:$0xff] }
 0x3e9   : > { %v2933_v6 = vpop.xlane.xlu2 %2932  ;;  %v2168_v53 = vmul.f32 1.442695, %v2058_v24  ;;  %3100 = vst.msk [vmem:[#allocation3 + $0x1f8] sm:$0xff] %vm463_vm2, %v3035_v18  ;;  %v2059_v18 = vsub.f32 %v9039_v41, %v9038_v14 }
 0x3ea   : > { %v3016_v8 = vadd.f32 %v2933_v6, %v2824_v35  ;;  %3050 = vst.msk [vmem:[#allocation3 + $0x68] sm:$0xff] %vm463_vm2, %v2985_v20  ;;  %v2809_v35 = vmul.f32 %v5551_v60, %v2745_v13  ;;  %v2794_v13 = vmul.f32 %v8040_v46, %v2730_v31  ;;  %v3103_v46 = vld [vmem:[#allocation4 + $0x10] sm:$0xff] }
 0x3eb   : > { %5554 = vpow2.f32 %v2168_v53  ;;  %v2170_v15 = vmul.f32 1.442695, %v2059_v18 }
 0x3ec   : > { %3081 = vst.msk [vmem:[#allocation3 + $0x160] sm:$0xff] %vm463_vm2, %v3016_v8  ;;  %v8129_v38 = vpop.f32.mrf.mxu1  ;;  %5556 = vpow2.f32 %v2200_v10 }
 0x3ed   : > { %3302 = vperm.xlu1 %5301, %v7981_v47   ;;  %v8141_v53 = vpop.f32.mrf.mxu0  ;;  %5558 = vpow2.f32 %v2170_v15 }
 0x3ee   : > { %3297 = vperm.xlu2 %5302, %v8034_v54   ;;  %v8131_v54 = vpop.f32.mrf.mxu2 }
 0x3ef   : > { %v2967_v24 = vpop.xlane.xlu1 %2966 }
 0x3f0   : > { %3367 = vperm.xlu0 %5303, %v7984_v26   ;;  %v3033_v33 = vadd.f32 %v2967_v24, %v2841_v4  ;;  %v3178_v4 = vpop.permute.xlu0 %3177 }
 0x3f1   : > { %v2903_v6 = vpop.xlane.xlu2 %2902  ;;  %v5555_v20 = vpop.eup %5554 }
 0x3f2   : > { %v3001_v8 = vadd.f32 %v2903_v6, %v2809_v35  ;;  %3098 = vst.msk [vmem:[#allocation3 + $0x1e8] sm:$0xff] %vm463_vm2, %v3033_v33  ;;  %v8147_v35 = vpop.eup %5556  ;;  %v2747_v33 = vld [vmem:[#allocation3 + $0xf8] sm:$0xff] }
 0x3f3   : > { %v8161_v18 = vpop.eup %5558 }
 0x3f4   : > { %3066 = vst.msk [vmem:[#allocation3 + $0xe8] sm:$0xff] %vm463_vm2, %v3001_v8  ;;  %v8144_v26 = vpop.f32.mrf.mxu1  ;;  %v2778_v8 = vld [vmem:[#allocation3 + $0x1f0] sm:$0xff] }
 0x3f5   : > { %3317 = vperm.xlu1 %5301, %v8068_v51   ;;  %v3487_v51 = vmul.f32 %v3178_v4, %v3103_v46  ;;  %v2842_v24 = vmul.f32 %v8147_v35, %v2778_v8 }
 0x3f6   : > { %3312 = vperm.xlu2 %5302, %v5551_v60   ;;  %v2826_v60 = vmul.f32 %v5555_v20, %v2762_v3  ;;  %v8149_v6 = vpop.f32.mrf.mxu2  ;;  %v3105_v3 = vld [vmem:[#allocation4 + $0x20] sm:$0xff] }
 0x3f7   : > { %v2937_v16 = vpop.xlane.xlu1 %2936  ;;  %v3811_v14 = vadd.f32 %v7988_v30, %v3487_v51  ;;  %v3102_v51 = vld [vmem:[#allocation4 + $0x8] sm:$0xff] }
 0x3f8   : > { %3382 = vperm.xlu0 %5303, %v8072_v59   ;;  %v3018_v10 = vadd.f32 %v2937_v16, %v2826_v60 }
 0x3f9   : > { %v2873_v47 = vpop.xlane.xlu2 %2872  ;;  %3875 = vst.msk [vmem:[#allocation4 + $0x10] sm:$0xff] %vm592_vm0, %v3811_v14  ;;  %v3111_v14 = vld [vmem:[#allocation4 + $0x50] sm:$0xff] }
 0x3fa   : > { %v2986_v22 = vadd.f32 %v2873_v47, %v2794_v13  ;;  %3083 = vst.msk [vmem:[#allocation3 + $0x170] sm:$0xff] %vm463_vm2, %v3018_v10  ;;  %v3596_v13 = vpop.f32.mrf.mxu0 }
 0x3fc   : > { %3051 = vst.msk [vmem:[#allocation3 + $0x70] sm:$0xff] %vm463_vm2, %v2986_v22  ;;  %v8157_v59 = vpop.f32.mrf.mxu1  ;;  %v2763_v22 = vld [vmem:[#allocation3 + $0x178] sm:$0xff] }
 0x3fd   : > { %3332 = vperm.xlu1 %5301, %v7719_v32   ;;  %v3188_v32 = vpop.permute.xlu0 %3187 }
 0x3fe   : > { %3327 = vperm.xlu2 %5302, %v7762_v2   ;;  %v2811_v2 = vmul.f32 %v8076_v45, %v2747_v33  ;;  %v8165_v30 = vpop.f32.mrf.mxu2  ;;  %v3489_v60 = vmul.f32 %v3188_v32, %v3105_v3  ;;  %v2827_v45 = vmul.f32 %v8161_v18, %v2763_v22  ;;  %v3114_v32 = vld [vmem:[#allocation4 + $0x68] sm:$0xff] }
 0x3ff   : > { %v2907_v47 = vpop.xlane.xlu1 %2906 }
 0x400   : > { %3397 = vperm.xlu0 %5303, %v5555_v20   ;;  %v3003_v15 = vadd.f32 %v2907_v47, %v2811_v2  ;;  %v3813_v46 = vadd.f32 %v8042_v62, %v3489_v60  ;;  %v3106_v2 = vld [vmem:[#allocation4 + $0x28] sm:$0xff] }
 0x401   : > { %v2969_v31 = vpop.xlane.xlu2 %2968 }
 0x402   : > { %v3034_v41 = vadd.f32 %v2969_v31, %v2842_v24  ;;  %3068 = vst.msk [vmem:[#allocation3 + $0xf8] sm:$0xff] %vm463_vm2, %v3003_v15  ;;  %v8172_v20 = vpop.f32.mrf.mxu0 }
 0x403   : > { %3877 = vst.msk [vmem:[#allocation4 + $0x20] sm:$0xff] %vm592_vm0, %v3813_v46 }
 0x404   : > { %3099 = vst.msk [vmem:[#allocation3 + $0x1f0] sm:$0xff] %vm463_vm2, %v3034_v41  ;;  %v8176_v10 = vpop.f32.mrf.mxu1 }
 0x405   : > { %3347 = vperm.xlu1 %5301, %v7789_v52  }
 0x406   : > { %3342 = vperm.xlu2 %5302, %v7845_v61   ;;  %v3108_v61 = vld [vmem:[#allocation4 + $0x38] sm:$0xff]  ;;  %v3203_v4 = vpop.permute.xlu0 %3202  ;;  %v8179_v62 = vpop.f32.mrf.mxu2 }
 0x407   : > { %v3492_v24 = vmul.f32 %v3203_v4, %v3108_v61 }
 0x408   : > { %3412 = vperm.xlu0 %5303, %v7793_v44  }
 0x409   : > { %v2939_v16 = vpop.xlane.xlu2 %2938  ;;  %v3816_v52 = vadd.f32 %v8111_v25, %v3492_v24 }
 0x40a   : > { %v3019_v8 = vadd.f32 %v2939_v16, %v2827_v45  ;;  %v3109_v45 = vld [vmem:[#allocation4 + $0x40] sm:$0xff] }
 0x40b   : > { %3880 = vst.msk [vmem:[#allocation4 + $0x38] sm:$0xff] %vm592_vm0, %v3816_v52 }
 0x40c   : > { %3084 = vst.msk [vmem:[#allocation3 + $0x178] sm:$0xff] %vm463_vm2, %v3019_v8  ;;  %v8190_v47 = vpop.f32.mrf.mxu1 }
 0x40d   : > { %3362 = vperm.xlu1 %5301, %v7871_v7  }
 0x40e   : > { %3357 = vperm.xlu2 %5302, %v7929_v11   ;;  %v8188_v11 = vpop.f32.mrf.mxu0  ;;  %v8192_v15 = vpop.f32.mrf.mxu2 }
 0x410   : > { %3427 = vperm.xlu0 %5303, %v7875_v50   ;;  %v3101_v50 = vld [vmem:[#allocation4] sm:$0xff] }
 0x411   : > { %v3173_v31 = vpop.permute.xlu2 %3172  ;;  %v3218_v41 = vpop.permute.xlu0 %3217 }
 0x412   : > { %v3486_v33 = vmul.f32 %v3173_v31, %v3102_v51  ;;  %v3495_v25 = vmul.f32 %v3218_v41, %v3111_v14  ;;  %v4004_v31 = vld [vmem:[#allocation3] sm:$0xff]  ;;  %v8213_v41 = vpop.f32.mrf.mxu3 }
 0x413   : > { %vm4068_vm3 = vcmp.gt.f32.partialorder %v4004_v31, 0.0 }
 0x414   : > { %v3810_v44 = vadd.f32 %v7968_v17, %v3486_v33  ;;  %v3819_v7 = vadd.f32 %v3596_v13, %v3495_v25  ;;  %v8200_v16 = vpop.f32.mrf.mxu1 }
 0x415   : > { %3377 = vperm.xlu1 %5301, %v7958_v36  }
 0x416   : > { %3874 = vst.msk [vmem:[#allocation4 + $0x8] sm:$0xff] %vm592_vm0, %v3810_v44  ;;  %3372 = vperm.xlu2 %5302, %v8009_v40   ;;  %v3168_v40 = vpop.permute.xlu1 %3167  ;;  %v3605_v8 = vpop.f32.mrf.mxu0  ;;  %v3112_v44 = vld [vmem:[#allocation4 + $0x58] sm:$0xff] }
 0x417   : > { %3883 = vst.msk [vmem:[#allocation4 + $0x50] sm:$0xff] %vm592_vm0, %v3819_v7  ;;  %v3485_v60 = vmul.f32 %v3168_v40, %v3101_v50  ;;  %v8207_v51 = vpop.f32.mrf.mxu2  ;;  %v3120_v50 = vld [vmem:[#allocation4 + $0x98] sm:$0xff] }
 0x418   : > { %3442 = vperm.xlu0 %5303, %v7962_v39   ;;  %v3104_v39 = vld [vmem:[#allocation4 + $0x18] sm:$0xff] }
 0x419   : > { %v3193_v3 = vpop.permute.xlu2 %3192  ;;  %v3233_v13 = vpop.permute.xlu0 %3232  ;;  %v3809_v36 = vadd.f32 %v7943_v1, %v3485_v60  ;;  %v3117_v1 = vld [vmem:[#allocation4 + $0x80] sm:$0xff] }
 0x41a   : > { %v3490_v22 = vmul.f32 %v3193_v3, %v3106_v2  ;;  %v3498_v46 = vmul.f32 %v3233_v13, %v3114_v32  ;;  %v3107_v3 = vld [vmem:[#allocation4 + $0x30] sm:$0xff] }
 0x41b   : > { %3873 = vst.msk [vmem:[#allocation4] sm:$0xff] %vm592_vm0, %v3809_v36 }
 0x41c   : > { %v3814_v17 = vadd.f32 %v8065_v28, %v3490_v22  ;;  %v3822_v28 = vadd.f32 %v3605_v8, %v3498_v46  ;;  %v8215_v2 = vpop.f32.mrf.mxu1  ;;  %v3110_v46 = vld [vmem:[#allocation4 + $0x48] sm:$0xff] }
 0x41d   : > { %3392 = vperm.xlu1 %5301, %v8048_v43  }
 0x41e   : > { %3878 = vst.msk [vmem:[#allocation4 + $0x28] sm:$0xff] %vm592_vm0, %v3814_v17  ;;  %3387 = vperm.xlu2 %5302, %v8100_v0   ;;  %v3183_v24 = vpop.permute.xlu1 %3182  ;;  %v4007_v17 = vld [vmem:[#allocation3 + $0x18] sm:$0xff]  ;;  %v3608_v36 = vpop.f32.mrf.mxu0 }
 0x41f   : > { %3886 = vst.msk [vmem:[#allocation4 + $0x68] sm:$0xff] %vm592_vm0, %v3822_v28  ;;  %v3488_v52 = vmul.f32 %v3183_v24, %v3104_v39  ;;  %v8222_v7 = vpop.f32.mrf.mxu2  ;;  %vm4071_vm4 = vcmp.gt.f32.partialorder %v4007_v17, 0.0  ;;  %v4010_v39 = vld [vmem:[#allocation3 + $0x30] sm:$0xff]  ;;  %v3118_v24 = vld [vmem:[#allocation4 + $0x88] sm:$0xff] }
 0x420   : > { %3457 = vperm.xlu0 %5303, %v8052_v56   ;;  %vm4074_vm5 = vcmp.gt.f32.partialorder %v4010_v39, 0.0 }
 0x421   : > { %v3208_v61 = vpop.permute.xlu2 %3207  ;;  %v3248_v33 = vpop.permute.xlu0 %3247  ;;  %v3812_v43 = vadd.f32 %v8018_v42, %v3488_v52 }
 0x422   : > { %v3493_v4 = vmul.f32 %v3208_v61, %v3109_v45  ;;  %v3501_v14 = vmul.f32 %v3248_v33, %v3117_v1 }
 0x423   : > { %3876 = vst.msk [vmem:[#allocation4 + $0x18] sm:$0xff] %vm592_vm0, %v3812_v43 }
 0x424   : > { %v3817_v0 = vadd.f32 %v8127_v27, %v3493_v4  ;;  %v3825_v56 = vadd.f32 %v8013_v57, %v3501_v14  ;;  %v3115_v57 = vld [vmem:[#allocation4 + $0x70] sm:$0xff]  ;;  %v8233_v61 = vpop.f32.mrf.mxu1  ;;  %v4138_v14 = vsel %vm4074_vm5, %v4010_v39, 1.0 }
 0x425   : > { %3407 = vperm.xlu1 %5301, %v7708_v9   ;;  %v3123_v4 = vld [vmem:[#allocation4 + $0xb0] sm:$0xff] }
 0x426   : > { %3881 = vst.msk [vmem:[#allocation4 + $0x40] sm:$0xff] %vm592_vm0, %v3817_v0  ;;  %3402 = vperm.xlu2 %5302, %v8161_v18   ;;  %v4132_v18 = vsel %vm4068_vm3, %v4004_v31, 1.0  ;;  %v3198_v22 = vpop.permute.xlu1 %3197 }
 0x427   : > { %3889 = vst.msk [vmem:[#allocation4 + $0x80] sm:$0xff] %vm592_vm0, %v3825_v56  ;;  %v3491_v40 = vmul.f32 %v3198_v22, %v3107_v3  ;;  %5560 = vrcp.f32 %v4132_v18  ;;  %v3126_v3 = vld [vmem:[#allocation4 + $0xc8] sm:$0xff] }
 0x428   : > { %3472 = vperm.xlu0 %5303, %v8125_v55   ;;  %v4013_v18 = vld [vmem:[#allocation3 + $0x48] sm:$0xff] }
 0x429   : > { %v3223_v27 = vpop.permute.xlu2 %3222  ;;  %v3263_v9 = vpop.permute.xlu0 %3262  ;;  %v3815_v32 = vadd.f32 %v8089_v63, %v3491_v40  ;;  %vm4077_vm6 = vcmp.gt.f32.partialorder %v4013_v18, 0.0 }
 0x42a   : > { %v3496_v25 = vmul.f32 %v3223_v27, %v3112_v44  ;;  %v3504_v60 = vmul.f32 %v3263_v9, %v3120_v50 }
 0x42b   : > { %3879 = vst.msk [vmem:[#allocation4 + $0x30] sm:$0xff] %vm592_vm0, %v3815_v32  ;;  %v4141_v32 = vsel %vm4077_vm6, %v4013_v18, 1.0  ;;  %v9041_v18 = vld [vmem:[#allocation5_spill] sm:$0xff] }
 0x42c   : > { %v3820_v42 = vadd.f32 %v8172_v20, %v3496_v25  ;;  %v8228_v20 = vpop.f32.mrf.mxu3  ;;  %v3828_v55 = vadd.f32 %v8092_v23, %v3504_v60  ;;  %v8238_v23 = vpop.f32.mrf.mxu2 }
 0x42d   : > { %3422 = vperm.xlu1 %5301, %v7768_v19   ;;  %v5561_v8 = vpop.eup %5560  ;;  %v8246_v56 = vpop.f32.mrf.mxu1 }
 0x42e   : > { %3884 = vst.msk [vmem:[#allocation4 + $0x58] sm:$0xff] %vm592_vm0, %v3820_v42  ;;  %3417 = vperm.xlu2 %5302, %v7804_v34   ;;  %v4135_v34 = vsel %vm4071_vm4, %v4007_v17, 1.0  ;;  %v3213_v28 = vpop.permute.xlu1 %3212 }
 0x42f   : > { %3892 = vst.msk [vmem:[#allocation4 + $0x98] sm:$0xff] %vm592_vm0, %v3828_v55  ;;  %v3494_v0 = vmul.f32 %v3213_v28, %v3110_v46  ;;  %5562 = vrcp.f32 %v4135_v34  ;;  %v3129_v55 = vld [vmem:[#allocation4 + $0xe0] sm:$0xff]  ;;  %v3611_v46 = vpop.f32.mrf.mxu0 }
 0x430   : > { %4326 = vperm.xlu0 %5303, %v5561_v8   ;;  %5564 = vrcp.f32 %v4138_v14  ;;  %v3124_v8 = vld [vmem:[#allocation4 + $0xb8] sm:$0xff] }
 0x431   : > { %v3238_v13 = vpop.permute.xlu2 %3237  ;;  %v3278_v19 = vpop.permute.xlu0 %3277  ;;  %v3818_v1 = vadd.f32 %v8141_v53, %v3494_v0  ;;  %5566 = vrcp.f32 %v4141_v32  ;;  %v3132_v14 = vld [vmem:[#allocation4 + $0xf8] sm:$0xff] }
 0x432   : > { %v3499_v45 = vmul.f32 %v3238_v13, %v3115_v57  ;;  %v3507_v31 = vmul.f32 %v3278_v19, %v3123_v4  ;;  %v9040_v19 = vld [vmem:[#allocation11_spill] sm:$0xff] }
 0x433   : > { %3882 = vst.msk [vmem:[#allocation4 + $0x48] sm:$0xff] %vm592_vm0, %v3818_v1  ;;  %v4006_v1 = vld [vmem:[#allocation3 + $0x10] sm:$0xff] }
 0x434   : > { %v3823_v63 = vadd.f32 %v3608_v36, %v3499_v45  ;;  %v8241_v52 = vpop.f32.mrf.mxu3  ;;  %v3831_v44 = vadd.f32 %v8144_v26, %v3507_v31  ;;  %v3121_v26 = vld [vmem:[#allocation4 + $0xa0] sm:$0xff]  ;;  %v8253_v17 = vpop.f32.mrf.mxu2  ;;  %vm4070_vm9 = vcmp.gt.f32.partialorder %v4006_v1, 0.0 }
 0x435   : > { %3437 = vperm.xlu1 %5301, %v7851_v48   ;;  %v5563_v27 = vpop.eup %5562  ;;  %v4016_v45 = vld [vmem:[#allocation3 + $0x60] sm:$0xff]  ;;  %v8262_v36 = vpop.f32.mrf.mxu1 }
 0x436   : > { %3887 = vst.msk [vmem:[#allocation4 + $0x70] sm:$0xff] %vm592_vm0, %v3823_v63  ;;  %3432 = vperm.xlu2 %5302, %v7906_v49   ;;  %v3113_v49 = vld [vmem:[#allocation4 + $0x60] sm:$0xff]  ;;  %v3228_v25 = vpop.permute.xlu1 %3227  ;;  %v5565_v60 = vpop.eup %5564  ;;  %vm4080_vm7 = vcmp.gt.f32.partialorder %v4016_v45, 0.0 }
 0x437   : > { %3895 = vst.msk [vmem:[#allocation4 + $0xb0] sm:$0xff] %vm592_vm0, %v3831_v44  ;;  %v3497_v42 = vmul.f32 %v3228_v25, %v3113_v49  ;;  %v5567_v31 = vpop.eup %5566 }
 0x438   : > { %4341 = vperm.xlu0 %5303, %v5563_v27   ;;  %v4019_v27 = vld [vmem:[#allocation3 + $0x78] sm:$0xff] }
 0x439   : > { %v3253_v33 = vpop.permute.xlu2 %3252  ;;  %v3293_v48 = vpop.permute.xlu0 %3292  ;;  %v3821_v22 = vadd.f32 %v8188_v11, %v3497_v42  ;;  %vm4083_vm10 = vcmp.gt.f32.partialorder %v4019_v27, 0.0 }
 0x43a   : > { %v3502_v43 = vmul.f32 %v3253_v33, %v3118_v24  ;;  %v3510_v50 = vmul.f32 %v3293_v48, %v3126_v3  ;;  %v4144_v24 = vsel %vm4080_vm7, %v4016_v45, 1.0  ;;  %v3127_v3 = vld [vmem:[#allocation4 + $0xd0] sm:$0xff] }
 0x43b   : > { %3885 = vst.msk [vmem:[#allocation4 + $0x60] sm:$0xff] %vm592_vm0, %v3821_v22  ;;  %5568 = vrcp.f32 %v4144_v24  ;;  %v4134_v22 = vsel %vm4070_vm9, %v4006_v1, 1.0  ;;  %v4012_v1 = vld [vmem:[#allocation3 + $0x40] sm:$0xff] }
 0x43c   : > { %v3826_v53 = vadd.f32 %v8036_v29, %v3502_v43  ;;  %v3834_v29 = vadd.f32 %v8190_v47, %v3510_v50  ;;  %v8257_v57 = vpop.f32.mrf.mxu3  ;;  %vm4076_vm15 = vcmp.gt.f32.partialorder %v4012_v1, 0.0 }
 0x43d   : > { %3452 = vperm.xlu1 %5301, %v7935_v21   ;;  %v4005_v21 = vld [vmem:[#allocation3 + $0x8] sm:$0xff]  ;;  %v3676_v48 = vpop.f32.mrf.mxu1 }
 0x43e   : > { %3890 = vst.msk [vmem:[#allocation4 + $0x88] sm:$0xff] %vm592_vm0, %v3826_v53  ;;  %3447 = vperm.xlu2 %5302, %v7994_v12   ;;  %v3116_v12 = vld [vmem:[#allocation4 + $0x78] sm:$0xff]  ;;  %vm4069_vm8 = vcmp.gt.f32.partialorder %v4005_v21, 0.0  ;;  %v4008_v53 = vld [vmem:[#allocation3 + $0x20] sm:$0xff] }
 0x43f   : > { %3898 = vst.msk [vmem:[#allocation4 + $0xc8] sm:$0xff] %vm592_vm0, %v3834_v29  ;;  %v3243_v13 = vpop.permute.xlu1 %3242  ;;  %v4133_v44 = vsel %vm4069_vm8, %v4005_v21, 1.0  ;;  %vm4072_vm11 = vcmp.gt.f32.partialorder %v4008_v53, 0.0  ;;  %v4022_v21 = vld [vmem:[#allocation3 + $0x90] sm:$0xff] }
 0x440   : > { %4356 = vperm.xlu0 %5303, %v5565_v60   ;;  %v3500_v47 = vmul.f32 %v3243_v13, %v3116_v12  ;;  %5570 = vrcp.f32 %v4133_v44  ;;  %v4009_v12 = vld [vmem:[#allocation3 + $0x28] sm:$0xff]  ;;  %vm4086_vm13 = vcmp.gt.f32.partialorder %v4022_v21, 0.0 }
 0x441   : > { %v3268_v40 = vpop.permute.xlu2 %3267  ;;  %v3308_v34 = vpop.permute.xlu0 %3307  ;;  %5572 = vrcp.f32 %v4134_v22  ;;  %vm4073_vm12 = vcmp.gt.f32.partialorder %v4009_v12, 0.0  ;;  %v4150_v24 = vsel %vm4086_vm13, %v4022_v21, 1.0  ;;  %v4017_v21 = vld [vmem:[#allocation3 + $0x68] sm:$0xff] }
 0x442   : > { %v3505_v9 = vmul.f32 %v3268_v40, %v3121_v26  ;;  %v3824_v63 = vadd.f32 %v3611_v46, %v3500_v47  ;;  %v3513_v28 = vmul.f32 %v3308_v34, %v3129_v55  ;;  %v5569_v32 = vpop.eup %5568  ;;  %v3135_v47 = vld [vmem:[#allocation4 + $0x110] sm:$0xff]  ;;  %v4011_v46 = vld [vmem:[#allocation3 + $0x38] sm:$0xff]  ;;  %vm4081_vm5 = vcmp.gt.f32.partialorder %v4017_v21, 0.0 }
 0x443   : > { %vm4075_vm14 = vcmp.gt.f32.partialorder %v4011_v46, 0.0 }
 0x444   : > { %v3829_v11 = vadd.f32 %v8107_v58, %v3505_v9  ;;  %v8266_v58 = vpop.f32.mrf.mxu2  ;;  %3888 = vst.msk [vmem:[#allocation4 + $0x78] sm:$0xff] %vm592_vm0, %v3824_v63  ;;  %v3837_v39 = vadd.f32 %v8233_v61, %v3513_v28  ;;  %v8273_v43 = vpop.f32.mrf.mxu3  ;;  %v4147_v9 = vsel %vm4083_vm10, %v4019_v27, 1.0  ;;  %v3138_v27 = vld [vmem:[#allocation4 + $0x128] sm:$0xff] }
 0x445   : > { %3467 = vperm.xlu1 %5301, %v9040_v19   ;;  %5574 = vrcp.f32 %v4147_v9  ;;  %v4015_v9 = vld [vmem:[#allocation3 + $0x58] sm:$0xff] }
 0x446   : > { %3893 = vst.msk [vmem:[#allocation4 + $0xa0] sm:$0xff] %vm592_vm0, %v3829_v11  ;;  %3462 = vperm.xlu2 %5302, %v8080_v37   ;;  %v3119_v37 = vld [vmem:[#allocation4 + $0x90] sm:$0xff]  ;;  %v4136_v11 = vsel %vm4072_vm11, %v4008_v53, 1.0  ;;  %v5571_v13 = vpop.eup %5570  ;;  %vm4079_vm3 = vcmp.gt.f32.partialorder %v4015_v9, 0.0 }
 0x447   : > { %3901 = vst.msk [vmem:[#allocation4 + $0xe0] sm:$0xff] %vm592_vm0, %v3837_v39  ;;  %v3258_v49 = vpop.permute.xlu1 %3257  ;;  %5576 = vrcp.f32 %v4136_v11  ;;  %v5573_v39 = vpop.eup %5572  ;;  %v4014_v53 = vld [vmem:[#allocation3 + $0x50] sm:$0xff] }
 0x448   : > { %4371 = vperm.xlu0 %5303, %v5567_v31   ;;  %v3503_v61 = vmul.f32 %v3258_v49, %v3119_v37  ;;  %v3125_v37 = vld [vmem:[#allocation4 + $0xc0] sm:$0xff]  ;;  %vm4078_vm2 = vcmp.gt.f32.partialorder %v4014_v53, 0.0 }
 0x449   : > { %v3283_v4 = vpop.permute.xlu2 %3282 }
 0x44a   : > { %v3508_v0 = vmul.f32 %v3283_v4, %v3124_v8  ;;  %v3323_v25 = vpop.permute.xlu0 %3322  ;;  %v3130_v8 = vld [vmem:[#allocation4 + $0xe8] sm:$0xff]  ;;  %v4137_v4 = vsel %vm4073_vm12, %v4009_v12, 1.0 }
 0x44b   : > { %v3516_v42 = vmul.f32 %v3323_v25, %v3132_v14  ;;  %v5575_v31 = vpop.eup %5574  ;;  %5578 = vrcp.f32 %v4137_v4 }
 0x44c   : > { %v3832_v33 = vadd.f32 %v8157_v59, %v3508_v0  ;;  %v3827_v59 = vadd.f32 %v9041_v18, %v3503_v61  ;;  %v8279_v29 = vpop.f32.mrf.mxu2  ;;  %v8284_v55 = vpop.f32.mrf.mxu3  ;;  %v4025_v61 = vld [vmem:[#allocation3 + $0xa8] sm:$0xff]  ;;  %5580 = vrcp.f32 %v4150_v24 }
 0x44d   : > { %v3840_v50 = vadd.f32 %v3676_v48, %v3516_v42  ;;  %3482 = vperm.xlu1 %5301, %v8105_v5   ;;  %v5577_v44 = vpop.eup %5576  ;;  %vm4089_vm1 = vcmp.gt.f32.partialorder %v4025_v61, 0.0  ;;  %v4140_v48 = vsel %vm4076_vm15, %v4012_v1, 1.0  ;;  %v4145_v1 = vsel %vm4081_vm5, %v4017_v21, 1.0 }
 0x44e   : > { %3896 = vst.msk [vmem:[#allocation4 + $0xb8] sm:$0xff] %vm592_vm0, %v3832_v33  ;;  %3477 = vperm.xlu2 %5302, %v8147_v35   ;;  %v3122_v35 = vld [vmem:[#allocation4 + $0xa8] sm:$0xff]  ;;  %v4139_v33 = vsel %vm4075_vm14, %v4011_v46, 1.0  ;;  %v3136_v46 = vld [vmem:[#allocation4 + $0x118] sm:$0xff] }
 0x44f   : > { %3891 = vst.msk [vmem:[#allocation4 + $0x90] sm:$0xff] %vm592_vm0, %v3827_v59  ;;  %v3273_v45 = vpop.permute.xlu1 %3272  ;;  %5582 = vrcp.f32 %v4139_v33  ;;  %v3144_v33 = vld [vmem:[#allocation4 + $0x158] sm:$0xff] }
 0x450   : > { %3904 = vst.msk [vmem:[#allocation4 + $0xf8] sm:$0xff] %vm592_vm0, %v3840_v50  ;;  %4386 = vperm.xlu0 %5303, %v5569_v32   ;;  %v3506_v5 = vmul.f32 %v3273_v45, %v3122_v35  ;;  %v4153_v35 = vsel %vm4089_vm1, %v4025_v61, 1.0  ;;  %5584 = vrcp.f32 %v4140_v48  ;;  %v4142_v32 = vsel %vm4078_vm2, %v4014_v53, 1.0  ;;  %v3141_v45 = vld [vmem:[#allocation4 + $0x140] sm:$0xff] }
 0x451   : > { %v3298_v26 = vpop.permute.xlu2 %3297  ;;  %5586 = vrcp.f32 %v4153_v35 }
 0x452   : > { %v3511_v40 = vmul.f32 %v3298_v26, %v3127_v3  ;;  %v3338_v34 = vpop.permute.xlu0 %3337  ;;  %v5579_v26 = vpop.eup %5578  ;;  %5588 = vrcp.f32 %v4142_v32  ;;  %v4034_v32 = vld [vmem:[#allocation3 + $0xf0] sm:$0xff] }
 0x453   : > { %v3519_v63 = vmul.f32 %v3338_v34, %v3135_v47  ;;  %v5581_v12 = vpop.eup %5580  ;;  %v4028_v47 = vld [vmem:[#allocation3 + $0xc0] sm:$0xff]  ;;  %vm4098_vm10 = vcmp.gt.f32.partialorder %v4034_v32, 0.0 }
 0x454   : > { %v3835_v60 = vadd.f32 %v8200_v16, %v3511_v40  ;;  %v3830_v16 = vadd.f32 %v8129_v38, %v3506_v5  ;;  %v8292_v49 = vpop.f32.mrf.mxu2  ;;  %v8295_v25 = vpop.f32.mrf.mxu3  ;;  %v3128_v40 = vld [vmem:[#allocation4 + $0xd8] sm:$0xff]  ;;  %vm4092_vm4 = vcmp.gt.f32.partialorder %v4028_v47, 0.0 }
 0x455   : > { %v3843_v0 = vadd.f32 %v8165_v30, %v3519_v63  ;;  %4336 = vperm.xlu1 %5301, %v5573_v39   ;;  %v4143_v63 = vsel %vm4079_vm3, %v4015_v9, 1.0 }
 0x456   : > { %3899 = vst.msk [vmem:[#allocation4 + $0xd0] sm:$0xff] %vm592_vm0, %v3835_v60  ;;  %4331 = vperm.xlu2 %5302, %v5571_v13   ;;  %v5583_v60 = vpop.eup %5582  ;;  %5590 = vrcp.f32 %v4143_v63  ;;  %v3137_v63 = vld [vmem:[#allocation4 + $0x120] sm:$0xff] }
 0x457   : > { %3894 = vst.msk [vmem:[#allocation4 + $0xa8] sm:$0xff] %vm592_vm0, %v3830_v16  ;;  %v3288_v14 = vpop.permute.xlu1 %3287 }
 0x458   : > { %3907 = vst.msk [vmem:[#allocation4 + $0x110] sm:$0xff] %vm592_vm0, %v3843_v0  ;;  %4401 = vperm.xlu0 %5303, %v5575_v31   ;;  %v3509_v30 = vmul.f32 %v3288_v14, %v3125_v37  ;;  %v3131_v0 = vld [vmem:[#allocation4 + $0xf0] sm:$0xff]  ;;  %v4020_v14 = vld [vmem:[#allocation3 + $0x80] sm:$0xff] }
 0x459   : > { %v3313_v28 = vpop.permute.xlu2 %3312  ;;  %v4018_v37 = vld [vmem:[#allocation3 + $0x70] sm:$0xff]  ;;  %vm4084_vm8 = vcmp.gt.f32.partialorder %v4020_v14, 0.0 }
 0x45a   : > { %v3514_v19 = vmul.f32 %v3313_v28, %v3130_v8  ;;  %v3353_v3 = vpop.permute.xlu0 %3352  ;;  %v3833_v18 = vadd.f32 %v8176_v10, %v3509_v30  ;;  %v5585_v28 = vpop.eup %5584  ;;  %vm4082_vm6 = vcmp.gt.f32.partialorder %v4018_v37, 0.0  ;;  %v3139_v30 = vld [vmem:[#allocation4 + $0x130] sm:$0xff]  ;;  %v4148_v35 = vsel %vm4084_vm8, %v4020_v14, 1.0 }
 0x45b   : > { %v3522_v59 = vmul.f32 %v3353_v3, %v3138_v27  ;;  %v5587_v24 = vpop.eup %5586 }
 0x45c   : > { %v3838_v38 = vadd.f32 %v8246_v56, %v3514_v19  ;;  %v3133_v56 = vld [vmem:[#allocation4 + $0x100] sm:$0xff]  ;;  %3897 = vst.msk [vmem:[#allocation4 + $0xc0] sm:$0xff] %vm592_vm0, %v3833_v18  ;;  %v8302_v11 = vpop.f32.mrf.mxu2  ;;  %v8306_v8 = vpop.f32.mrf.mxu3  ;;  %v4156_v19 = vsel %vm4092_vm4, %v4028_v47, 1.0  ;;  %v4146_v18 = vsel %vm4082_vm6, %v4018_v37, 1.0 }
 0x45d   : > { %v3846_v22 = vadd.f32 %v8207_v51, %v3522_v59  ;;  %4351 = vperm.xlu1 %5301, %v5579_v26   ;;  %v5589_v31 = vpop.eup %5588  ;;  %5592 = vrcp.f32 %v4156_v19  ;;  %v3134_v26 = vld [vmem:[#allocation4 + $0x108] sm:$0xff] }
 0x45e   : > { %3902 = vst.msk [vmem:[#allocation4 + $0xe8] sm:$0xff] %vm592_vm0, %v3838_v38  ;;  %4346 = vperm.xlu2 %5302, %v5577_v44   ;;  %v4031_v44 = vld [vmem:[#allocation3 + $0xd8] sm:$0xff]  ;;  %5594 = vrcp.f32 %v4145_v1  ;;  %v5591_v59 = vpop.eup %5590 }
 0x45f   : > { %3910 = vst.msk [vmem:[#allocation4 + $0x128] sm:$0xff] %vm592_vm0, %v3846_v22  ;;  %v3303_v13 = vpop.permute.xlu1 %3302  ;;  %vm4095_vm7 = vcmp.gt.f32.partialorder %v4031_v44, 0.0  ;;  %5596 = vrcp.f32 %v4146_v18  ;;  %v4027_v18 = vld [vmem:[#allocation3 + $0xb8] sm:$0xff] }
 0x460   : > { %4416 = vperm.xlu0 %5303, %v5581_v12   ;;  %v3512_v51 = vmul.f32 %v3303_v13, %v3128_v40  ;;  %v4159_v22 = vsel %vm4095_vm7, %v4031_v44, 1.0  ;;  %vm4091_vm15 = vcmp.gt.f32.partialorder %v4027_v18, 0.0 }
 0x461   : > { %v3328_v42 = vpop.permute.xlu2 %3327  ;;  %5598 = vrcp.f32 %v4159_v22 }
 0x462   : > { %v3517_v50 = vmul.f32 %v3328_v42, %v3133_v56  ;;  %v3368_v5 = vpop.permute.xlu0 %3367  ;;  %5600 = vrcp.f32 %v4148_v35 }
 0x463   : > { %v3525_v34 = vmul.f32 %v3368_v5, %v3141_v45  ;;  %v5593_v40 = vpop.eup %5592  ;;  %v3142_v45 = vld [vmem:[#allocation4 + $0x148] sm:$0xff] }
 0x464   : > { %v3841_v10 = vadd.f32 %v8131_v54, %v3517_v50  ;;  %v3836_v54 = vadd.f32 %v8215_v2, %v3512_v51  ;;  %v8313_v27 = vpop.f32.mrf.mxu2  ;;  %v8316_v3 = vpop.f32.mrf.mxu3  ;;  %v4021_v50 = vld [vmem:[#allocation3 + $0x88] sm:$0xff] }
 0x465   : > { %v3849_v4 = vadd.f32 %v8253_v17, %v3525_v34  ;;  %4366 = vperm.xlu1 %5301, %v5585_v28   ;;  %v5595_v9 = vpop.eup %5594  ;;  %vm4085_vm9 = vcmp.gt.f32.partialorder %v4021_v50, 0.0  ;;  %v4162_v28 = vsel %vm4098_vm10, %v4034_v32, 1.0  ;;  %v4155_v32 = vsel %vm4091_vm15, %v4027_v18, 1.0 }
 0x466   : > { %3905 = vst.msk [vmem:[#allocation4 + $0x100] sm:$0xff] %vm592_vm0, %v3841_v10  ;;  %4361 = vperm.xlu2 %5302, %v5583_v60   ;;  %v3147_v10 = vld [vmem:[#allocation4 + $0x170] sm:$0xff]  ;;  %v4023_v60 = vld [vmem:[#allocation3 + $0x98] sm:$0xff]  ;;  %v4149_v5 = vsel %vm4085_vm9, %v4021_v50, 1.0  ;;  %v3153_v50 = vld [vmem:[#allocation4 + $0x1a0] sm:$0xff] }
 0x467   : > { %3900 = vst.msk [vmem:[#allocation4 + $0xd8] sm:$0xff] %vm592_vm0, %v3836_v54  ;;  %v3318_v38 = vpop.permute.xlu1 %3317  ;;  %vm4087_vm11 = vcmp.gt.f32.partialorder %v4023_v60, 0.0  ;;  %5602 = vrcp.f32 %v4149_v5 }
 0x468   : > { %3913 = vst.msk [vmem:[#allocation4 + $0x140] sm:$0xff] %vm592_vm0, %v3849_v4  ;;  %4431 = vperm.xlu0 %5303, %v5587_v24   ;;  %v3515_v17 = vmul.f32 %v3318_v38, %v3131_v0  ;;  %v4024_v4 = vld [vmem:[#allocation3 + $0xa0] sm:$0xff]  ;;  %v4151_v0 = vsel %vm4087_vm11, %v4023_v60, 1.0  ;;  %v3150_v24 = vld [vmem:[#allocation4 + $0x188] sm:$0xff]  ;;  %5604 = vrcp.f32 %v4162_v28  ;;  %v4043_v28 = vld [vmem:[#allocation3 + $0x138] sm:$0xff] }
 0x469   : > { %v3343_v16 = vpop.permute.xlu2 %3342  ;;  %vm4088_vm12 = vcmp.gt.f32.partialorder %v4024_v4, 0.0  ;;  %5606 = vrcp.f32 %v4151_v0  ;;  %vm4107_vm4 = vcmp.gt.f32.partialorder %v4043_v28, 0.0 }
 0x46a   : > { %v3520_v39 = vmul.f32 %v3343_v16, %v3136_v46  ;;  %v3383_v61 = vpop.permute.xlu0 %3382  ;;  %v5597_v46 = vpop.eup %5596  ;;  %v4152_v14 = vsel %vm4088_vm12, %v4024_v4, 1.0  ;;  %v4032_v4 = vld [vmem:[#allocation3 + $0xe0] sm:$0xff] }
 0x46b   : > { %v3528_v53 = vmul.f32 %v3383_v61, %v3144_v33  ;;  %v3145_v33 = vld [vmem:[#allocation4 + $0x160] sm:$0xff]  ;;  %5608 = vrcp.f32 %v4152_v14  ;;  %vm4096_vm5 = vcmp.gt.f32.partialorder %v4032_v4, 0.0 }
 0x46c   : > { %v3844_v2 = vadd.f32 %v8179_v62, %v3520_v39  ;;  %v3839_v62 = vadd.f32 %v8262_v36, %v3515_v17  ;;  %v3738_v51 = vpop.f32.mrf.mxu2  ;;  %v8325_v16 = vpop.f32.mrf.mxu3 }
 0x46d   : > { %v3852_v42 = vadd.f32 %v8292_v49, %v3528_v53  ;;  %4381 = vperm.xlu1 %5301, %v5591_v59   ;;  %v5599_v39 = vpop.eup %5598  ;;  %v3140_v53 = vld [vmem:[#allocation4 + $0x138] sm:$0xff] }
 0x46e   : > { %3908 = vst.msk [vmem:[#allocation4 + $0x118] sm:$0xff] %vm592_vm0, %v3844_v2  ;;  %4376 = vperm.xlu2 %5302, %v5589_v31   ;;  %v5601_v19 = vpop.eup %5600  ;;  %v4037_v2 = vld [vmem:[#allocation3 + $0x108] sm:$0xff]  ;;  %v4026_v31 = vld [vmem:[#allocation3 + $0xb0] sm:$0xff] }
 0x46f   : > { %3903 = vst.msk [vmem:[#allocation4 + $0xf0] sm:$0xff] %vm592_vm0, %v3839_v62  ;;  %v3333_v12 = vpop.permute.xlu1 %3332  ;;  %vm4101_vm13 = vcmp.gt.f32.partialorder %v4037_v2, 0.0  ;;  %vm4090_vm14 = vcmp.gt.f32.partialorder %v4026_v31, 0.0  ;;  %v5603_v61 = vpop.eup %5602 }
 0x470   : > { %3916 = vst.msk [vmem:[#allocation4 + $0x158] sm:$0xff] %vm592_vm0, %v3852_v42  ;;  %4446 = vperm.xlu0 %5303, %v5593_v40   ;;  %v3518_v49 = vmul.f32 %v3333_v12, %v3134_v26  ;;  %v5605_v59 = vpop.eup %5604  ;;  %v4154_v42 = vsel %vm4090_vm14, %v4026_v31, 1.0  ;;  %v4040_v40 = vld [vmem:[#allocation3 + $0x120] sm:$0xff] }
 0x471   : > { %v3358_v56 = vpop.permute.xlu2 %3357  ;;  %vm4104_vm1 = vcmp.gt.f32.partialorder %v4040_v40, 0.0 }
 0x472   : > { %v3523_v48 = vmul.f32 %v3358_v56, %v3139_v30  ;;  %v3398_v13 = vpop.permute.xlu0 %3397  ;;  %v3842_v47 = vadd.f32 %v8149_v6, %v3518_v49  ;;  %v4165_v56 = vsel %vm4101_vm13, %v4037_v2, 1.0 }
 0x473   : > { %5610 = vrcp.f32 %v4165_v56 }
 0x474   : > { %v3847_v36 = vadd.f32 %v8222_v7, %v3523_v48  ;;  %v3531_v7 = vmul.f32 %v3398_v13, %v3147_v10  ;;  %3906 = vst.msk [vmem:[#allocation4 + $0x108] sm:$0xff] %vm592_vm0, %v3842_v47  ;;  %v5607_v48 = vpop.eup %5606  ;;  %v8335_v26 = vpop.f32.mrf.mxu3  ;;  %5612 = vrcp.f32 %v4154_v42  ;;  %v3143_v47 = vld [vmem:[#allocation4 + $0x150] sm:$0xff] }
 0x475   : > { %4396 = vperm.xlu1 %5301, %v5597_v46   ;;  %v5609_v49 = vpop.eup %5608  ;;  %5614 = vrcp.f32 %v4155_v32  ;;  %v3162_v32 = vld [vmem:[#allocation4 + $0x1e8] sm:$0xff] }
 0x476   : > { %3911 = vst.msk [vmem:[#allocation4 + $0x130] sm:$0xff] %vm592_vm0, %v3847_v36  ;;  %4391 = vperm.xlu2 %5302, %v5595_v9   ;;  %v3855_v54 = vadd.f32 %v3738_v51, %v3531_v7  ;;  %v4029_v36 = vld [vmem:[#allocation3 + $0xc8] sm:$0xff]  ;;  %v3148_v9 = vld [vmem:[#allocation4 + $0x178] sm:$0xff]  ;;  %v4168_v7 = vsel %vm4104_vm1, %v4040_v40, 1.0  ;;  %v4030_v51 = vld [vmem:[#allocation3 + $0xd0] sm:$0xff] }
 0x477   : > { %v3348_v37 = vpop.permute.xlu1 %3347  ;;  %vm4093_vm2 = vcmp.gt.f32.partialorder %v4029_v36, 0.0  ;;  %5616 = vrcp.f32 %v4168_v7  ;;  %vm4094_vm3 = vcmp.gt.f32.partialorder %v4030_v51, 0.0 }
 0x478   : > { %3919 = vst.msk [vmem:[#allocation4 + $0x170] sm:$0xff] %vm592_vm0, %v3855_v54  ;;  %4461 = vperm.xlu0 %5303, %v5599_v39   ;;  %v3521_v1 = vmul.f32 %v3348_v37, %v3137_v63  ;;  %v4157_v5 = vsel %vm4093_vm2, %v4029_v36, 1.0  ;;  %v3156_v63 = vld [vmem:[#allocation4 + $0x1b8] sm:$0xff] }
 0x479   : > { %v3373_v21 = vpop.permute.xlu2 %3372  ;;  %5618 = vrcp.f32 %v4157_v5 }
 0x47a   : > { %v3526_v34 = vmul.f32 %v3373_v21, %v3142_v45  ;;  %v3413_v38 = vpop.permute.xlu0 %3412  ;;  %v3845_v44 = vadd.f32 %v8192_v15, %v3521_v1  ;;  %v3741_v45 = vpop.f32.mrf.mxu2 }
 0x47b   : > { %v5611_v21 = vpop.eup %5610 }
 0x47c   : > { %v3850_v6 = vadd.f32 %v8266_v58, %v3526_v34  ;;  %v3534_v58 = vmul.f32 %v3413_v38, %v3150_v24  ;;  %3909 = vst.msk [vmem:[#allocation4 + $0x120] sm:$0xff] %vm592_vm0, %v3845_v44  ;;  %v5613_v46 = vpop.eup %5612  ;;  %v8342_v54 = vpop.f32.mrf.mxu3  ;;  %v4158_v24 = vsel %vm4094_vm3, %v4030_v51, 1.0  ;;  %v3146_v38 = vld [vmem:[#allocation4 + $0x168] sm:$0xff] }
 0x47d   : > { %4411 = vperm.xlu1 %5301, %v5603_v61   ;;  %v5615_v2 = vpop.eup %5614  ;;  %v4033_v44 = vld [vmem:[#allocation3 + $0xe8] sm:$0xff]  ;;  %5620 = vrcp.f32 %v4158_v24  ;;  %v4260_v24 = vld [vmem:[#allocation4] sm:$0xff] }
 0x47e   : > { %3914 = vst.msk [vmem:[#allocation4 + $0x148] sm:$0xff] %vm592_vm0, %v3850_v6  ;;  %4406 = vperm.xlu2 %5302, %v5601_v19   ;;  %v3858_v30 = vadd.f32 %v8228_v20, %v3534_v58  ;;  %v3151_v6 = vld [vmem:[#allocation4 + $0x190] sm:$0xff]  ;;  %v5617_v58 = vpop.eup %5616  ;;  %vm4097_vm6 = vcmp.gt.f32.partialorder %v4033_v44, 0.0 }
 0x47f   : > { %v3363_v22 = vpop.permute.xlu1 %3362  ;;  %v5619_v14 = vpop.eup %5618 }
 0x480   : > { %3922 = vst.msk [vmem:[#allocation4 + $0x188] sm:$0xff] %vm592_vm0, %v3858_v30  ;;  %4476 = vperm.xlu0 %5303, %v5605_v59   ;;  %v3524_v20 = vmul.f32 %v3363_v22, %v3140_v53  ;;  %v3159_v30 = vld [vmem:[#allocation4 + $0x1d0] sm:$0xff]  ;;  %v4035_v53 = vld [vmem:[#allocation3 + $0xf8] sm:$0xff]  ;;  %v3154_v59 = vld [vmem:[#allocation4 + $0x1a8] sm:$0xff] }
 0x481   : > { %v3388_v17 = vpop.permute.xlu2 %3387  ;;  %vm4099_vm8 = vcmp.gt.f32.partialorder %v4035_v53, 0.0 }
 0x482   : > { %v3529_v62 = vmul.f32 %v3388_v17, %v3145_v33  ;;  %v3428_v35 = vpop.permute.xlu0 %3427  ;;  %v4171_v33 = vsel %vm4107_vm4, %v4043_v28, 1.0  ;;  %v4160_v17 = vsel %vm4096_vm5, %v4032_v4, 1.0  ;;  %v4039_v28 = vld [vmem:[#allocation3 + $0x118] sm:$0xff] }
 0x483   : > { %v3537_v12 = vmul.f32 %v3428_v35, %v3153_v50  ;;  %5622 = vrcp.f32 %v4171_v33  ;;  %v5621_v22 = vpop.eup %5620  ;;  %v4036_v35 = vld [vmem:[#allocation3 + $0x100] sm:$0xff]  ;;  %vm4103_vm12 = vcmp.gt.f32.partialorder %v4039_v28, 0.0 }
 0x484   : > { %v3853_v15 = vadd.f32 %v8302_v11, %v3529_v62  ;;  %v3848_v11 = vadd.f32 %v8238_v23, %v3524_v20  ;;  %v4046_v62 = vld [vmem:[#allocation3 + $0x150] sm:$0xff]  ;;  %v8351_v56 = vpop.f32.mrf.mxu3  ;;  %5624 = vrcp.f32 %v4160_v17  ;;  %v3149_v20 = vld [vmem:[#allocation4 + $0x180] sm:$0xff]  ;;  %vm4100_vm9 = vcmp.gt.f32.partialorder %v4036_v35, 0.0 }
 0x485   : > { %v3861_v60 = vadd.f32 %v8273_v43, %v3537_v12  ;;  %4426 = vperm.xlu1 %5301, %v5609_v49   ;;  %vm4110_vm7 = vcmp.gt.f32.partialorder %v4046_v62, 0.0  ;;  %v4049_v49 = vld [vmem:[#allocation3 + $0x168] sm:$0xff]  ;;  %v4167_v33 = vsel %vm4103_vm12, %v4039_v28, 1.0  ;;  %v4042_v17 = vld [vmem:[#allocation3 + $0x130] sm:$0xff] }
 0x486   : > { %3917 = vst.msk [vmem:[#allocation4 + $0x160] sm:$0xff] %vm592_vm0, %v3853_v15  ;;  %4421 = vperm.xlu2 %5302, %v5607_v48   ;;  %v4161_v48 = vsel %vm4097_vm6, %v4033_v44, 1.0  ;;  %v4174_v36 = vsel %vm4110_vm7, %v4046_v62, 1.0  ;;  %vm4113_vm10 = vcmp.gt.f32.partialorder %v4049_v49, 0.0  ;;  %vm4106_vm15 = vcmp.gt.f32.partialorder %v4042_v17, 0.0 }
 0x487   : > { %3912 = vst.msk [vmem:[#allocation4 + $0x138] sm:$0xff] %vm592_vm0, %v3848_v11  ;;  %v3378_v34 = vpop.permute.xlu1 %3377  ;;  %5626 = vrcp.f32 %v4161_v48  ;;  %v4163_v11 = vsel %vm4099_vm8, %v4035_v53, 1.0  ;;  %v4055_v53 = vld [vmem:[#allocation3 + $0x198] sm:$0xff] }
 0x488   : > { %3925 = vst.msk [vmem:[#allocation4 + $0x1a0] sm:$0xff] %vm592_vm0, %v3861_v60  ;;  %4491 = vperm.xlu0 %5303, %v5611_v21   ;;  %v3527_v43 = vmul.f32 %v3378_v34, %v3143_v47  ;;  %5628 = vrcp.f32 %v4174_v36  ;;  %v4038_v60 = vld [vmem:[#allocation3 + $0x110] sm:$0xff]  ;;  %v4164_v21 = vsel %vm4100_vm9, %v4036_v35, 1.0  ;;  %v3152_v34 = vld [vmem:[#allocation4 + $0x198] sm:$0xff]  ;;  %vm4119_vm1 = vcmp.gt.f32.partialorder %v4055_v53, 0.0  ;;  %v3158_v35 = vld [vmem:[#allocation4 + $0x1c8] sm:$0xff] }
 0x489   : > { %v3403_v10 = vpop.permute.xlu2 %3402  ;;  %5630 = vrcp.f32 %v4163_v11  ;;  %vm4102_vm11 = vcmp.gt.f32.partialorder %v4038_v60, 0.0 }
 0x48a   : > { %v3532_v13 = vmul.f32 %v3403_v10, %v3148_v9  ;;  %v3443_v39 = vpop.permute.xlu0 %3442  ;;  %v3851_v0 = vadd.f32 %v8279_v29, %v3527_v43  ;;  %v5623_v9 = vpop.eup %5622  ;;  %5632 = vrcp.f32 %v4164_v21  ;;  %v4166_v4 = vsel %vm4102_vm11, %v4038_v60, 1.0  ;;  %v4047_v60 = vld [vmem:[#allocation3 + $0x158] sm:$0xff] }
 0x48b   : > { %v3540_v19 = vmul.f32 %v3443_v39, %v3156_v63  ;;  %v5625_v12 = vpop.eup %5624  ;;  %v4177_v63 = vsel %vm4113_vm10, %v4049_v49, 1.0  ;;  %v4058_v49 = vld [vmem:[#allocation3 + $0x1b0] sm:$0xff]  ;;  %vm4111_vm5 = vcmp.gt.f32.partialorder %v4047_v60, 0.0 }
 0x48c   : > { %v3856_v23 = vadd.f32 %v3741_v45, %v3532_v13  ;;  %3915 = vst.msk [vmem:[#allocation4 + $0x150] sm:$0xff] %vm592_vm0, %v3851_v0  ;;  %v3157_v45 = vld [vmem:[#allocation4 + $0x1c0] sm:$0xff]  ;;  %v3800_v7 = vpop.f32.mrf.mxu3  ;;  %5634 = vrcp.f32 %v4177_v63  ;;  %vm4122_vm4 = vcmp.gt.f32.partialorder %v4058_v49, 0.0 }
 0x48d   : > { %v3864_v1 = vadd.f32 %v8306_v8, %v3540_v19  ;;  %4441 = vperm.xlu1 %5301, %v5615_v2   ;;  %v4052_v0 = vld [vmem:[#allocation3 + $0x180] sm:$0xff]  ;;  %5636 = vrcp.f32 %v4166_v4  ;;  %v4061_v4 = vld [vmem:[#allocation3 + $0x1c8] sm:$0xff] }
 0x48e   : > { %3920 = vst.msk [vmem:[#allocation4 + $0x178] sm:$0xff] %vm592_vm0, %v3856_v23  ;;  %4436 = vperm.xlu2 %5302, %v5613_v46   ;;  %v5627_v23 = vpop.eup %5626  ;;  %vm4116_vm13 = vcmp.gt.f32.partialorder %v4052_v0, 0.0  ;;  %5638 = vrcp.f32 %v4167_v33  ;;  %v4048_v63 = vld [vmem:[#allocation3 + $0x160] sm:$0xff]  ;;  %vm4125_vm7 = vcmp.gt.f32.partialorder %v4061_v4, 0.0  ;;  %v3164_v33 = vld [vmem:[#allocation4 + $0x1f8] sm:$0xff] }
 0x48f   : > { %3928 = vst.msk [vmem:[#allocation4 + $0x1b8] sm:$0xff] %vm592_vm0, %v3864_v1  ;;  %v3393_v61 = vpop.permute.xlu1 %3392  ;;  %v5629_v43 = vpop.eup %5628  ;;  %v3160_v1 = vld [vmem:[#allocation4 + $0x1d8] sm:$0xff]  ;;  %vm4112_vm6 = vcmp.gt.f32.partialorder %v4048_v63, 0.0 }
 0x490   : > { %4506 = vperm.xlu0 %5303, %v5617_v58   ;;  %v3530_v8 = vmul.f32 %v3393_v61, %v3146_v38  ;;  %v5631_v39 = vpop.eup %5630 }
 0x491   : > { %v3418_v37 = vpop.permute.xlu2 %3417  ;;  %v5633_v44 = vpop.eup %5632 }
 0x492   : > { %v3535_v31 = vmul.f32 %v3418_v37, %v3151_v6  ;;  %v3458_v18 = vpop.permute.xlu0 %3457  ;;  %v4041_v37 = vld [vmem:[#allocation3 + $0x128] sm:$0xff] }
 0x493   : > { %v3543_v15 = vmul.f32 %v3458_v18, %v3159_v30  ;;  %vm4105_vm14 = vcmp.gt.f32.partialorder %v4041_v37, 0.0 }
 0x494   : > { %v3859_v29 = vadd.f32 %v8241_v52, %v3535_v31  ;;  %v3854_v52 = vadd.f32 %v8313_v27, %v3530_v8  ;;  %v4169_v30 = vsel %vm4105_vm14, %v4041_v37, 1.0  ;;  %v3803_v36 = vpop.f32.mrf.mxu3 }
 0x495   : > { %v3867_v50 = vadd.f32 %v8335_v26, %v3543_v15  ;;  %4456 = vperm.xlu1 %5301, %v5621_v22  }
 0x496   : > { %3923 = vst.msk [vmem:[#allocation4 + $0x190] sm:$0xff] %vm592_vm0, %v3859_v29  ;;  %4451 = vperm.xlu2 %5302, %v5619_v14   ;;  %v3155_v29 = vld [vmem:[#allocation4 + $0x1b0] sm:$0xff]  ;;  %v5635_v14 = vpop.eup %5634 }
 0x497   : > { %3918 = vst.msk [vmem:[#allocation4 + $0x168] sm:$0xff] %vm592_vm0, %v3854_v52  ;;  %v3408_v10 = vpop.permute.xlu1 %3407  ;;  %v5637_v62 = vpop.eup %5636  ;;  %v4263_v52 = vld [vmem:[#allocation4 + $0x18] sm:$0xff] }
 0x498   : > { %3931 = vst.msk [vmem:[#allocation4 + $0x1d0] sm:$0xff] %vm592_vm0, %v3867_v50  ;;  %4521 = vperm.xlu0 %5303, %v5623_v9   ;;  %v3533_v26 = vmul.f32 %v3408_v10, %v3149_v20  ;;  %v4170_v50 = vsel %vm4106_vm15, %v4042_v17, 1.0  ;;  %v4183_v9 = vsel %vm4119_vm1, %v4055_v53, 1.0 }
 0x499   : > { %v3433_v42 = vpop.permute.xlu2 %3432 }
 0x49a   : > { %v3538_v40 = vmul.f32 %v3433_v42, %v3154_v59  ;;  %v3473_v13 = vpop.permute.xlu0 %3472  ;;  %v3857_v47 = vadd.f32 %v8213_v41, %v3533_v26  ;;  %v4044_v59 = vld [vmem:[#allocation3 + $0x140] sm:$0xff]  ;;  %v3163_v42 = vld [vmem:[#allocation4 + $0x1f0] sm:$0xff] }
 0x49b   : > { %vm4108_vm2 = vcmp.gt.f32.partialorder %v4044_v59, 0.0 }
 0x49c   : > { %v3862_v27 = vadd.f32 %v8284_v55, %v3538_v40  ;;  %v3546_v55 = vmul.f32 %v3473_v13, %v3162_v32  ;;  %3921 = vst.msk [vmem:[#allocation4 + $0x180] sm:$0xff] %vm592_vm0, %v3857_v47  ;;  %v5639_v40 = vpop.eup %5638  ;;  %v4266_v13 = vld [vmem:[#allocation4 + $0x30] sm:$0xff] }
 0x49d   : > { %4471 = vperm.xlu1 %5301, %v5627_v23  }
 0x49e   : > { %3926 = vst.msk [vmem:[#allocation4 + $0x1a8] sm:$0xff] %vm592_vm0, %v3862_v27  ;;  %4466 = vperm.xlu2 %5302, %v5625_v12   ;;  %v3870_v5 = vadd.f32 %v3800_v7, %v3546_v55  ;;  %v4045_v27 = vld [vmem:[#allocation3 + $0x148] sm:$0xff] }
 0x49f   : > { %v3423_v6 = vpop.permute.xlu1 %3422  ;;  %vm4109_vm3 = vcmp.gt.f32.partialorder %v4045_v27, 0.0  ;;  %v4261_v7 = vld [vmem:[#allocation4 + $0x8] sm:$0xff] }
 0x4a0   : > { %3934 = vst.msk [vmem:[#allocation4 + $0x1e8] sm:$0xff] %vm592_vm0, %v3870_v5  ;;  %4536 = vperm.xlu0 %5303, %v5629_v43   ;;  %v3536_v19 = vmul.f32 %v3423_v6, %v3152_v34  ;;  %v4173_v21 = vsel %vm4109_vm3, %v4045_v27, 1.0  ;;  %v4186_v34 = vsel %vm4122_vm4, %v4058_v49, 1.0  ;;  %v4050_v6 = vld [vmem:[#allocation3 + $0x170] sm:$0xff]  ;;  %v4067_v27 = vld [vmem:[#allocation3 + $0x1f8] sm:$0xff] }
 0x4a1   : > { %v3448_v51 = vpop.permute.xlu2 %3447  ;;  %vm4114_vm8 = vcmp.gt.f32.partialorder %v4050_v6, 0.0 }
 0x4a2   : > { %v3541_v46 = vmul.f32 %v3448_v51, %v3157_v45  ;;  %v4327_v2 = vpop.permute.xlu0 %4326 }
 0x4a3   : > { %v4644_v31 = vmul.f32 %v4327_v2, %v4260_v24 }
 0x4a4   : > { %v3865_v41 = vadd.f32 %v8316_v3, %v3541_v46  ;;  %v3860_v3 = vadd.f32 %v8257_v57, %v3536_v19  ;;  %v4180_v57 = vsel %vm4116_vm13, %v4052_v0, 1.0  ;;  %v3161_v46 = vld [vmem:[#allocation4 + $0x1e0] sm:$0xff]  ;;  %v4269_v0 = vld [vmem:[#allocation4 + $0x48] sm:$0xff]  ;;  %vm4131_vm13 = vcmp.gt.f32.partialorder %v4067_v27, 0.0 }
 0x4a5   : > { %4708 = vst.msk [vmem:[%s8369_s9] sm:$0xff] %vm592_vm0, %v4644_v31  ;;  %4486 = vperm.xlu1 %5301, %v5633_v44   ;;  %5640 = vrcp.f32 %v4180_v57  ;;  %v4189_v44 = vsel %vm4125_vm7, %v4061_v4, 1.0 }
 0x4a6   : > { %3929 = vst.msk [vmem:[#allocation4 + $0x1c0] sm:$0xff] %vm592_vm0, %v3865_v41  ;;  %4481 = vperm.xlu2 %5302, %v5631_v39   ;;  %5642 = vrcp.f32 %v4169_v30  ;;  %v4053_v30 = vld [vmem:[#allocation3 + $0x188] sm:$0xff] }
 0x4a7   : > { %3924 = vst.msk [vmem:[#allocation4 + $0x198] sm:$0xff] %vm592_vm0, %v3860_v3  ;;  %v3438_v8 = vpop.permute.xlu1 %3437  ;;  %5644 = vrcp.f32 %v4170_v50  ;;  %v4176_v3 = vsel %vm4112_vm6, %v4048_v63, 1.0  ;;  %vm4117_vm11 = vcmp.gt.f32.partialorder %v4053_v30, 0.0  ;;  %v4054_v50 = vld [vmem:[#allocation3 + $0x190] sm:$0xff] }
 0x4a8   : > { %4551 = vperm.xlu0 %5303, %v5635_v14   ;;  %v3539_v18 = vmul.f32 %v3438_v8, %v3155_v29  ;;  %5646 = vrcp.f32 %v4183_v9  ;;  %v4064_v14 = vld [vmem:[#allocation3 + $0x1e0] sm:$0xff]  ;;  %v4262_v9 = vld [vmem:[#allocation4 + $0x10] sm:$0xff]  ;;  %vm4118_vm12 = vcmp.gt.f32.partialorder %v4054_v50, 0.0 }
 0x4a9   : > { %v3463_v38 = vpop.permute.xlu2 %3462  ;;  %v4272_v8 = vld [vmem:[#allocation4 + $0x60] sm:$0xff]  ;;  %vm4128_vm10 = vcmp.gt.f32.partialorder %v4064_v14, 0.0  ;;  %v4278_v63 = vld [vmem:[#allocation4 + $0x90] sm:$0xff] }
 0x4aa   : > { %v3544_v58 = vmul.f32 %v3463_v38, %v3160_v1  ;;  %v4342_v15 = vpop.permute.xlu0 %4341  ;;  %v4264_v1 = vld [vmem:[#allocation4 + $0x20] sm:$0xff] }
 0x4ab   : > { %v4647_v48 = vmul.f32 %v4342_v15, %v4263_v52  ;;  %v5641_v11 = vpop.eup %5640  ;;  %v4267_v15 = vld [vmem:[#allocation4 + $0x38] sm:$0xff] }
 0x4ac   : > { %v3868_v61 = vadd.f32 %v8342_v54, %v3544_v58  ;;  %v3863_v54 = vadd.f32 %v8295_v25, %v3539_v18  ;;  %v4172_v25 = vsel %vm4108_vm2, %v4044_v59, 1.0  ;;  %v5643_v10 = vpop.eup %5642  ;;  %v4051_v58 = vld [vmem:[#allocation3 + $0x178] sm:$0xff] }
 0x4ad   : > { %4711 = vst.msk [vmem:[%s8369_s9 + $0x18] sm:$0xff] %vm592_vm0, %v4647_v48  ;;  %4501 = vperm.xlu1 %5301, %v5639_v40   ;;  %5648 = vrcp.f32 %v4172_v25  ;;  %v5645_v23 = vpop.eup %5644  ;;  %vm4115_vm9 = vcmp.gt.f32.partialorder %v4051_v58, 0.0  ;;  %v4275_v25 = vld [vmem:[#allocation4 + $0x78] sm:$0xff] }
 0x4ae   : > { %3932 = vst.msk [vmem:[#allocation4 + $0x1d8] sm:$0xff] %vm592_vm0, %v3868_v61  ;;  %4496 = vperm.xlu2 %5302, %v5637_v62   ;;  %v5647_v28 = vpop.eup %5646  ;;  %5650 = vrcp.f32 %v4173_v21  ;;  %v3806_v62 = vpop.f32.mrf.mxu3 }
 0x4af   : > { %3927 = vst.msk [vmem:[#allocation4 + $0x1b0] sm:$0xff] %vm592_vm0, %v3863_v54  ;;  %v3453_v32 = vpop.permute.xlu1 %3452  ;;  %5652 = vrcp.f32 %v4186_v34  ;;  %v4059_v34 = vld [vmem:[#allocation3 + $0x1b8] sm:$0xff] }
 0x4b0   : > { %4566 = vperm.xlu0 %5303, %v5641_v11   ;;  %v3542_v26 = vmul.f32 %v3453_v32, %v3158_v35  ;;  %vm4123_vm1 = vcmp.gt.f32.partialorder %v4059_v34, 0.0 }
 0x4b1   : > { %v3478_v22 = vpop.permute.xlu2 %3477 }
 0x4b2   : > { %v3547_v20 = vmul.f32 %v3478_v22, %v3163_v42  ;;  %v4357_v45 = vpop.permute.xlu0 %4356  ;;  %v3866_v47 = vadd.f32 %v8325_v16, %v3542_v26  ;;  %v4175_v16 = vsel %vm4111_vm5, %v4047_v60, 1.0  ;;  %v4179_v42 = vsel %vm4115_vm9, %v4051_v58, 1.0  ;;  %v4270_v26 = vld [vmem:[#allocation4 + $0x50] sm:$0xff] }
 0x4b3   : > { %v4650_v55 = vmul.f32 %v4357_v45, %v4266_v13  ;;  %v5649_v43 = vpop.eup %5648  ;;  %5654 = vrcp.f32 %v4175_v16  ;;  %v4192_v22 = vsel %vm4128_vm10, %v4064_v14, 1.0  ;;  %v4182_v60 = vsel %vm4118_vm12, %v4054_v50, 1.0  ;;  %v4063_v14 = vld [vmem:[#allocation3 + $0x1d8] sm:$0xff] }
 0x4b4   : > { %v3871_v12 = vadd.f32 %v3803_v36, %v3547_v20  ;;  %3930 = vst.msk [vmem:[#allocation4 + $0x1c8] sm:$0xff] %vm592_vm0, %v3866_v47  ;;  %v5651_v31 = vpop.eup %5650  ;;  %5656 = vrcp.f32 %v4176_v3  ;;  %v4181_v20 = vsel %vm4117_vm11, %v4053_v30, 1.0  ;;  %v4195_v47 = vsel %vm4131_vm13, %v4067_v27, 1.0 }
 0x4b5   : > { %4714 = vst.msk [vmem:[%s8369_s9 + $0x30] sm:$0xff] %vm592_vm0, %v4650_v55  ;;  %4516 = vperm.xlu1 %5301, %v5645_v23   ;;  %v5653_v29 = vpop.eup %5652  ;;  %5658 = vrcp.f32 %v4189_v44  ;;  %v4057_v55 = vld [vmem:[#allocation3 + $0x1a8] sm:$0xff]  ;;  %vm4127_vm4 = vcmp.gt.f32.partialorder %v4063_v14, 0.0 }
 0x4b6   : > { %3935 = vst.msk [vmem:[#allocation4 + $0x1f0] sm:$0xff] %vm592_vm0, %v3871_v12  ;;  %4511 = vperm.xlu2 %5302, %v5643_v10   ;;  %v4056_v12 = vld [vmem:[#allocation3 + $0x1a0] sm:$0xff]  ;;  %v4265_v23 = vld [vmem:[#allocation4 + $0x28] sm:$0xff]  ;;  %vm4121_vm15 = vcmp.gt.f32.partialorder %v4057_v55, 0.0 }
 0x4b7   : > { %v3468_v41 = vpop.permute.xlu1 %3467  ;;  %vm4120_vm14 = vcmp.gt.f32.partialorder %v4056_v12, 0.0  ;;  %v4185_v4 = vsel %vm4121_vm15, %v4057_v55, 1.0 }
 0x4b8   : > { %4581 = vperm.xlu0 %5303, %v5647_v28   ;;  %v3545_v39 = vmul.f32 %v3468_v41, %v3161_v46  ;;  %v4273_v41 = vld [vmem:[#allocation4 + $0x68] sm:$0xff] }
 0x4b9   : > { %v4332_v51 = vpop.permute.xlu2 %4331  ;;  %v5655_v57 = vpop.eup %5654 }
 0x4ba   : > { %v4645_v5 = vmul.f32 %v4332_v51, %v4261_v7  ;;  %v4372_v19 = vpop.permute.xlu0 %4371  ;;  %v3869_v37 = vadd.f32 %v8351_v56, %v3545_v39  ;;  %v4178_v56 = vsel %vm4114_vm8, %v4050_v6, 1.0  ;;  %v5657_v54 = vpop.eup %5656  ;;  %v4184_v51 = vsel %vm4120_vm14, %v4056_v12, 1.0 }
 0x4bb   : > { %v4653_v24 = vmul.f32 %v4372_v19, %v4269_v0  ;;  %5660 = vrcp.f32 %v4178_v56  ;;  %v5659_v40 = vpop.eup %5658  ;;  %v4060_v0 = vld [vmem:[#allocation3 + $0x1c0] sm:$0xff] }
 0x4bc   : > { %4709 = vst.msk [vmem:[%s8369_s9 + $0x8] sm:$0xff] %vm592_vm0, %v4645_v5  ;;  %5662 = vrcp.f32 %v4179_v42  ;;  %vm4124_vm2 = vcmp.gt.f32.partialorder %v4060_v0, 0.0 }
 0x4bd   : > { %3933 = vst.msk [vmem:[#allocation4 + $0x1e0] sm:$0xff] %vm592_vm0, %v3869_v37  ;;  %4531 = vperm.xlu1 %5301, %v5651_v31   ;;  %5664 = vrcp.f32 %v4192_v22  ;;  %v4187_v37 = vsel %vm4123_vm1, %v4059_v34, 1.0  ;;  %v4062_v31 = vld [vmem:[#allocation3 + $0x1d0] sm:$0xff]  ;;  %v4188_v56 = vsel %vm4124_vm2, %v4060_v0, 1.0 }
 0x4be   : > { %4526 = vperm.xlu2 %5302, %v5649_v43   ;;  %4717 = vst.msk [vmem:[%s8369_s9 + $0x48] sm:$0xff] %vm592_vm0, %v4653_v24  ;;  %5666 = vrcp.f32 %v4181_v20  ;;  %vm4126_vm3 = vcmp.gt.f32.partialorder %v4062_v31, 0.0 }
 0x4bf   : > { %v3483_v17 = vpop.permute.xlu1 %3482  ;;  %5668 = vrcp.f32 %v4182_v60 }
 0x4c0   : > { %4596 = vperm.xlu0 %5303, %v5653_v29   ;;  %v3548_v61 = vmul.f32 %v3483_v17, %v3164_v33  ;;  %5670 = vrcp.f32 %v4195_v47  ;;  %v4276_v29 = vld [vmem:[#allocation4 + $0x80] sm:$0xff] }
 0x4c1   : > { %v4347_v2 = vpop.permute.xlu2 %4346  ;;  %v5661_v36 = vpop.eup %5660  ;;  %5672 = vrcp.f32 %v4184_v51 }
 0x4c2   : > { %v4648_v38 = vmul.f32 %v4347_v2, %v4264_v1  ;;  %v4387_v53 = vpop.permute.xlu0 %4386  ;;  %v3872_v18 = vadd.f32 %v3806_v62, %v3548_v61  ;;  %v5663_v13 = vpop.eup %5662  ;;  %5674 = vrcp.f32 %v4185_v4  ;;  %v4268_v2 = vld [vmem:[#allocation4 + $0x40] sm:$0xff]  ;;  %v4190_v61 = vsel %vm4126_vm3, %v4062_v31, 1.0  ;;  %v4271_v62 = vld [vmem:[#allocation4 + $0x58] sm:$0xff] }
 0x4c3   : > { %v4656_v59 = vmul.f32 %v4387_v53, %v4272_v8  ;;  %v5665_v7 = vpop.eup %5664  ;;  %5676 = vrcp.f32 %v4187_v37 }
 0x4c4   : > { %4712 = vst.msk [vmem:[%s8369_s9 + $0x20] sm:$0xff] %vm592_vm0, %v4648_v38  ;;  %v5667_v21 = vpop.eup %5666  ;;  %v4281_v38 = vld [vmem:[#allocation4 + $0xa8] sm:$0xff]  ;;  %5678 = vrcp.f32 %v4188_v56  ;;  %v4299_v56 = vld [vmem:[#allocation4 + $0x138] sm:$0xff] }
 0x4c5   : > { %3936 = vst.msk [vmem:[#allocation4 + $0x1f8] sm:$0xff] %vm592_vm0, %v3872_v18  ;;  %4546 = vperm.xlu1 %5301, %v5657_v54   ;;  %v5669_v39 = vpop.eup %5668  ;;  %v4065_v18 = vld [vmem:[#allocation3 + $0x1e8] sm:$0xff]  ;;  %5680 = vrcp.f32 %v4190_v61  ;;  %v4279_v54 = vld [vmem:[#allocation4 + $0x98] sm:$0xff]  ;;  %v4294_v61 = vld [vmem:[#allocation4 + $0x110] sm:$0xff] }
 0x4c6   : > { %4541 = vperm.xlu2 %5302, %v5655_v57   ;;  %4720 = vst.msk [vmem:[%s8369_s9 + $0x60] sm:$0xff] %vm592_vm0, %v4656_v59  ;;  %v5671_v19 = vpop.eup %5670  ;;  %v4284_v59 = vld [vmem:[#allocation4 + $0xc0] sm:$0xff]  ;;  %vm4129_vm5 = vcmp.gt.f32.partialorder %v4065_v18, 0.0 }
 0x4c7   : > { %v4337_v35 = vpop.permute.xlu1 %4336  ;;  %v5673_v24 = vpop.eup %5672  ;;  %v4193_v20 = vsel %vm4129_vm5, %v4065_v18, 1.0  ;;  %v4302_v18 = vld [vmem:[#allocation4 + $0x150] sm:$0xff] }
 0x4c8   : > { %4611 = vperm.xlu0 %5303, %v5659_v40   ;;  %v4646_v11 = vmul.f32 %v4337_v35, %v4262_v9  ;;  %v5675_v57 = vpop.eup %5674  ;;  %v4066_v40 = vld [vmem:[#allocation3 + $0x1f0] sm:$0xff] }
 0x4c9   : > { %v4362_v52 = vpop.permute.xlu2 %4361  ;;  %v5677_v30 = vpop.eup %5676  ;;  %v4274_v35 = vld [vmem:[#allocation4 + $0x70] sm:$0xff]  ;;  %vm4130_vm6 = vcmp.gt.f32.partialorder %v4066_v40, 0.0 }
 0x4ca   : > { %v4651_v48 = vmul.f32 %v4362_v52, %v4267_v15  ;;  %v4402_v10 = vpop.permute.xlu0 %4401  ;;  %4710 = vst.msk [vmem:[%s8369_s9 + $0x10] sm:$0xff] %vm592_vm0, %v4646_v11  ;;  %v5679_v22 = vpop.eup %5678  ;;  %v4287_v11 = vld [vmem:[#allocation4 + $0xd8] sm:$0xff] }
 0x4cb   : > { %v4659_v32 = vmul.f32 %v4402_v10, %v4275_v25 }
 0x4cc   : > { %4715 = vst.msk [vmem:[%s8369_s9 + $0x38] sm:$0xff] %vm592_vm0, %v4651_v48  ;;  %v4191_v48 = vsel %vm4127_vm4, %v4063_v14, 1.0 }
 0x4cd   : > { %4723 = vst.msk [vmem:[%s8369_s9 + $0x78] sm:$0xff] %vm592_vm0, %v4659_v32  ;;  %4561 = vperm.xlu1 %5301, %v5663_v13   ;;  %5682 = vrcp.f32 %v4191_v48  ;;  %v4282_v32 = vld [vmem:[#allocation4 + $0xb0] sm:$0xff]  ;;  %v4292_v48 = vld [vmem:[#allocation4 + $0x100] sm:$0xff] }
 0x4ce   : > { %4556 = vperm.xlu2 %5302, %v5661_v36   ;;  %v5681_v36 = vpop.eup %5680  ;;  %5684 = vrcp.f32 %v4193_v20 }
 0x4cf   : > { %v4352_v5 = vpop.permute.xlu1 %4351 }
 0x4d0   : > { %4626 = vperm.xlu0 %5303, %v5665_v7   ;;  %v4649_v46 = vmul.f32 %v4352_v5, %v4265_v23  ;;  %v4290_v7 = vld [vmem:[#allocation4 + $0xf0] sm:$0xff]  ;;  %v4285_v5 = vld [vmem:[#allocation4 + $0xc8] sm:$0xff] }
 0x4d1   : > { %v4377_v49 = vpop.permute.xlu2 %4376 }
 0x4d2   : > { %v4654_v45 = vmul.f32 %v4377_v49, %v4270_v26  ;;  %v4417_v28 = vpop.permute.xlu0 %4416  ;;  %4713 = vst.msk [vmem:[%s8369_s9 + $0x28] sm:$0xff] %vm592_vm0, %v4649_v46  ;;  %v4194_v49 = vsel %vm4130_vm6, %v4066_v40, 1.0  ;;  %v4305_v40 = vld [vmem:[#allocation4 + $0x168] sm:$0xff] }
 0x4d3   : > { %v4662_v16 = vmul.f32 %v4417_v28, %v4278_v63  ;;  %v5683_v26 = vpop.eup %5682  ;;  %5686 = vrcp.f32 %v4194_v49  ;;  %v4280_v63 = vld [vmem:[#allocation4 + $0xa0] sm:$0xff] }
 0x4d4   : > { %4718 = vst.msk [vmem:[%s8369_s9 + $0x50] sm:$0xff] %vm592_vm0, %v4654_v45  ;;  %v5685_v13 = vpop.eup %5684  ;;  %v4277_v45 = vld [vmem:[#allocation4 + $0x88] sm:$0xff] }
 0x4d5   : > { %4726 = vst.msk [vmem:[%s8369_s9 + $0x90] sm:$0xff] %vm592_vm0, %v4662_v16  ;;  %4576 = vperm.xlu1 %5301, %v5669_v39  }
 0x4d6   : > { %4571 = vperm.xlu2 %5302, %v5667_v21  }
 0x4d7   : > { %v4367_v1 = vpop.permute.xlu1 %4366 }
 0x4d8   : > { %4641 = vperm.xlu0 %5303, %v5671_v19   ;;  %v4652_v3 = vmul.f32 %v4367_v1, %v4268_v2  ;;  %v4283_v19 = vld [vmem:[#allocation4 + $0xb8] sm:$0xff]  ;;  %v4296_v2 = vld [vmem:[#allocation4 + $0x120] sm:$0xff] }
 0x4d9   : > { %v4392_v43 = vpop.permute.xlu2 %4391  ;;  %v5687_v46 = vpop.eup %5686 }
 0x4da   : > { %v4657_v6 = vmul.f32 %v4392_v43, %v4273_v41  ;;  %v4432_v33 = vpop.permute.xlu0 %4431  ;;  %4716 = vst.msk [vmem:[%s8369_s9 + $0x40] sm:$0xff] %vm592_vm0, %v4652_v3  ;;  %v4293_v43 = vld [vmem:[#allocation4 + $0x108] sm:$0xff] }
 0x4db   : > { %v4665_v44 = vmul.f32 %v4432_v33, %v4281_v38  ;;  %v4291_v38 = vld [vmem:[#allocation4 + $0xf8] sm:$0xff] }
 0x4dc   : > { %4721 = vst.msk [vmem:[%s8369_s9 + $0x68] sm:$0xff] %vm592_vm0, %v4657_v6  ;;  %v4288_v6 = vld [vmem:[#allocation4 + $0xe0] sm:$0xff] }
 0x4dd   : > { %4729 = vst.msk [vmem:[%s8369_s9 + $0xa8] sm:$0xff] %vm592_vm0, %v4665_v44  ;;  %4591 = vperm.xlu1 %5301, %v5675_v57   ;;  %v4286_v44 = vld [vmem:[#allocation4 + $0xd0] sm:$0xff] }
 0x4de   : > { %4586 = vperm.xlu2 %5302, %v5673_v24  }
 0x4df   : > { %v4382_v8 = vpop.permute.xlu1 %4381 }
 0x4e0   : > { %v4655_v53 = vmul.f32 %v4382_v8, %v4271_v62  ;;  %v4289_v62 = vld [vmem:[#allocation4 + $0xe8] sm:$0xff] }
 0x4e1   : > { %v4407_v58 = vpop.permute.xlu2 %4406 }
 0x4e2   : > { %v4660_v17 = vmul.f32 %v4407_v58, %v4276_v29  ;;  %v4447_v52 = vpop.permute.xlu0 %4446  ;;  %4719 = vst.msk [vmem:[%s8369_s9 + $0x58] sm:$0xff] %vm592_vm0, %v4655_v53 }
 0x4e3   : > { %v4668_v15 = vmul.f32 %v4447_v52, %v4284_v59 }
 0x4e4   : > { %4724 = vst.msk [vmem:[%s8369_s9 + $0x80] sm:$0xff] %vm592_vm0, %v4660_v17 }
 0x4e5   : > { %4732 = vst.msk [vmem:[%s8369_s9 + $0xc0] sm:$0xff] %vm592_vm0, %v4668_v15  ;;  %4606 = vperm.xlu1 %5301, %v5679_v22  }
 0x4e6   : > { %4601 = vperm.xlu2 %5302, %v5677_v30  }
 0x4e7   : > { %v4397_v9 = vpop.permute.xlu1 %4396 }
 0x4e8   : > { %v4658_v27 = vmul.f32 %v4397_v9, %v4274_v35  ;;  %v4300_v9 = vld [vmem:[#allocation4 + $0x140] sm:$0xff] }
 0x4e9   : > { %v4422_v42 = vpop.permute.xlu2 %4421 }
 0x4ea   : > { %v4663_v50 = vmul.f32 %v4422_v42, %v4279_v54  ;;  %v4462_v12 = vpop.permute.xlu0 %4461  ;;  %4722 = vst.msk [vmem:[%s8369_s9 + $0x70] sm:$0xff] %vm592_vm0, %v4658_v27  ;;  %v4297_v42 = vld [vmem:[#allocation4 + $0x128] sm:$0xff] }
 0x4eb   : > { %v4671_v25 = vmul.f32 %v4462_v12, %v4287_v11  ;;  %v4295_v11 = vld [vmem:[#allocation4 + $0x118] sm:$0xff] }
 0x4ec   : > { %4727 = vst.msk [vmem:[%s8369_s9 + $0x98] sm:$0xff] %vm592_vm0, %v4663_v50 }
 0x4ed   : > { %4735 = vst.msk [vmem:[%s8369_s9 + $0xd8] sm:$0xff] %vm592_vm0, %v4671_v25  ;;  %4621 = vperm.xlu1 %5301, %v5683_v26  }
 0x4ee   : > { %4616 = vperm.xlu2 %5302, %v5681_v36  }
 0x4ef   : > { %v4412_v47 = vpop.permute.xlu1 %4411 }
 0x4f0   : > { %v4661_v55 = vmul.f32 %v4412_v47, %v4277_v45  ;;  %v4298_v45 = vld [vmem:[#allocation4 + $0x130] sm:$0xff] }
 0x4f1   : > { %v4437_v10 = vpop.permute.xlu2 %4436 }
 0x4f2   : > { %v4666_v60 = vmul.f32 %v4437_v10, %v4282_v32  ;;  %v4477_v51 = vpop.permute.xlu0 %4476  ;;  %4725 = vst.msk [vmem:[%s8369_s9 + $0x88] sm:$0xff] %vm592_vm0, %v4661_v55  ;;  %v4308_v10 = vld [vmem:[#allocation4 + $0x180] sm:$0xff] }
 0x4f3   : > { %v4674_v21 = vmul.f32 %v4477_v51, %v4290_v7  ;;  %v4311_v7 = vld [vmem:[#allocation4 + $0x198] sm:$0xff] }
 0x4f4   : > { %4730 = vst.msk [vmem:[%s8369_s9 + $0xb0] sm:$0xff] %vm592_vm0, %v4666_v60  ;;  %v4303_v60 = vld [vmem:[#allocation4 + $0x158] sm:$0xff] }
 0x4f5   : > { %4738 = vst.msk [vmem:[%s8369_s9 + $0xf0] sm:$0xff] %vm592_vm0, %v4674_v21  ;;  %4636 = vperm.xlu1 %5301, %v5687_v46  }
 0x4f6   : > { %4631 = vperm.xlu2 %5302, %v5685_v13  }
 0x4f7   : > { %v4427_v28 = vpop.permute.xlu1 %4426 }
 0x4f8   : > { %v4664_v16 = vmul.f32 %v4427_v28, %v4280_v63 }
 0x4f9   : > { %v4452_v23 = vpop.permute.xlu2 %4451 }
 0x4fa   : > { %v4669_v34 = vmul.f32 %v4452_v23, %v4285_v5  ;;  %v4492_v41 = vpop.permute.xlu0 %4491  ;;  %4728 = vst.msk [vmem:[%s8369_s9 + $0xa0] sm:$0xff] %vm592_vm0, %v4664_v16  ;;  %v4306_v5 = vld [vmem:[#allocation4 + $0x170] sm:$0xff] }
 0x4fb   : > { %v4677_v4 = vmul.f32 %v4492_v41, %v4293_v43  ;;  %v4314_v16 = vld [vmem:[#allocation4 + $0x1b0] sm:$0xff] }
 0x4fc   : > { %4733 = vst.msk [vmem:[%s8369_s9 + $0xc8] sm:$0xff] %vm592_vm0, %v4669_v34  ;;  %v4301_v34 = vld [vmem:[#allocation4 + $0x148] sm:$0xff] }
 0x4fd   : > { %4741 = vst.msk [vmem:[%s8369_s9 + $0x108] sm:$0xff] %vm592_vm0, %v4677_v4 }
 0x4ff   : > { %v4442_v37 = vpop.permute.xlu1 %4441 }
 0x500   : > { %v4667_v24 = vmul.f32 %v4442_v37, %v4283_v19 }
 0x501   : > { %v4467_v39 = vpop.permute.xlu2 %4466 }
 0x502   : > { %v4672_v0 = vmul.f32 %v4467_v39, %v4288_v6  ;;  %v4507_v1 = vpop.permute.xlu0 %4506  ;;  %4731 = vst.msk [vmem:[%s8369_s9 + $0xb8] sm:$0xff] %vm592_vm0, %v4667_v24  ;;  %v4309_v39 = vld [vmem:[#allocation4 + $0x188] sm:$0xff] }
 0x503   : > { %v4680_v3 = vmul.f32 %v4507_v1, %v4296_v2  ;;  %v4317_v24 = vld [vmem:[#allocation4 + $0x1c8] sm:$0xff] }
 0x504   : > { %4736 = vst.msk [vmem:[%s8369_s9 + $0xe0] sm:$0xff] %vm592_vm0, %v4672_v0  ;;  %v4304_v0 = vld [vmem:[#allocation4 + $0x160] sm:$0xff] }
 0x505   : > { %4744 = vst.msk [vmem:[%s8369_s9 + $0x120] sm:$0xff] %vm592_vm0, %v4680_v3 }
 0x507   : > { %v4457_v58 = vpop.permute.xlu1 %4456 }
 0x508   : > { %v4670_v29 = vmul.f32 %v4457_v58, %v4286_v44 }
 0x509   : > { %v4482_v31 = vpop.permute.xlu2 %4481 }
 0x50a   : > { %v4675_v33 = vmul.f32 %v4482_v31, %v4291_v38  ;;  %v4522_v57 = vpop.permute.xlu0 %4521  ;;  %4734 = vst.msk [vmem:[%s8369_s9 + $0xd0] sm:$0xff] %vm592_vm0, %v4670_v29  ;;  %v4312_v31 = vld [vmem:[#allocation4 + $0x1a0] sm:$0xff] }
 0x50b   : > { %v4683_v17 = vmul.f32 %v4522_v57, %v4299_v56  ;;  %v4320_v29 = vld [vmem:[#allocation4 + $0x1e0] sm:$0xff] }
 0x50c   : > { %4739 = vst.msk [vmem:[%s8369_s9 + $0xf8] sm:$0xff] %vm592_vm0, %v4675_v33  ;;  %v4307_v33 = vld [vmem:[#allocation4 + $0x178] sm:$0xff] }
 0x50d   : > { %4747 = vst.msk [vmem:[%s8369_s9 + $0x138] sm:$0xff] %vm592_vm0, %v4683_v17 }
 0x50f   : > { %v4472_v8 = vpop.permute.xlu1 %4471 }
 0x510   : > { %v4673_v53 = vmul.f32 %v4472_v8, %v4289_v62 }
 0x511   : > { %v4497_v14 = vpop.permute.xlu2 %4496 }
 0x512   : > { %v4678_v30 = vmul.f32 %v4497_v14, %v4294_v61  ;;  %v4537_v59 = vpop.permute.xlu0 %4536  ;;  %4737 = vst.msk [vmem:[%s8369_s9 + $0xe8] sm:$0xff] %vm592_vm0, %v4673_v53  ;;  %v4315_v14 = vld [vmem:[#allocation4 + $0x1b8] sm:$0xff] }
 0x513   : > { %v4686_v52 = vmul.f32 %v4537_v59, %v4302_v18  ;;  %v4323_v53 = vld [vmem:[#allocation4 + $0x1f8] sm:$0xff] }
 0x514   : > { %4742 = vst.msk [vmem:[%s8369_s9 + $0x110] sm:$0xff] %vm592_vm0, %v4678_v30  ;;  %v4310_v30 = vld [vmem:[#allocation4 + $0x190] sm:$0xff] }
 0x515   : > { %4750 = vst.msk [vmem:[%s8369_s9 + $0x150] sm:$0xff] %vm592_vm0, %v4686_v52 }
 0x517   : > { %v4487_v22 = vpop.permute.xlu1 %4486 }
 0x518   : > { %v4676_v50 = vmul.f32 %v4487_v22, %v4292_v48 }
 0x519   : > { %v4512_v15 = vpop.permute.xlu2 %4511 }
 0x51a   : > { %v4681_v54 = vmul.f32 %v4512_v15, %v4297_v42  ;;  %v4552_v20 = vpop.permute.xlu0 %4551  ;;  %4740 = vst.msk [vmem:[%s8369_s9 + $0x100] sm:$0xff] %vm592_vm0, %v4676_v50  ;;  %v4318_v15 = vld [vmem:[#allocation4 + $0x1d0] sm:$0xff] }
 0x51b   : > { %v4689_v36 = vmul.f32 %v4552_v20, %v4305_v40  ;;  %v4321_v40 = vld [vmem:[#allocation4 + $0x1e8] sm:$0xff] }
 0x51c   : > { %4745 = vst.msk [vmem:[%s8369_s9 + $0x128] sm:$0xff] %vm592_vm0, %v4681_v54  ;;  %v4313_v54 = vld [vmem:[#allocation4 + $0x1a8] sm:$0xff] }
 0x51d   : > { %4753 = vst.msk [vmem:[%s8369_s9 + $0x168] sm:$0xff] %vm592_vm0, %v4689_v36  ;;  %v4316_v36 = vld [vmem:[#allocation4 + $0x1c0] sm:$0xff] }
 0x51f   : > { %v4502_v12 = vpop.permute.xlu1 %4501 }
 0x520   : > { %v4679_v25 = vmul.f32 %v4502_v12, %v4295_v11 }
 0x521   : > { %v4527_v35 = vpop.permute.xlu2 %4526 }
 0x522   : > { %v4684_v27 = vmul.f32 %v4527_v35, %v4300_v9  ;;  %v4567_v32 = vpop.permute.xlu0 %4566  ;;  %4743 = vst.msk [vmem:[%s8369_s9 + $0x118] sm:$0xff] %vm592_vm0, %v4679_v25  ;;  %v4322_v25 = vld [vmem:[#allocation4 + $0x1f0] sm:$0xff] }
 0x523   : > { %v4692_v49 = vmul.f32 %v4567_v32, %v4308_v10 }
 0x524   : > { %4748 = vst.msk [vmem:[%s8369_s9 + $0x140] sm:$0xff] %vm592_vm0, %v4684_v27  ;;  %v4319_v27 = vld [vmem:[#allocation4 + $0x1d8] sm:$0xff] }
 0x525   : > { %4756 = vst.msk [vmem:[%s8369_s9 + $0x180] sm:$0xff] %vm592_vm0, %v4692_v49 }
 0x527   : > { %v4517_v47 = vpop.permute.xlu1 %4516 }
 0x528   : > { %v4682_v55 = vmul.f32 %v4517_v47, %v4298_v45 }
 0x529   : > { %v4542_v26 = vpop.permute.xlu2 %4541 }
 0x52a   : > { %v4687_v13 = vmul.f32 %v4542_v26, %v4303_v60  ;;  %v4582_v51 = vpop.permute.xlu0 %4581  ;;  %4746 = vst.msk [vmem:[%s8369_s9 + $0x130] sm:$0xff] %vm592_vm0, %v4682_v55 }
 0x52b   : > { %v4695_v21 = vmul.f32 %v4582_v51, %v4311_v7 }
 0x52c   : > { %4751 = vst.msk [vmem:[%s8369_s9 + $0x158] sm:$0xff] %vm592_vm0, %v4687_v13 }
 0x52d   : > { %4759 = vst.msk [vmem:[%s8369_s9 + $0x198] sm:$0xff] %vm592_vm0, %v4695_v21 }
 0x52f   : > { %v4532_v63 = vpop.permute.xlu1 %4531 }
 0x530   : > { %v4685_v28 = vmul.f32 %v4532_v63, %v4301_v34 }
 0x531   : > { %v4557_v23 = vpop.permute.xlu2 %4556 }
 0x532   : > { %v4690_v46 = vmul.f32 %v4557_v23, %v4306_v5  ;;  %v4597_v43 = vpop.permute.xlu0 %4596  ;;  %4749 = vst.msk [vmem:[%s8369_s9 + $0x148] sm:$0xff] %vm592_vm0, %v4685_v28 }
 0x533   : > { %v4698_v41 = vmul.f32 %v4597_v43, %v4314_v16 }
 0x534   : > { %4754 = vst.msk [vmem:[%s8369_s9 + $0x170] sm:$0xff] %vm592_vm0, %v4690_v46 }
 0x535   : > { %4762 = vst.msk [vmem:[%s8369_s9 + $0x1b0] sm:$0xff] %vm592_vm0, %v4698_v41 }
 0x537   : > { %v4547_v19 = vpop.permute.xlu1 %4546 }
 0x538   : > { %v4688_v37 = vmul.f32 %v4547_v19, %v4304_v0 }
 0x539   : > { %v4572_v4 = vpop.permute.xlu2 %4571 }
 0x53a   : > { %v4693_v6 = vmul.f32 %v4572_v4, %v4309_v39  ;;  %v4612_v2 = vpop.permute.xlu0 %4611  ;;  %4752 = vst.msk [vmem:[%s8369_s9 + $0x160] sm:$0xff] %vm592_vm0, %v4688_v37 }
 0x53b   : > { %v4701_v1 = vmul.f32 %v4612_v2, %v4317_v24 }
 0x53c   : > { %4757 = vst.msk [vmem:[%s8369_s9 + $0x188] sm:$0xff] %vm592_vm0, %v4693_v6 }
 0x53d   : > { %4765 = vst.msk [vmem:[%s8369_s9 + $0x1c8] sm:$0xff] %vm592_vm0, %v4701_v1 }
 0x53f   : > { %v4562_v44 = vpop.permute.xlu1 %4561 }
 0x540   : > { %v4691_v58 = vmul.f32 %v4562_v44, %v4307_v33 }
 0x541   : > { %v4587_v3 = vpop.permute.xlu2 %4586 }
 0x542   : > { %v4696_v38 = vmul.f32 %v4587_v3, %v4312_v31  ;;  %v4627_v56 = vpop.permute.xlu0 %4626  ;;  %4755 = vst.msk [vmem:[%s8369_s9 + $0x178] sm:$0xff] %vm592_vm0, %v4691_v58 }
 0x543   : > { %v4704_v57 = vmul.f32 %v4627_v56, %v4320_v29 }
 0x544   : > { %4760 = vst.msk [vmem:[%s8369_s9 + $0x1a0] sm:$0xff] %vm592_vm0, %v4696_v38 }
 0x545   : > { %4768 = vst.msk [vmem:[%s8369_s9 + $0x1e0] sm:$0xff] %vm592_vm0, %v4704_v57 }
 0x547   : > { %v4577_v62 = vpop.permute.xlu1 %4576 }
 0x548   : > { %v4694_v8 = vmul.f32 %v4577_v62, %v4310_v30 }
 0x549   : > { %v4602_v17 = vpop.permute.xlu2 %4601 }
 0x54a   : > { %v4699_v61 = vmul.f32 %v4602_v17, %v4315_v14  ;;  %v4642_v18 = vpop.permute.xlu0 %4641  ;;  %4758 = vst.msk [vmem:[%s8369_s9 + $0x190] sm:$0xff] %vm592_vm0, %v4694_v8 }
 0x54b   : > { %v4707_v59 = vmul.f32 %v4642_v18, %v4323_v53 }
 0x54c   : > { %4763 = vst.msk [vmem:[%s8369_s9 + $0x1b8] sm:$0xff] %vm592_vm0, %v4699_v61 }
 0x54d   : > { %4771 = vst.msk [vmem:[%s8369_s9 + $0x1f8] sm:$0xff] %vm592_vm0, %v4707_v59 }
 0x54f   : > { %v4592_v48 = vpop.permute.xlu1 %4591 }
 0x550   : > { %v4697_v22 = vmul.f32 %v4592_v48, %v4313_v54 }
 0x551   : > { %v4617_v52 = vpop.permute.xlu2 %4616 }
 0x552   : > { %v4702_v42 = vmul.f32 %v4617_v52, %v4318_v15  ;;  %4761 = vst.msk [vmem:[%s8369_s9 + $0x1a8] sm:$0xff] %vm592_vm0, %v4697_v22 }
 0x554   : > { %4766 = vst.msk [vmem:[%s8369_s9 + $0x1d0] sm:$0xff] %vm592_vm0, %v4702_v42 }
 0x557   : > { %v4607_v35 = vpop.permute.xlu1 %4606 }
 0x558   : > { %v4700_v9 = vmul.f32 %v4607_v35, %v4316_v36 }
 0x559   : > { %v4632_v50 = vpop.permute.xlu2 %4631 }
 0x55a   : > { %v4705_v20 = vmul.f32 %v4632_v50, %v4321_v40  ;;  %4764 = vst.msk [vmem:[%s8369_s9 + $0x1c0] sm:$0xff] %vm592_vm0, %v4700_v9 }
 0x55c   : > { %4769 = vst.msk [vmem:[%s8369_s9 + $0x1e8] sm:$0xff] %vm592_vm0, %v4705_v20 }
 0x55f   : > { %v4622_v11 = vpop.permute.xlu1 %4621 }
 0x560   : > { %v4703_v12 = vmul.f32 %v4622_v11, %v4319_v27 }
 0x562   : > { %4767 = vst.msk [vmem:[%s8369_s9 + $0x1d8] sm:$0xff] %vm592_vm0, %v4703_v12 }
 0x567   : > { %v4637_v10 = vpop.permute.xlu1 %4636 }
 0x568   : > { %v4706_v32 = vmul.f32 %v4637_v10, %v4322_v25 }
 0x56a   : > { %4770 = vst.msk [vmem:[%s8369_s9 + $0x1f0] sm:$0xff] %vm592_vm0, %v4706_v32 }
 0x56b PF: > { %s14_s17 = sadd.s32 1, %s5710_s17   ;;  %s9042_s15 = smov %s5706_s16 }
 0x56c   : > { %p11_p5 = scmp.ge.s32.totalorder %s14_s17, 4   ;;  %s9043_s16 = smov %s9045_s18 }
 0x56e   :  { %13 = sbr.rel (!%p11_p5) target bundleno = 2 (0x2), region = 83 }

</bundles_post_ra>
